<compile_context>
chip_gen: v6e
topology: v6e:2x2x1
jax: 0.10.0
libtpu: 0.0.40
codegen_flags: <defaults>
</compile_context>

<pallas_src>
import functools

import jax
import jax.numpy as jnp
from jax.experimental import pallas as pl
from jax.experimental.pallas import tpu as pltpu


def _clamp_vmem(need_bytes):
    return int(min(max(need_bytes, 32 * 2 ** 20), 96 * 2 ** 20))


# ------------------------ conv2d (3x3 pad=1 / 1x1), bf16 MXU ------------------------

def _conv_kernel(x_ref, w_ref, b_ref, o_ref, *, K, W, Wp, TR, relu):
    # x_ref : (1, Hp*Wp, Cin) f32   flattened zero-padded image (resident across row tiles)
    # w_ref : (K*K, Cin, Cout) bf16 tap weights
    # b_ref : (1, Cout) f32
    # o_ref : (1, TR, W, Cout) f32  NHWC output row tile
    Cout = w_ref.shape[2]
    Lt = (TR - 1) * Wp + W                 # flat length covering TR output rows
    row0 = pl.program_id(1) * TR           # first output row of this tile

    acc = jnp.zeros((Lt, Cout), jnp.float32)
    for ky in range(K):
        for kx in range(K):
            start = (row0 + ky) * Wp + kx
            patch = x_ref[0, pl.ds(start, Lt), :].astype(jnp.bfloat16)
            acc = acc + jnp.dot(patch, w_ref[ky * K + kx],
                                preferred_element_type=jnp.float32)

    out = acc + b_ref[...]
    if relu:
        out = jnp.maximum(out, 0.0)
    out = out.astype(o_ref.dtype)
    for r in range(TR):                    # drop the Wp-W wrap-around columns
        o_ref[0, r] = out[r * Wp:r * Wp + W]


def _pick_row_tile(H, W, Wp, Cout):
    """Largest row tile (divisor of H) whose f32 accumulator stays <= ~32 vregs."""
    budget = 32 * 1024                     # f32 elements (~128 KB)
    tr = 1
    for cand in (2, 4, 8, 16, 32):
        if cand > H or H % cand:
            continue
        if ((cand - 1) * Wp + W) * Cout <= budget:
            tr = cand
    return tr


def conv2d(x, w, b, *, relu):
    """x: (N,H,W,Cin) f32; w: (K*K,Cin,Cout) bf16; b: (1,Cout) f32.  Same-padding conv."""
    N, H, W, Cin = x.shape
    KK, wcin, Cout = w.shape
    assert wcin == Cin
    K = int(round(KK ** 0.5))
    pad = (K - 1) // 2
    Hp, Wp = H + 2 * pad, W + 2 * pad
    L = Hp * Wp
    TR = _pick_row_tile(H, W, Wp, Cout)

    xp = jnp.pad(x, ((0, 0), (pad, pad), (pad, pad), (0, 0))) if pad else x
    xf = xp.reshape(N, L, Cin)             # pure row-major reshape (no transpose)

    vmem = _clamp_vmem(2 * (L * Cin * 4 + KK * Cin * Cout * 2 + TR * W * Cout * 4)
                       + 8 * 2 ** 20)
    kern = functools.partial(_conv_kernel, K=K, W=W, Wp=Wp, TR=TR, relu=relu)
    return pl.pallas_call(
        kern,
        out_shape=jax.ShapeDtypeStruct((N, H, W, Cout), jnp.float32),
        grid=(N, H // TR),
        in_specs=[
            pl.BlockSpec((1, L, Cin), lambda n, t: (n, 0, 0)),
            pl.BlockSpec((KK, Cin, Cout), lambda n, t: (0, 0, 0)),
            pl.BlockSpec((1, Cout), lambda n, t: (0, 0)),
        ],
        out_specs=pl.BlockSpec((1, TR, W, Cout), lambda n, t: (n, t, 0, 0)),
        compiler_params=pltpu.CompilerParams(
            dimension_semantics=("parallel", "parallel"),
            vmem_limit_bytes=vmem,
        ),
    )(xf, w, b)


# ----------------------------- maxpool 2x2 stride 2 -----------------------------

def _maxpool_kernel(x_ref, o_ref):
    # x_ref: (1, 1, 2, Wo, 2*C) -- one output row; column pairs flattened into lanes
    C = x_ref.shape[-1] // 2
    m = jnp.maximum(x_ref[0, 0, 0], x_ref[0, 0, 1])     # max over the row pair
    o_ref[0, 0] = jnp.maximum(m[:, :C], m[:, C:])       # max over the column pair


def maxpool2x2(x):
    N, H, W, C = x.shape
    Ho, Wo = H // 2, W // 2
    xr = x.reshape(N, Ho, 2, Wo, 2 * C)    # pure reshape: no HBM transpose pass
    return pl.pallas_call(
        _maxpool_kernel,
        out_shape=jax.ShapeDtypeStruct((N, Ho, Wo, C), jnp.float32),
        grid=(N, Ho),
        in_specs=[pl.BlockSpec((1, 1, 2, Wo, 2 * C),
                               lambda n, h: (n, h, 0, 0, 0))],
        out_specs=pl.BlockSpec((1, 1, Wo, C), lambda n, h: (n, h, 0, 0)),
        compiler_params=pltpu.CompilerParams(
            dimension_semantics=("parallel", "parallel"),
            vmem_limit_bytes=_clamp_vmem(16 * Wo * C * 4 + 4 * 2 ** 20)),
    )(xr)


# ------------------- bilinear x2 upsample (align_corners=False) -------------------

def _upsample_kernel(x_ref, o_ref):
    # x_ref: (1, H, W, C); o_ref: (1, H, 2, W, 2*C) -- row-parity dim, col-parity in lanes
    C = x_ref.shape[-1]
    x = x_ref[0]
    up = jnp.concatenate([x[:1], x[:-1]], axis=0)       # x[max(h-1, 0)]
    dn = jnp.concatenate([x[1:], x[-1:]], axis=0)       # x[min(h+1, H-1)]
    for rp, p in ((0, 0.75 * x + 0.25 * up),            # even output rows
                  (1, 0.75 * x + 0.25 * dn)):           # odd output rows
        lf = jnp.concatenate([p[:, :1], p[:, :-1]], axis=1)
        rt = jnp.concatenate([p[:, 1:], p[:, -1:]], axis=1)
        o_ref[0, :, rp, :, :C] = 0.75 * p + 0.25 * lf   # even output cols
        o_ref[0, :, rp, :, C:] = 0.75 * p + 0.25 * rt   # odd output cols


def upsample_bilinear_2x(x):
    # TODO(synk): row-tile this kernel (like conv2d) for very large feature maps.
    N, H, W, C = x.shape
    out = pl.pallas_call(
        _upsample_kernel,
        out_shape=jax.ShapeDtypeStruct((N, H, 2, W, 2 * C), jnp.float32),
        grid=(N,),
        in_specs=[pl.BlockSpec((1, H, W, C), lambda n: (n, 0, 0, 0))],
        out_specs=pl.BlockSpec((1, H, 2, W, 2 * C),
                               lambda n: (n, 0, 0, 0, 0)),
        compiler_params=pltpu.CompilerParams(
            dimension_semantics=("parallel",),
            vmem_limit_bytes=_clamp_vmem(10 * H * W * C * 4 + 4 * 2 ** 20)),
    )(x)
    return out.reshape(N, 2 * H, 2 * W, C)  # pure reshape: interleave is in the layout


# ----------------------------- model definition -----------------------------

def init_params(key):
    """Deterministic He-init parameters for encoder (VGG16 features[:-1]) + decoder."""
    # TODO(synk): pretrained torchvision VGG16 weights are replaced by deterministic init.
    ops = []
    cin = 3
    enc = [64, 64, 'M', 128, 128, 'M', 256, 256, 256, 'M',
           512, 512, 512, 'M', 512, 512, 512]
    dec = [(512, 3, True), (512, 3, True), (512, 3, True), 'U',
           (512, 3, True), (512, 3, True), (512, 3, True), 'U',
           (256, 3, True), (256, 3, True), (256, 3, True), 'U',
           (128, 3, True), (128, 3, True), 'U',
           (64, 3, True), (64, 3, True), (1, 1, False)]

    def make_conv(key, cin, cout, k, relu):
        key, kw = jax.random.split(key)
        scale = (2.0 / (k * k * cin)) ** 0.5
        w = jax.random.normal(kw, (k * k, cin, cout), jnp.float32) * scale
        b = jnp.zeros((1, cout), jnp.float32)
        # Lane-dense output for the final Cout=1 layer: zero-pad to 128 channels so the
        # kernel stores full 128-lane vectors; glue slices channel 0 back out.
        if cout == 1:
            w = jnp.pad(w, ((0, 0), (0, 0), (0, 128 - cout)))
            b = jnp.pad(b, ((0, 0), (0, 128 - cout)))
        return key, ('conv', w.astype(jnp.bfloat16), b, relu, cout)

    for item in enc:
        if item == 'M':
            ops.append(('pool',))
        else:
            key, op = make_conv(key, cin, item, 3, True)
            ops.append(op)
            cin = item
    for item in dec:
        if item == 'U':
            ops.append(('up',))
        else:
            cout, k, relu = item
            key, op = make_conv(key, cin, cout, k, relu)
            ops.append(op)
            cin = cout
    return ops


def generator_forward(x_nchw, ops):
    """Forward pass of Generator: encoder -> decoder. In/out are NCHW like PyTorch."""
    x = jnp.transpose(x_nchw, (0, 2, 3, 1)).astype(jnp.float32)  # NCHW -> NHWC
    for op in ops:
        kind = op[0]
        if kind == 'conv':
            _, w, b, relu, true_cout = op
            x = conv2d(x, w, b, relu=relu)
            if x.shape[-1] != true_cout:          # drop lane-padding of the final layer
                x = x[..., :true_cout]
        elif kind == 'pool':
            x = maxpool2x2(x)
        else:  # 'up'
            x = upsample_bilinear_2x(x)
    return jnp.transpose(x, (0, 3, 1, 2))  # NHWC -> NCHW, shape (N, 1, H, W)


if __name__ == "__main__":
    key = jax.random.PRNGKey(0)
    kx, kp = jax.random.split(key)
    ops = init_params(kp)
    # spatial must be divisible by 16 (4 maxpools); 3 input channels (VGG16)
    x = jax.random.normal(kx, (2, 3, 32, 32), dtype=jnp.float32)
    y = generator_forward(x, ops)
    y = jax.block_until_ready(y)
    assert y.shape == (2, 1, 32, 32), y.shape
    assert bool(jnp.all(jnp.isfinite(y))), "non-finite output"
    print("KERNEL_OK")
</pallas_src>

<mosaic_0001>
module attributes {stable_mosaic.version = 11 : i64} {
  func.func @_conv_kernel(%arg0: i32, %arg1: i32, %arg2: memref<1x1156x3xf32, #tpu.memory_space<vmem>>, %arg3: memref<9x3x64xbf16, #tpu.memory_space<vmem>>, %arg4: memref<1x64xf32, #tpu.memory_space<vmem>>, %arg5: memref<1x8x32x64xf32, #tpu.memory_space<vmem>>) attributes {dimension_semantics = [#tpu.dimension_semantics<parallel>, #tpu.dimension_semantics<parallel>], iteration_bounds = array<i64: 2, 4>, scalar_prefetch = 0 : i64, scratch_operands = 0 : i64, tpu.core_type = #tpu.core_type<tc>, window_params = [{transform_indices = @transform_0, window_bounds = array<i64: 1, 1156, 3>}, {pipeline_mode = #tpu.pipeline_mode<synchronous>, transform_indices = @transform_1, window_bounds = array<i64: 9, 3, 64>}, {pipeline_mode = #tpu.pipeline_mode<synchronous>, transform_indices = @transform_2, window_bounds = array<i64: 1, 64>}, {transform_indices = @transform_3, window_bounds = array<i64: 1, 8, 32, 64>}]} {
    %c8_i32 = arith.constant 8 : i32
    %0 = arith.muli %arg1, %c8_i32 : i32
    %cst = arith.constant 0.000000e+00 : f32
    %1 = vector.broadcast %cst : f32 to vector<270x64xf32>
    %c0_i32 = arith.constant 0 : i32
    %2 = arith.addi %0, %c0_i32 : i32
    %c34_i32 = arith.constant 34 : i32
    %3 = arith.muli %2, %c34_i32 : i32
    %c0_i32_0 = arith.constant 0 : i32
    %4 = arith.addi %3, %c0_i32_0 : i32
    %c0 = arith.constant 0 : index
    %5 = arith.index_cast %4 : i32 to index
    %c0_1 = arith.constant 0 : index
    %6 = vector.load %arg2[%c0, %5, %c0_1] : memref<1x1156x3xf32, #tpu.memory_space<vmem>>, vector<1x270x3xf32>
    %7 = vector.shape_cast %6 : vector<1x270x3xf32> to vector<270x3xf32>
    %8 = arith.truncf %7 : vector<270x3xf32> to vector<270x3xbf16>
    %c0_2 = arith.constant 0 : index
    %c0_3 = arith.constant 0 : index
    %c0_4 = arith.constant 0 : index
    %9 = vector.load %arg3[%c0_2, %c0_3, %c0_4] : memref<9x3x64xbf16, #tpu.memory_space<vmem>>, vector<1x3x64xbf16>
    %10 = vector.shape_cast %9 : vector<1x3x64xbf16> to vector<3x64xbf16>
    %cst_5 = arith.constant dense<0.000000e+00> : vector<270x64xf32>
    %11 = tpu.matmul %8, %10, %cst_5 {dimension_numbers = #tpu.dot_dimension_numbers<[1], [0], [0], [1], [0, 0, 1, 1], [], []>} : vector<270x3xbf16>, vector<3x64xbf16>, vector<270x64xf32> -> vector<270x64xf32>
    %12 = arith.addf %1, %11 : vector<270x64xf32>
    %c0_i32_6 = arith.constant 0 : i32
    %13 = arith.addi %0, %c0_i32_6 : i32
    %c34_i32_7 = arith.constant 34 : i32
    %14 = arith.muli %13, %c34_i32_7 : i32
    %c1_i32 = arith.constant 1 : i32
    %15 = arith.addi %14, %c1_i32 : i32
    %c0_8 = arith.constant 0 : index
    %16 = arith.index_cast %15 : i32 to index
    %c0_9 = arith.constant 0 : index
    %17 = vector.load %arg2[%c0_8, %16, %c0_9] : memref<1x1156x3xf32, #tpu.memory_space<vmem>>, vector<1x270x3xf32>
    %18 = vector.shape_cast %17 : vector<1x270x3xf32> to vector<270x3xf32>
    %19 = arith.truncf %18 : vector<270x3xf32> to vector<270x3xbf16>
    %c1 = arith.constant 1 : index
    %c0_10 = arith.constant 0 : index
    %c0_11 = arith.constant 0 : index
    %20 = vector.load %arg3[%c1, %c0_10, %c0_11] : memref<9x3x64xbf16, #tpu.memory_space<vmem>>, vector<1x3x64xbf16>
    %21 = vector.shape_cast %20 : vector<1x3x64xbf16> to vector<3x64xbf16>
    %cst_12 = arith.constant dense<0.000000e+00> : vector<270x64xf32>
    %22 = tpu.matmul %19, %21, %cst_12 {dimension_numbers = #tpu.dot_dimension_numbers<[1], [0], [0], [1], [0, 0, 1, 1], [], []>} : vector<270x3xbf16>, vector<3x64xbf16>, vector<270x64xf32> -> vector<270x64xf32>
    %23 = arith.addf %12, %22 : vector<270x64xf32>
    %c0_i32_13 = arith.constant 0 : i32
    %24 = arith.addi %0, %c0_i32_13 : i32
    %c34_i32_14 = arith.constant 34 : i32
    %25 = arith.muli %24, %c34_i32_14 : i32
    %c2_i32 = arith.constant 2 : i32
    %26 = arith.addi %25, %c2_i32 : i32
    %c0_15 = arith.constant 0 : index
    %27 = arith.index_cast %26 : i32 to index
    %c0_16 = arith.constant 0 : index
    %28 = vector.load %arg2[%c0_15, %27, %c0_16] : memref<1x1156x3xf32, #tpu.memory_space<vmem>>, vector<1x270x3xf32>
    %29 = vector.shape_cast %28 : vector<1x270x3xf32> to vector<270x3xf32>
    %30 = arith.truncf %29 : vector<270x3xf32> to vector<270x3xbf16>
    %c2 = arith.constant 2 : index
    %c0_17 = arith.constant 0 : index
    %c0_18 = arith.constant 0 : index
    %31 = vector.load %arg3[%c2, %c0_17, %c0_18] : memref<9x3x64xbf16, #tpu.memory_space<vmem>>, vector<1x3x64xbf16>
    %32 = vector.shape_cast %31 : vector<1x3x64xbf16> to vector<3x64xbf16>
    %cst_19 = arith.constant dense<0.000000e+00> : vector<270x64xf32>
    %33 = tpu.matmul %30, %32, %cst_19 {dimension_numbers = #tpu.dot_dimension_numbers<[1], [0], [0], [1], [0, 0, 1, 1], [], []>} : vector<270x3xbf16>, vector<3x64xbf16>, vector<270x64xf32> -> vector<270x64xf32>
    %34 = arith.addf %23, %33 : vector<270x64xf32>
    %c1_i32_20 = arith.constant 1 : i32
    %35 = arith.addi %0, %c1_i32_20 : i32
    %c34_i32_21 = arith.constant 34 : i32
    %36 = arith.muli %35, %c34_i32_21 : i32
    %c0_i32_22 = arith.constant 0 : i32
    %37 = arith.addi %36, %c0_i32_22 : i32
    %c0_23 = arith.constant 0 : index
    %38 = arith.index_cast %37 : i32 to index
    %c0_24 = arith.constant 0 : index
    %39 = vector.load %arg2[%c0_23, %38, %c0_24] : memref<1x1156x3xf32, #tpu.memory_space<vmem>>, vector<1x270x3xf32>
    %40 = vector.shape_cast %39 : vector<1x270x3xf32> to vector<270x3xf32>
    %41 = arith.truncf %40 : vector<270x3xf32> to vector<270x3xbf16>
    %c3 = arith.constant 3 : index
    %c0_25 = arith.constant 0 : index
    %c0_26 = arith.constant 0 : index
    %42 = vector.load %arg3[%c3, %c0_25, %c0_26] : memref<9x3x64xbf16, #tpu.memory_space<vmem>>, vector<1x3x64xbf16>
    %43 = vector.shape_cast %42 : vector<1x3x64xbf16> to vector<3x64xbf16>
    %cst_27 = arith.constant dense<0.000000e+00> : vector<270x64xf32>
    %44 = tpu.matmul %41, %43, %cst_27 {dimension_numbers = #tpu.dot_dimension_numbers<[1], [0], [0], [1], [0, 0, 1, 1], [], []>} : vector<270x3xbf16>, vector<3x64xbf16>, vector<270x64xf32> -> vector<270x64xf32>
    %45 = arith.addf %34, %44 : vector<270x64xf32>
    %c1_i32_28 = arith.constant 1 : i32
    %46 = arith.addi %0, %c1_i32_28 : i32
    %c34_i32_29 = arith.constant 34 : i32
    %47 = arith.muli %46, %c34_i32_29 : i32
    %c1_i32_30 = arith.constant 1 : i32
    %48 = arith.addi %47, %c1_i32_30 : i32
    %c0_31 = arith.constant 0 : index
    %49 = arith.index_cast %48 : i32 to index
    %c0_32 = arith.constant 0 : index
    %50 = vector.load %arg2[%c0_31, %49, %c0_32] : memref<1x1156x3xf32, #tpu.memory_space<vmem>>, vector<1x270x3xf32>
    %51 = vector.shape_cast %50 : vector<1x270x3xf32> to vector<270x3xf32>
    %52 = arith.truncf %51 : vector<270x3xf32> to vector<270x3xbf16>
    %c4 = arith.constant 4 : index
    %c0_33 = arith.constant 0 : index
    %c0_34 = arith.constant 0 : index
    %53 = vector.load %arg3[%c4, %c0_33, %c0_34] : memref<9x3x64xbf16, #tpu.memory_space<vmem>>, vector<1x3x64xbf16>
    %54 = vector.shape_cast %53 : vector<1x3x64xbf16> to vector<3x64xbf16>
    %cst_35 = arith.constant dense<0.000000e+00> : vector<270x64xf32>
    %55 = tpu.matmul %52, %54, %cst_35 {dimension_numbers = #tpu.dot_dimension_numbers<[1], [0], [0], [1], [0, 0, 1, 1], [], []>} : vector<270x3xbf16>, vector<3x64xbf16>, vector<270x64xf32> -> vector<270x64xf32>
    %56 = arith.addf %45, %55 : vector<270x64xf32>
    %c1_i32_36 = arith.constant 1 : i32
    %57 = arith.addi %0, %c1_i32_36 : i32
    %c34_i32_37 = arith.constant 34 : i32
    %58 = arith.muli %57, %c34_i32_37 : i32
    %c2_i32_38 = arith.constant 2 : i32
    %59 = arith.addi %58, %c2_i32_38 : i32
    %c0_39 = arith.constant 0 : index
    %60 = arith.index_cast %59 : i32 to index
    %c0_40 = arith.constant 0 : index
    %61 = vector.load %arg2[%c0_39, %60, %c0_40] : memref<1x1156x3xf32, #tpu.memory_space<vmem>>, vector<1x270x3xf32>
    %62 = vector.shape_cast %61 : vector<1x270x3xf32> to vector<270x3xf32>
    %63 = arith.truncf %62 : vector<270x3xf32> to vector<270x3xbf16>
    %c5 = arith.constant 5 : index
    %c0_41 = arith.constant 0 : index
    %c0_42 = arith.constant 0 : index
    %64 = vector.load %arg3[%c5, %c0_41, %c0_42] : memref<9x3x64xbf16, #tpu.memory_space<vmem>>, vector<1x3x64xbf16>
    %65 = vector.shape_cast %64 : vector<1x3x64xbf16> to vector<3x64xbf16>
    %cst_43 = arith.constant dense<0.000000e+00> : vector<270x64xf32>
    %66 = tpu.matmul %63, %65, %cst_43 {dimension_numbers = #tpu.dot_dimension_numbers<[1], [0], [0], [1], [0, 0, 1, 1], [], []>} : vector<270x3xbf16>, vector<3x64xbf16>, vector<270x64xf32> -> vector<270x64xf32>
    %67 = arith.addf %56, %66 : vector<270x64xf32>
    %c2_i32_44 = arith.constant 2 : i32
    %68 = arith.addi %0, %c2_i32_44 : i32
    %c34_i32_45 = arith.constant 34 : i32
    %69 = arith.muli %68, %c34_i32_45 : i32
    %c0_i32_46 = arith.constant 0 : i32
    %70 = arith.addi %69, %c0_i32_46 : i32
    %c0_47 = arith.constant 0 : index
    %71 = arith.index_cast %70 : i32 to index
    %c0_48 = arith.constant 0 : index
    %72 = vector.load %arg2[%c0_47, %71, %c0_48] : memref<1x1156x3xf32, #tpu.memory_space<vmem>>, vector<1x270x3xf32>
    %73 = vector.shape_cast %72 : vector<1x270x3xf32> to vector<270x3xf32>
    %74 = arith.truncf %73 : vector<270x3xf32> to vector<270x3xbf16>
    %c6 = arith.constant 6 : index
    %c0_49 = arith.constant 0 : index
    %c0_50 = arith.constant 0 : index
    %75 = vector.load %arg3[%c6, %c0_49, %c0_50] : memref<9x3x64xbf16, #tpu.memory_space<vmem>>, vector<1x3x64xbf16>
    %76 = vector.shape_cast %75 : vector<1x3x64xbf16> to vector<3x64xbf16>
    %cst_51 = arith.constant dense<0.000000e+00> : vector<270x64xf32>
    %77 = tpu.matmul %74, %76, %cst_51 {dimension_numbers = #tpu.dot_dimension_numbers<[1], [0], [0], [1], [0, 0, 1, 1], [], []>} : vector<270x3xbf16>, vector<3x64xbf16>, vector<270x64xf32> -> vector<270x64xf32>
    %78 = arith.addf %67, %77 : vector<270x64xf32>
    %c2_i32_52 = arith.constant 2 : i32
    %79 = arith.addi %0, %c2_i32_52 : i32
    %c34_i32_53 = arith.constant 34 : i32
    %80 = arith.muli %79, %c34_i32_53 : i32
    %c1_i32_54 = arith.constant 1 : i32
    %81 = arith.addi %80, %c1_i32_54 : i32
    %c0_55 = arith.constant 0 : index
    %82 = arith.index_cast %81 : i32 to index
    %c0_56 = arith.constant 0 : index
    %83 = vector.load %arg2[%c0_55, %82, %c0_56] : memref<1x1156x3xf32, #tpu.memory_space<vmem>>, vector<1x270x3xf32>
    %84 = vector.shape_cast %83 : vector<1x270x3xf32> to vector<270x3xf32>
    %85 = arith.truncf %84 : vector<270x3xf32> to vector<270x3xbf16>
    %c7 = arith.constant 7 : index
    %c0_57 = arith.constant 0 : index
    %c0_58 = arith.constant 0 : index
    %86 = vector.load %arg3[%c7, %c0_57, %c0_58] : memref<9x3x64xbf16, #tpu.memory_space<vmem>>, vector<1x3x64xbf16>
    %87 = vector.shape_cast %86 : vector<1x3x64xbf16> to vector<3x64xbf16>
    %cst_59 = arith.constant dense<0.000000e+00> : vector<270x64xf32>
    %88 = tpu.matmul %85, %87, %cst_59 {dimension_numbers = #tpu.dot_dimension_numbers<[1], [0], [0], [1], [0, 0, 1, 1], [], []>} : vector<270x3xbf16>, vector<3x64xbf16>, vector<270x64xf32> -> vector<270x64xf32>
    %89 = arith.addf %78, %88 : vector<270x64xf32>
    %c2_i32_60 = arith.constant 2 : i32
    %90 = arith.addi %0, %c2_i32_60 : i32
    %c34_i32_61 = arith.constant 34 : i32
    %91 = arith.muli %90, %c34_i32_61 : i32
    %c2_i32_62 = arith.constant 2 : i32
    %92 = arith.addi %91, %c2_i32_62 : i32
    %c0_63 = arith.constant 0 : index
    %93 = arith.index_cast %92 : i32 to index
    %c0_64 = arith.constant 0 : index
    %94 = vector.load %arg2[%c0_63, %93, %c0_64] : memref<1x1156x3xf32, #tpu.memory_space<vmem>>, vector<1x270x3xf32>
    %95 = vector.shape_cast %94 : vector<1x270x3xf32> to vector<270x3xf32>
    %96 = arith.truncf %95 : vector<270x3xf32> to vector<270x3xbf16>
    %c8 = arith.constant 8 : index
    %c0_65 = arith.constant 0 : index
    %c0_66 = arith.constant 0 : index
    %97 = vector.load %arg3[%c8, %c0_65, %c0_66] : memref<9x3x64xbf16, #tpu.memory_space<vmem>>, vector<1x3x64xbf16>
    %98 = vector.shape_cast %97 : vector<1x3x64xbf16> to vector<3x64xbf16>
    %cst_67 = arith.constant dense<0.000000e+00> : vector<270x64xf32>
    %99 = tpu.matmul %96, %98, %cst_67 {dimension_numbers = #tpu.dot_dimension_numbers<[1], [0], [0], [1], [0, 0, 1, 1], [], []>} : vector<270x3xbf16>, vector<3x64xbf16>, vector<270x64xf32> -> vector<270x64xf32>
    %100 = arith.addf %89, %99 : vector<270x64xf32>
    %c0_68 = arith.constant 0 : index
    %c0_69 = arith.constant 0 : index
    %101 = vector.load %arg4[%c0_68, %c0_69] : memref<1x64xf32, #tpu.memory_space<vmem>>, vector<1x64xf32>
    %102 = vector.broadcast %101 : vector<1x64xf32> to vector<270x64xf32>
    %103 = arith.addf %100, %102 : vector<270x64xf32>
    %cst_70 = arith.constant 0.000000e+00 : f32
    %104 = vector.broadcast %cst_70 : f32 to vector<270x64xf32>
    %105 = arith.maximumf %103, %104 : vector<270x64xf32>
    %106 = vector.extract_strided_slice %105 {offsets = [0, 0], sizes = [32, 64], strides = [1, 1]} : vector<270x64xf32> to vector<32x64xf32>
    %c0_71 = arith.constant 0 : index
    %c0_72 = arith.constant 0 : index
    %c0_73 = arith.constant 0 : index
    %c0_74 = arith.constant 0 : index
    %107 = vector.load %arg5[%c0_71, %c0_72, %c0_73, %c0_74] : memref<1x8x32x64xf32, #tpu.memory_space<vmem>>, vector<1x1x32x64xf32>
    %108 = vector.shape_cast %107 : vector<1x1x32x64xf32> to vector<32x64xf32>
    %109 = vector.shape_cast %106 : vector<32x64xf32> to vector<1x1x32x64xf32>
    tpu.vector_store %arg5[%c0_71, %c0_72, %c0_73, %c0_74], %109 {strides = array<i32>} : memref<1x8x32x64xf32, #tpu.memory_space<vmem>>, vector<1x1x32x64xf32>,
    %110 = vector.extract_strided_slice %105 {offsets = [34, 0], sizes = [32, 64], strides = [1, 1]} : vector<270x64xf32> to vector<32x64xf32>
    %c0_75 = arith.constant 0 : index
    %c1_76 = arith.constant 1 : index
    %c0_77 = arith.constant 0 : index
    %c0_78 = arith.constant 0 : index
    %111 = vector.load %arg5[%c0_75, %c1_76, %c0_77, %c0_78] : memref<1x8x32x64xf32, #tpu.memory_space<vmem>>, vector<1x1x32x64xf32>
    %112 = vector.shape_cast %111 : vector<1x1x32x64xf32> to vector<32x64xf32>
    %113 = vector.shape_cast %110 : vector<32x64xf32> to vector<1x1x32x64xf32>
    tpu.vector_store %arg5[%c0_75, %c1_76, %c0_77, %c0_78], %113 {strides = array<i32>} : memref<1x8x32x64xf32, #tpu.memory_space<vmem>>, vector<1x1x32x64xf32>,
    %114 = vector.extract_strided_slice %105 {offsets = [68, 0], sizes = [32, 64], strides = [1, 1]} : vector<270x64xf32> to vector<32x64xf32>
    %c0_79 = arith.constant 0 : index
    %c2_80 = arith.constant 2 : index
    %c0_81 = arith.constant 0 : index
    %c0_82 = arith.constant 0 : index
    %115 = vector.load %arg5[%c0_79, %c2_80, %c0_81, %c0_82] : memref<1x8x32x64xf32, #tpu.memory_space<vmem>>, vector<1x1x32x64xf32>
    %116 = vector.shape_cast %115 : vector<1x1x32x64xf32> to vector<32x64xf32>
    %117 = vector.shape_cast %114 : vector<32x64xf32> to vector<1x1x32x64xf32>
    tpu.vector_store %arg5[%c0_79, %c2_80, %c0_81, %c0_82], %117 {strides = array<i32>} : memref<1x8x32x64xf32, #tpu.memory_space<vmem>>, vector<1x1x32x64xf32>,
    %118 = vector.extract_strided_slice %105 {offsets = [102, 0], sizes = [32, 64], strides = [1, 1]} : vector<270x64xf32> to vector<32x64xf32>
    %c0_83 = arith.constant 0 : index
    %c3_84 = arith.constant 3 : index
    %c0_85 = arith.constant 0 : index
    %c0_86 = arith.constant 0 : index
    %119 = vector.load %arg5[%c0_83, %c3_84, %c0_85, %c0_86] : memref<1x8x32x64xf32, #tpu.memory_space<vmem>>, vector<1x1x32x64xf32>
    %120 = vector.shape_cast %119 : vector<1x1x32x64xf32> to vector<32x64xf32>
    %121 = vector.shape_cast %118 : vector<32x64xf32> to vector<1x1x32x64xf32>
    tpu.vector_store %arg5[%c0_83, %c3_84, %c0_85, %c0_86], %121 {strides = array<i32>} : memref<1x8x32x64xf32, #tpu.memory_space<vmem>>, vector<1x1x32x64xf32>,
    %122 = vector.extract_strided_slice %105 {offsets = [136, 0], sizes = [32, 64], strides = [1, 1]} : vector<270x64xf32> to vector<32x64xf32>
    %c0_87 = arith.constant 0 : index
    %c4_88 = arith.constant 4 : index
    %c0_89 = arith.constant 0 : index
    %c0_90 = arith.constant 0 : index
    %123 = vector.load %arg5[%c0_87, %c4_88, %c0_89, %c0_90] : memref<1x8x32x64xf32, #tpu.memory_space<vmem>>, vector<1x1x32x64xf32>
    %124 = vector.shape_cast %123 : vector<1x1x32x64xf32> to vector<32x64xf32>
    %125 = vector.shape_cast %122 : vector<32x64xf32> to vector<1x1x32x64xf32>
    tpu.vector_store %arg5[%c0_87, %c4_88, %c0_89, %c0_90], %125 {strides = array<i32>} : memref<1x8x32x64xf32, #tpu.memory_space<vmem>>, vector<1x1x32x64xf32>,
    %126 = vector.extract_strided_slice %105 {offsets = [170, 0], sizes = [32, 64], strides = [1, 1]} : vector<270x64xf32> to vector<32x64xf32>
    %c0_91 = arith.constant 0 : index
    %c5_92 = arith.constant 5 : index
    %c0_93 = arith.constant 0 : index
    %c0_94 = arith.constant 0 : index
    %127 = vector.load %arg5[%c0_91, %c5_92, %c0_93, %c0_94] : memref<1x8x32x64xf32, #tpu.memory_space<vmem>>, vector<1x1x32x64xf32>
    %128 = vector.shape_cast %127 : vector<1x1x32x64xf32> to vector<32x64xf32>
    %129 = vector.shape_cast %126 : vector<32x64xf32> to vector<1x1x32x64xf32>
    tpu.vector_store %arg5[%c0_91, %c5_92, %c0_93, %c0_94], %129 {strides = array<i32>} : memref<1x8x32x64xf32, #tpu.memory_space<vmem>>, vector<1x1x32x64xf32>,
    %130 = vector.extract_strided_slice %105 {offsets = [204, 0], sizes = [32, 64], strides = [1, 1]} : vector<270x64xf32> to vector<32x64xf32>
    %c0_95 = arith.constant 0 : index
    %c6_96 = arith.constant 6 : index
    %c0_97 = arith.constant 0 : index
    %c0_98 = arith.constant 0 : index
    %131 = vector.load %arg5[%c0_95, %c6_96, %c0_97, %c0_98] : memref<1x8x32x64xf32, #tpu.memory_space<vmem>>, vector<1x1x32x64xf32>
    %132 = vector.shape_cast %131 : vector<1x1x32x64xf32> to vector<32x64xf32>
    %133 = vector.shape_cast %130 : vector<32x64xf32> to vector<1x1x32x64xf32>
    tpu.vector_store %arg5[%c0_95, %c6_96, %c0_97, %c0_98], %133 {strides = array<i32>} : memref<1x8x32x64xf32, #tpu.memory_space<vmem>>, vector<1x1x32x64xf32>,
    %134 = vector.extract_strided_slice %105 {offsets = [238, 0], sizes = [32, 64], strides = [1, 1]} : vector<270x64xf32> to vector<32x64xf32>
    %c0_99 = arith.constant 0 : index
    %c7_100 = arith.constant 7 : index
    %c0_101 = arith.constant 0 : index
    %c0_102 = arith.constant 0 : index
    %135 = vector.load %arg5[%c0_99, %c7_100, %c0_101, %c0_102] : memref<1x8x32x64xf32, #tpu.memory_space<vmem>>, vector<1x1x32x64xf32>
    %136 = vector.shape_cast %135 : vector<1x1x32x64xf32> to vector<32x64xf32>
    %137 = vector.shape_cast %134 : vector<32x64xf32> to vector<1x1x32x64xf32>
    tpu.vector_store %arg5[%c0_99, %c7_100, %c0_101, %c0_102], %137 {strides = array<i32>} : memref<1x8x32x64xf32, #tpu.memory_space<vmem>>, vector<1x1x32x64xf32>,
    return
  }
  func.func @transform_0(%arg0: i32, %arg1: i32) -> (i32, i32, i32) {
    %c0_i32 = arith.constant 0 : i32
    %c0_i32_0 = arith.constant 0 : i32
    %c0_i32_1 = arith.constant 0 : i32
    return %arg0, %c0_i32, %c0_i32_0 : i32, i32, i32
  }
  func.func @transform_1(%arg0: i32, %arg1: i32) -> (i32, i32, i32) {
    %c0_i32 = arith.constant 0 : i32
    %c0_i32_0 = arith.constant 0 : i32
    %c0_i32_1 = arith.constant 0 : i32
    %c0_i32_2 = arith.constant 0 : i32
    return %c0_i32, %c0_i32_0, %c0_i32_1 : i32, i32, i32
  }
  func.func @transform_2(%arg0: i32, %arg1: i32) -> (i32, i32) {
    %c0_i32 = arith.constant 0 : i32
    %c0_i32_0 = arith.constant 0 : i32
    %c0_i32_1 = arith.constant 0 : i32
    return %c0_i32, %c0_i32_0 : i32, i32
  }
  func.func @transform_3(%arg0: i32, %arg1: i32) -> (i32, i32, i32, i32) {
    %c0_i32 = arith.constant 0 : i32
    %c0_i32_0 = arith.constant 0 : i32
    %c0_i32_1 = arith.constant 0 : i32
    return %arg0, %arg1, %c0_i32, %c0_i32_0 : i32, i32, i32, i32
  }
}

</mosaic_0001>

<bundles_post_ra>
// kernel: tpu_custom_call.1
= control target key start
LH: loop header
LB: loop body
LE: loop exit
PB: predicated region body
PF: predicated region fallthrough
CT: control target
= control target key end

     0   :  { %8 = vsyncpa [#allocation3], 0  ;;  %s6155_s0 = inlined_call_operand.vmem [shape: f32[2,1156,3], index: 0, kind: input, shape index: {}]   ;;  %s6156_s1 = inlined_call_operand.vmem [shape: bf16[9,3,64], index: 1, kind: input, shape index: {}]   ;;  %s6157_s2 = inlined_call_operand.vmem [shape: f32[1,64], index: 2, kind: input, shape index: {}]   ;;  %s6158_s3 = inlined_call_operand.hbm [shape: f32[2,32,32,64], index: 3, kind: output, shape index: {}]  }
   0x1   :  { %10 = vsyncpa [#allocation3 + $0x1], 0  ;;  %s4670_s12 = smov 0   ;;  %s4672_s13 = smov 0  }
   0x2   :  { %s4674_s14 = smov 0   ;;  %s4676_s15 = smov 0  }
   0x3   :  { %s4678_s16 = smov 0   ;;  %s4680_s17 = smov 0  }
   0x4   :  { %s4682_s18 = smov 0   ;;  %s4684_s19 = smov 0  }
   0x5 LB: > { %s3184_s20 = sadd.s32 4294967295, %s4642_s19   ;;  %s3185_s21 = sadd.s32 4294967294, %s4642_s19   ;;  %s4642_s19 = sphi %s4684_s19, %s16_s19   ;;  %s4638_s18 = sphi %s4682_s18, %s6167_s18   ;;  %s4634_s17 = sphi %s4680_s17, %s6166_s17   ;;  %s4630_s16 = sphi %s4678_s16, %s6165_s16   ;;  %s4626_s15 = sphi %s4676_s15, %s6164_s15   ;;  %s4622_s14 = sphi %s4674_s14, %s6163_s14   ;;  %s4618_s13 = sphi %s4672_s13, %s6162_s13   ;;  %s4614_s12 = sphi %s4670_s12, %s6161_s12  }
   0x6   : > { %s25_s22 = sadd.s32 1, %s4634_s17  ;;  %s28_s23 = sadd.s32 1, %s4638_s18 }
   0x7   : > { %p26_p0 = scmp.ge.s32.totalorder %s25_s22, 4  ;;  %p115_p1 = scmp.ne.s32.totalorder %s4622_s14, %s4618_s13 }
   0x8   : > { %p116_p2 = scmp.eq.s32.totalorder %s3184_s20, 7  ;;  %p121_p5 = scmp.ne.s32.totalorder %s4618_s13, %s4614_s12 }
   0x9   : > { %s6169_s22 = smov (%p26_p0, %s25_s22), 0  ;;  %s6171_s23 = smov (!%p26_p0, %s28_s23), %s4638_s18 }
   0xa   : > { %s101_s24 = ssub.s32 %s4634_s17, %s6169_s22  ;;  %p4721_p3 = por %p116_p2, %p115_p1 }
   0xb   : > { %p30_p4 = scmp.ge.s32.totalorder %s6171_s23, 2  ;;  %p122_p6 = scmp.eq.s32.totalorder %s3185_s21, 7 }
   0xc   : > { %p3188_p7 = scmp.ge.s32.totalorder %s4642_s19, 1  ;;  %p154_p9 = scmp.lt.s32.totalorder %s4642_s19, 9 }
   0xd   : > { %s6173_s23 = smov (%p30_p4, %s6171_s23), 0  ;;  %p4730_p8 = por %p122_p6, %p121_p5 }
   0xe   : > { %s100_s27 = ssub.s32 %s4638_s18, %s6173_s23  ;;  %s105_s28 = sadd.s32 1, %s4622_s14 }
   0xf   : > { %s102_s29 = sor.u32 %s101_s24, %s100_s27  ;;  %p155_p10 = pnand %p3188_p7, %p154_p9 }
  0x10   : > { %p103_p11 = scmp.eq.s32.totalorder %s102_s29, 0  ;;  %p178_p12 = scmp.lt.s32.totalorder (!%p155_p10), %s4630_s16, 1 }
  0x11   : > { %158 = sbr.rel (%p155_p10) target bundleno = 857 (0x359), region = 32  ;;  %s175_s27 = sand.u32 (!%p155_p10), 1, %s4618_s13  }
  0x12   : > { %s4739_s30 = scalar_select %p103_p11, %s4622_s14, %s105_s28  }
  0x13   : > { %s186_s7 = smul.u32 (!%p155_p10), 272, %s4626_s15  ;;  %s3189_s4 = sshll.u32 (!%p155_p10), %s175_s27, 8 }
  0x14   : > { %s5950_s5 = scalar_lea.vmem (!%p155_p10), [#allocation2], %s3189_s4  ;;  %s6104_s20 = scalar_lea.sflag (!%p155_p10), [#allocation3], %s175_s27 }
  0x15   : > { %s3076_s9 = sshll.u32 (!%p155_p10), %s5950_s5, 4  ;;  %s4647_s24 = smov (!%p155_p10), [#allocation2]   ;;  %s6098_s9 = int_to_ptr.vmem [resolvable:$true] %s3076_s9 }
  0x16   : > { %v3225_v0 = vld [vmem:[%s6156_s1 + $0x2] sm:$0x3]  ;;  %vm347_vm0 = vcmask 1040384   ;;  %vm348_vm1 = vcmask 1041408   ;;  %v4644_v1 = vmov 0.0   ;;  %v4645_v2 = vmov 65535  }
  0x17   : > { %3841 = vmatprep.subr.bf16.mxu0 %v4644_v1  ;;  %4471 = vmatprep.subr.bf16.mxu1 %v4644_v1  ;;  %v349_v3 = vsel %vm347_vm0, 4294967295, %v4645_v2  ;;  %vm4646_vm2 = vmmov 0   ;;  %s179_s6 = scalar_select %p178_p12, %s4630_s16, 1  ;;  %v3294_v6 = vld [vmem:[%s6156_s1 + $0x4] sm:$0x3]  ;;  %vm295_vm3 = vcmask 23552  }
  0x18   : > { %v4747_v4 = vsel %vm348_vm1, %v349_v3, 0  ;;  %3843 = vmatprep.mubr.msk.bf16.mxu0 %vm4646_vm2, %v4644_v1  ;;  %3879 = vmatprep.mubr.msk.bf16.mxu1 %vm4646_vm2, %v4644_v1  ;;  %v239_v7 = vld [vmem:[%s6156_s1] sm:$0x3]  ;;  %v3348_v62 = vld [vmem:[%s6156_s1 + $0x6] sm:$0x3]  ;;  %vm3007_vm4 = vcmask 523264  }
  0x19   : > { %v352_v5 = vand.u32 %v3225_v0, %v4747_v4  ;;  %s4473_s8 = smul.u32 1160, %s179_s6  ;;  %v853_v11 = vand.u32 %v3294_v6, %v4747_v4  ;;  %v575_v14 = vand.u32 %v4747_v4, %v239_v7  ;;  %v1166_v2 = vand.u32 %v3348_v62, %v4747_v4  ;;  %s3678_s6 = sshll.u32 %s4626_s15, 5 }
  0x1a   : > { %vm3013_vm5 = vcmask 523266   ;;  %vm3018_vm6 = vcmask 517120   ;;  %vm3021_vm7 = vcmask 523268   ;;  %vm3026_vm8 = vcmask 519168  }
  0x1b   : > { %3842 = vmatpush3.bf16.msra.mxu0 %v352_v5  ;;  %4472 = vmatpush3.bf16.msra.mxu1 %v352_v5  ;;  %s182_s21 = scalar_lea.vmem %s6155_s0, %s4473_s8  ;;  %vm3029_vm9 = vcmask 523270   ;;  %vm3034_vm10 = vcmask 521216  }
  0x1c   : > { %3981 = vmatprep.subr.bf16.mxu0 %v4644_v1  ;;  %3911 = vmatprep.subr.bf16.mxu1 %v4644_v1  ;;  %s4767_s28 = scalar_lea.vmem %s182_s21, %s186_s7  ;;  %s3674_s7 = sshll.u32 %s4630_s16, 7 }
  0x1d   : > { %v3191_v8 = vld [vmem:[%s4767_s28 + $0x1] sm:$0xff]  ;;  %v3192_v9 = vld [vmem:[%s4767_s28 + $0x9] sm:$0xff]  ;;  %v3209_v10 = vld [vmem:[%s4767_s28 + $0x91] sm:$0xff]  ;;  %s3073_s8 = sadd.s32 %s3678_s6, %s3674_s7  ;;  %s4550_s21 = scalar_lea.vmem %s6098_s9, 4096 }
  0x1e   : > { %v276_v12 = vpack.c.bf16 %v3192_v9, %v3191_v8  ;;  %v3210_v13 = vld [vmem:[%s4767_s28 + $0x99] sm:$0xff]  ;;  %v3193_v16 = vld [vmem:[%s4767_s28 + $0x11] sm:$0xff]  ;;  %v3211_v18 = vld [vmem:[%s4767_s28 + $0xa1] sm:$0xff]  ;;  %s3675_s15 = sshll.u32 %s3073_s8, 7  ;;  %p4551_p13 = scmp.ne.s32.totalorder %s6098_s9, %s4550_s21 }
  0x1f   : > { %v285_v15 = vpack.c.bf16 %v3210_v13, %v3209_v10  ;;  %v3194_v17 = vld [vmem:[%s4767_s28 + $0x19] sm:$0xff]  ;;  %v3212_v19 = vld [vmem:[%s4767_s28 + $0xa9] sm:$0xff]  ;;  %v3195_v22 = vld [vmem:[%s4767_s28 + $0x21] sm:$0xff]  ;;  %s6096_s11 = scalar_lea.hbm %s6158_s3, %s3675_s15 }
  0x20   : > { %3844 = vmatmul.mubr.msk.bf16.vlgmr.msra.gmra.mxu0 %vm295_vm3, %v276_v12  ;;  %v277_v20 = vpack.c.bf16 %v3194_v17, %v3193_v16  ;;  %v286_v21 = vpack.c.bf16 %v3212_v19, %v3211_v18  ;;  %v3196_v23 = vld [vmem:[%s4767_s28 + $0x29] sm:$0xff]  ;;  %v3213_v24 = vld [vmem:[%s4767_s28 + $0xb1] sm:$0xff]  ;;  %v3214_v25 = vld [vmem:[%s4767_s28 + $0xb9] sm:$0xff]  ;;  %p4552_p0 = pnand %p4551_p13, %p4721_p3 }
  0x21   : > { %3880 = vmatmul.mubr.msk.bf16.vlgmr.msra.gmra.mxu1 %vm295_vm3, %v285_v15  ;;  %3982 = vmatpush3.bf16.msra.mxu0 %v853_v11  ;;  %v278_v26 = vpack.c.bf16 %v3196_v23, %v3195_v22  ;;  %v287_v27 = vpack.c.bf16 %v3214_v25, %v3213_v24  ;;  %v3197_v28 = vld [vmem:[%s4767_s28 + $0x31] sm:$0xff]  ;;  %v3198_v29 = vld [vmem:[%s4767_s28 + $0x39] sm:$0xff]  ;;  %v3215_v30 = vld [vmem:[%s4767_s28 + $0xc1] sm:$0xff] }
  0x22   : > { %3912 = vmatpush3.bf16.msra.mxu1 %v575_v14  ;;  %3847 = vmatprep.mubr.msk.bf16.mxu0 %vm4646_vm2, %v4644_v1  ;;  %v3216_v31 = vld [vmem:[%s4767_s28 + $0xc9] sm:$0xff]  ;;  %v279_v32 = vpack.c.bf16 %v3198_v29, %v3197_v28  ;;  %v3199_v34 = vld [vmem:[%s4767_s28 + $0x41] sm:$0xff]  ;;  %v3217_v36 = vld [vmem:[%s4767_s28 + $0xd1] sm:$0xff]  ;;  %p4553_p1 = pneg %p4552_p0 }
  0x23   : > { %3883 = vmatprep.mubr.msk.bf16.mxu1 %vm4646_vm2, %v4644_v1  ;;  %4051 = vmatprep.subr.bf16.mxu1 %v4644_v1  ;;  %v288_v33 = vpack.c.bf16 %v3216_v31, %v3215_v30  ;;  %v3200_v35 = vld [vmem:[%s4767_s28 + $0x49] sm:$0xff]  ;;  %v3218_v37 = vld [vmem:[%s4767_s28 + $0xd9] sm:$0xff]  ;;  %v3201_v40 = vld [vmem:[%s4767_s28 + $0x51] sm:$0xff] }
  0x24   : > { %4121 = vmatprep.subr.bf16.mxu0 %v4644_v1  ;;  %v280_v38 = vpack.c.bf16 %v3200_v35, %v3199_v34  ;;  %v289_v39 = vpack.c.bf16 %v3218_v37, %v3217_v36  ;;  %v3202_v41 = vld [vmem:[%s4767_s28 + $0x59] sm:$0xff]  ;;  %v3219_v42 = vld [vmem:[%s4767_s28 + $0xe1] sm:$0xff]  ;;  %v3220_v43 = vld [vmem:[%s4767_s28 + $0xe9] sm:$0xff] }
  0x25   : > { %v281_v44 = vpack.c.bf16 %v3202_v41, %v3201_v40  ;;  %v290_v45 = vpack.c.bf16 %v3220_v43, %v3219_v42  ;;  %v3203_v46 = vld [vmem:[%s4767_s28 + $0x61] sm:$0xff]  ;;  %v3204_v47 = vld [vmem:[%s4767_s28 + $0x69] sm:$0xff]  ;;  %v3221_v48 = vld [vmem:[%s4767_s28 + $0xf1] sm:$0xff] }
  0x26   : > { %v3222_v49 = vld [vmem:[%s4767_s28 + $0xf9] sm:$0xff]  ;;  %v282_v50 = vpack.c.bf16 %v3204_v47, %v3203_v46  ;;  %v3205_v52 = vld [vmem:[%s4767_s28 + $0x71] sm:$0xff]  ;;  %v3223_v54 = vld [vmem:[%s4767_s28 + $0x101] sm:$0xff] }
  0x27   : > { %v291_v51 = vpack.c.bf16 %v3222_v49, %v3221_v48  ;;  %v3206_v53 = vld [vmem:[%s4767_s28 + $0x79] sm:$0xff]  ;;  %v3224_v55 = vld [vmem:[%s4767_s28 + $0x109] sm:$0x3f]  ;;  %v3207_v58 = vld [vmem:[%s4767_s28 + $0x81] sm:$0xff] }
  0x28   : > { %3848 = vmatmul.mubr.msk.bf16.gmra.mxu0 %vm295_vm3, %v277_v20  ;;  %v283_v56 = vpack.c.bf16 %v3206_v53, %v3205_v52  ;;  %v292_v57 = vpack.c.bf16 %v3224_v55, %v3223_v54  ;;  %v3208_v59 = vld [vmem:[%s4767_s28 + $0x89] sm:$0xff]  ;;  %v188_v60 = vld [vmem:[%s4767_s28] sm:$0xff]  ;;  %v191_v7 = vld [vmem:[%s4767_s28 + $0x18] sm:$0xff] }
  0x29   : > { %3884 = vmatmul.mubr.msk.bf16.gmra.mxu1 %vm295_vm3, %v286_v21  ;;  %3851 = vmatprep.mubr.msk.bf16.mxu0 %vm4646_vm2, %v4644_v1  ;;  %v189_v61 = vld [vmem:[%s4767_s28 + $0x8] sm:$0xff]  ;;  %v284_v63 = vpack.c.bf16 %v3208_v59, %v3207_v58  ;;  %v190_v6 = vld [vmem:[%s4767_s28 + $0x10] sm:$0xff]  ;;  %v3263_v13 = vld [vmem:[%s4767_s28 + $0x1a] sm:$0xff] }
  0x2a   : > { %3887 = vmatprep.mubr.msk.bf16.mxu1 %vm4646_vm2, %v4644_v1  ;;  %v222_v0 = vpack.c.bf16 %v189_v61, %v188_v60  ;;  %v3260_v3 = vld [vmem:[%s4767_s28 + $0x2] sm:$0xff]  ;;  %v3261_v5 = vld [vmem:[%s4767_s28 + $0xa] sm:$0xff]  ;;  %v223_v10 = vpack.c.bf16 %v191_v7, %v190_v6  ;;  %v3262_v12 = vld [vmem:[%s4767_s28 + $0x12] sm:$0xff] }
  0x2b   : > { %v3402_v8 = vld [vmem:[%s6156_s1 + $0x8] sm:$0x3]  ;;  %v782_v9 = vpack.c.bf16 %v3261_v5, %v3260_v3  ;;  %v192_v14 = vld [vmem:[%s4767_s28 + $0x20] sm:$0xff]  ;;  %v783_v16 = vpack.c.bf16 %v3263_v13, %v3262_v12  ;;  %v3265_v19 = vld [vmem:[%s4767_s28 + $0x2a] sm:$0xff] }
  0x2c   : > { %v1478_v11 = vand.u32 %v3402_v8, %v4747_v4  ;;  %v193_v15 = vld [vmem:[%s4767_s28 + $0x28] sm:$0xff]  ;;  %v194_v20 = vld [vmem:[%s4767_s28 + $0x30] sm:$0xff]  ;;  %v195_v21 = vld [vmem:[%s4767_s28 + $0x38] sm:$0xff] }
  0x2d   : > { %v224_v17 = vpack.c.bf16 %v193_v15, %v192_v14  ;;  %v3264_v18 = vld [vmem:[%s4767_s28 + $0x22] sm:$0xff]  ;;  %v225_v23 = vpack.c.bf16 %v195_v21, %v194_v20  ;;  %v3266_v24 = vld [vmem:[%s4767_s28 + $0x32] sm:$0xff]  ;;  %v3267_v25 = vld [vmem:[%s4767_s28 + $0x3a] sm:$0xff] }
  0x2e   : > { %v4897_v22 = vpack.c.bf16 %v3265_v19, %v3264_v18  ;;  %v4910_v28 = vpack.c.bf16 %v3267_v25, %v3266_v24  ;;  %v3268_v30 = vld [vmem:[%s4767_s28 + $0x42] sm:$0xff]  ;;  %v3269_v31 = vld [vmem:[%s4767_s28 + $0x4a] sm:$0xff]  ;;  %v3270_v36 = vld [vmem:[%s4767_s28 + $0x52] sm:$0xff] }
  0x2f   : > { %v4923_v34 = vpack.c.bf16 %v3269_v31, %v3268_v30  ;;  %v3271_v37 = vld [vmem:[%s4767_s28 + $0x5a] sm:$0xff]  ;;  %v3272_v42 = vld [vmem:[%s4767_s28 + $0x62] sm:$0xff]  ;;  %v3273_v43 = vld [vmem:[%s4767_s28 + $0x6a] sm:$0xff] }
  0x30   : > { %3852 = vmatmul.mubr.msk.bf16.gmra.mxu0 %vm295_vm3, %v278_v26  ;;  %v196_v26 = vld [vmem:[%s4767_s28 + $0x40] sm:$0xff]  ;;  %v4936_v40 = vpack.c.bf16 %v3271_v37, %v3270_v36  ;;  %v4949_v46 = vpack.c.bf16 %v3273_v43, %v3272_v42  ;;  %v3274_v48 = vld [vmem:[%s4767_s28 + $0x72] sm:$0xff]  ;;  %v3277_v55 = vld [vmem:[%s4767_s28 + $0x8a] sm:$0xff] }
  0x31   : > { %3888 = vmatmul.mubr.msk.bf16.gmra.mxu1 %vm295_vm3, %v287_v27  ;;  %3855 = vmatprep.mubr.msk.bf16.mxu0 %vm4646_vm2, %v4644_v1  ;;  %v197_v27 = vld [vmem:[%s4767_s28 + $0x48] sm:$0xff]  ;;  %v3275_v49 = vld [vmem:[%s4767_s28 + $0x7a] sm:$0xff]  ;;  %v3278_v60 = vld [vmem:[%s4767_s28 + $0x92] sm:$0xff] }
  0x32   : > { %3891 = vmatprep.mubr.msk.bf16.mxu1 %vm4646_vm2, %v4644_v1  ;;  %v226_v29 = vpack.c.bf16 %v197_v27, %v196_v26  ;;  %v4962_v52 = vpack.c.bf16 %v3275_v49, %v3274_v48  ;;  %v3276_v54 = vld [vmem:[%s4767_s28 + $0x82] sm:$0xff]  ;;  %v3279_v61 = vld [vmem:[%s4767_s28 + $0x9a] sm:$0xff]  ;;  %v3281_v5 = vld [vmem:[%s4767_s28 + $0xaa] sm:$0xff] }
  0x33   : > { %v4975_v58 = vpack.c.bf16 %v3277_v55, %v3276_v54  ;;  %v208_v62 = vld [vmem:[%s4767_s28 + $0xa0] sm:$0xff]  ;;  %v210_v6 = vld [vmem:[%s4767_s28 + $0xb0] sm:$0xff]  ;;  %v211_v7 = vld [vmem:[%s4767_s28 + $0xb8] sm:$0xff] }
  0x34   : > { %v3280_v3 = vld [vmem:[%s4767_s28 + $0xa2] sm:$0xff]  ;;  %v214_v18 = vld [vmem:[%s4767_s28 + $0xd0] sm:$0xff]  ;;  %v215_v19 = vld [vmem:[%s4767_s28 + $0xd8] sm:$0xff] }
  0x35   : > { %v5001_v8 = vpack.c.bf16 %v3281_v5, %v3280_v3  ;;  %v212_v12 = vld [vmem:[%s4767_s28 + $0xc0] sm:$0xff]  ;;  %v213_v13 = vld [vmem:[%s4767_s28 + $0xc8] sm:$0xff]  ;;  %v235_v21 = vpack.c.bf16 %v215_v19, %v214_v18  ;;  %v3290_v37 = vld [vmem:[%s4767_s28 + $0xf2] sm:$0xff] }
  0x36   : > { %v234_v15 = vpack.c.bf16 %v213_v13, %v212_v12  ;;  %v3287_v24 = vld [vmem:[%s4767_s28 + $0xda] sm:$0xff]  ;;  %v217_v26 = vld [vmem:[%s4767_s28 + $0xe8] sm:$0xff] }
  0x37   : > { %v216_v25 = vld [vmem:[%s4767_s28 + $0xe0] sm:$0xff]  ;;  %v3289_v31 = vld [vmem:[%s4767_s28 + $0xea] sm:$0xff] }
  0x38   : > { %3856 = vmatmul.mubr.msk.bf16.gmra.mxu0 %vm295_vm3, %v279_v32  ;;  %v198_v32 = vld [vmem:[%s4767_s28 + $0x50] sm:$0xff]  ;;  %v3288_v30 = vld [vmem:[%s4767_s28 + $0xe2] sm:$0xff]  ;;  %v3293_v48 = vld [vmem:[%s4767_s28 + $0x10a] sm:$0x3f] }
  0x39   : > { %3892 = vmatmul.mubr.msk.bf16.gmra.mxu1 %vm295_vm3, %v288_v33  ;;  %3859 = vmatprep.mubr.msk.bf16.mxu0 %vm4646_vm2, %v4644_v1  ;;  %v199_v33 = vld [vmem:[%s4767_s28 + $0x58] sm:$0xff]  ;;  %v3510_v3 = vld [vmem:[%s6156_s1 + $0xc] sm:$0x3] }
  0x3a   : > { %3895 = vmatprep.mubr.msk.bf16.mxu1 %vm4646_vm2, %v4644_v1  ;;  %v227_v35 = vpack.c.bf16 %v199_v33, %v198_v32  ;;  %v218_v32 = vld [vmem:[%s4767_s28 + $0xf0] sm:$0xff]  ;;  %v219_v33 = vld [vmem:[%s4767_s28 + $0xf8] sm:$0xff] }
  0x3b   : > { %v237_v36 = vpack.c.bf16 %v219_v33, %v218_v32 }
  0x40   : > { %3860 = vmatmul.mubr.msk.bf16.gmra.mxu0 %vm295_vm3, %v280_v38  ;;  %v200_v38 = vld [vmem:[%s4767_s28 + $0x60] sm:$0xff] }
  0x41   : > { %3896 = vmatmul.mubr.msk.bf16.gmra.mxu1 %vm295_vm3, %v289_v39  ;;  %3863 = vmatprep.mubr.msk.bf16.mxu0 %vm4646_vm2, %v4644_v1  ;;  %v201_v39 = vld [vmem:[%s4767_s28 + $0x68] sm:$0xff] }
  0x42   : > { %3899 = vmatprep.mubr.msk.bf16.mxu1 %vm4646_vm2, %v4644_v1  ;;  %v228_v41 = vpack.c.bf16 %v201_v39, %v200_v38  ;;  %v3291_v38 = vld [vmem:[%s4767_s28 + $0xfa] sm:$0xff] }
  0x43   : > { %v220_v39 = vld [vmem:[%s4767_s28 + $0x100] sm:$0xff]  ;;  %v5066_v42 = vpack.c.bf16 %v3291_v38, %v3290_v37 }
  0x48   : > { %3864 = vmatmul.mubr.msk.bf16.gmra.mxu0 %vm295_vm3, %v281_v44  ;;  %v202_v44 = vld [vmem:[%s4767_s28 + $0x70] sm:$0xff] }
  0x49   : > { %3900 = vmatmul.mubr.msk.bf16.gmra.mxu1 %vm295_vm3, %v290_v45  ;;  %3867 = vmatprep.mubr.msk.bf16.mxu0 %vm4646_vm2, %v4644_v1  ;;  %v203_v45 = vld [vmem:[%s4767_s28 + $0x78] sm:$0xff] }
  0x4a   : > { %3903 = vmatprep.mubr.msk.bf16.mxu1 %vm4646_vm2, %v4644_v1  ;;  %v229_v47 = vpack.c.bf16 %v203_v45, %v202_v44 }
  0x50   : > { %3868 = vmatmul.mubr.msk.bf16.gmra.mxu0 %vm295_vm3, %v282_v50  ;;  %v204_v50 = vld [vmem:[%s4767_s28 + $0x80] sm:$0xff] }
  0x51   : > { %3904 = vmatmul.mubr.msk.bf16.gmra.mxu1 %vm295_vm3, %v291_v51  ;;  %3871 = vmatprep.mubr.msk.bf16.mxu0 %vm4646_vm2, %v4644_v1  ;;  %v205_v51 = vld [vmem:[%s4767_s28 + $0x88] sm:$0xff] }
  0x52   : > { %3907 = vmatprep.mubr.msk.bf16.mxu1 %vm4646_vm2, %v4644_v1  ;;  %v230_v53 = vpack.c.bf16 %v205_v51, %v204_v50  ;;  %v3456_v51 = vld [vmem:[%s6156_s1 + $0xa] sm:$0x3] }
  0x58   : > { %3872 = vmatmul.mubr.msk.bf16.gmra.mxu0 %vm295_vm3, %v283_v56  ;;  %v206_v56 = vld [vmem:[%s4767_s28 + $0x90] sm:$0xff] }
  0x59   : > { %3908 = vmatmul.mubr.msk.bf16.gmra.mxu1 %vm295_vm3, %v292_v57  ;;  %3875 = vmatprep.mubr.msk.bf16.mxu0 %vm4646_vm2, %v4644_v1  ;;  %v207_v57 = vld [vmem:[%s4767_s28 + $0x98] sm:$0xff] }
  0x5a   : > { %3913 = vmatprep.mubr.msk.bf16.mxu1 %vm4646_vm2, %v4644_v1  ;;  %v231_v59 = vpack.c.bf16 %v207_v57, %v206_v56  ;;  %v1790_v57 = vand.u32 %v3456_v51, %v4747_v4 }
  0x60   : > { %3876 = vmatmul.mubr.msk.bf16.gmra.mxu0 %vm295_vm3, %v284_v63  ;;  %v209_v63 = vld [vmem:[%s4767_s28 + $0xa8] sm:$0xff] }
  0x61   : > { %3914 = vmatmul.mubr.msk.bf16.vlgmr.msra.gmra.mxu1 %vm295_vm3, %v222_v0  ;;  %3983 = vmatprep.mubr.msk.bf16.mxu0 %vm4646_vm2, %v4644_v1  ;;  %v4988_v0 = vpack.c.bf16 %v3279_v61, %v3278_v60 }
  0x62   : > { %4052 = vmatpush3.bf16.msra.mxu1 %v1166_v2  ;;  %3917 = vmatprep.mubr.msk.bf16.mxu1 %vm4646_vm2, %v4644_v1  ;;  %v232_v2 = vpack.c.bf16 %v209_v63, %v208_v62  ;;  %v3368_v62 = vld [vmem:[%s4767_s28 + $0x23] sm:$0xff]  ;;  %v3369_v63 = vld [vmem:[%s4767_s28 + $0x2b] sm:$0xff] }
  0x63   : > { %4191 = vmatprep.subr.bf16.mxu1 %v4644_v1 }
  0x68   : > { %3984 = vmatmul.mubr.msk.bf16.vlgmr.msra.gmra.mxu0 %vm295_vm3, %v782_v9  ;;  %v233_v9 = vpack.c.bf16 %v211_v7, %v210_v6  ;;  %v1407_v6 = vpack.c.bf16 %v3369_v63, %v3368_v62  ;;  %v3376_v63 = vld [vmem:[%s4767_s28 + $0x63] sm:$0xff] }
  0x69   : > { %3918 = vmatmul.mubr.msk.bf16.gmra.mxu1 %vm295_vm3, %v223_v10  ;;  %4122 = vmatpush3.bf16.msra.mxu0 %v1478_v11  ;;  %v3282_v10 = vld [vmem:[%s4767_s28 + $0xb2] sm:$0xff]  ;;  %v3283_v11 = vld [vmem:[%s4767_s28 + $0xba] sm:$0xff] }
  0x6a   : > { %3921 = vmatprep.mubr.msk.bf16.mxu1 %vm4646_vm2, %v4644_v1  ;;  %3987 = vmatprep.mubr.msk.bf16.mxu0 %vm4646_vm2, %v4644_v1  ;;  %v5014_v14 = vpack.c.bf16 %v3283_v11, %v3282_v10 }
  0x6b   : > { %4261 = vmatprep.subr.bf16.mxu0 %v4644_v1 }
  0x70   : > { %3988 = vmatmul.mubr.msk.bf16.gmra.mxu0 %vm295_vm3, %v783_v16  ;;  %v3284_v16 = vld [vmem:[%s4767_s28 + $0xc2] sm:$0xff] }
  0x71   : > { %3922 = vmatmul.mubr.msk.bf16.gmra.mxu1 %vm295_vm3, %v224_v17  ;;  %3991 = vmatprep.mubr.msk.bf16.mxu0 %vm4646_vm2, %v4644_v1  ;;  %v3285_v17 = vld [vmem:[%s4767_s28 + $0xca] sm:$0xff] }
  0x72   : > { %3925 = vmatprep.mubr.msk.bf16.mxu1 %vm4646_vm2, %v4644_v1  ;;  %v5027_v20 = vpack.c.bf16 %v3285_v17, %v3284_v16  ;;  %v3371_v16 = vld [vmem:[%s4767_s28 + $0x3b] sm:$0xff] }
  0x78   : > { %3992 = vmatmul.mubr.msk.bf16.gmra.mxu0 %vm295_vm3, %v4897_v22 }
  0x79   : > { %3926 = vmatmul.mubr.msk.bf16.gmra.mxu1 %vm295_vm3, %v225_v23  ;;  %3995 = vmatprep.mubr.msk.bf16.mxu0 %vm4646_vm2, %v4644_v1  ;;  %v3286_v23 = vld [vmem:[%s4767_s28 + $0xd2] sm:$0xff] }
  0x7a   : > { %3929 = vmatprep.mubr.msk.bf16.mxu1 %vm4646_vm2, %v4644_v1  ;;  %v5040_v27 = vpack.c.bf16 %v3287_v24, %v3286_v23 }
  0x80   : > { %3996 = vmatmul.mubr.msk.bf16.gmra.mxu0 %vm295_vm3, %v4910_v28 }
  0x81   : > { %3930 = vmatmul.mubr.msk.bf16.gmra.mxu1 %vm295_vm3, %v226_v29  ;;  %3999 = vmatprep.mubr.msk.bf16.mxu0 %vm4646_vm2, %v4644_v1  ;;  %v236_v29 = vpack.c.bf16 %v217_v26, %v216_v25 }
  0x82   : > { %3933 = vmatprep.mubr.msk.bf16.mxu1 %vm4646_vm2, %v4644_v1 }
  0x88   : > { %4000 = vmatmul.mubr.msk.bf16.gmra.mxu0 %vm295_vm3, %v4923_v34 }
  0x89   : > { %3934 = vmatmul.mubr.msk.bf16.gmra.mxu1 %vm295_vm3, %v227_v35  ;;  %4003 = vmatprep.mubr.msk.bf16.mxu0 %vm4646_vm2, %v4644_v1  ;;  %v5053_v35 = vpack.c.bf16 %v3289_v31, %v3288_v30  ;;  %v3373_v30 = vld [vmem:[%s4767_s28 + $0x4b] sm:$0xff] }
  0x8a   : > { %3937 = vmatprep.mubr.msk.bf16.mxu1 %vm4646_vm2, %v4644_v1 }
  0x90   : > { %4004 = vmatmul.mubr.msk.bf16.gmra.mxu0 %vm295_vm3, %v4936_v40 }
  0x91   : > { %3938 = vmatmul.mubr.msk.bf16.gmra.mxu1 %vm295_vm3, %v228_v41  ;;  %4007 = vmatprep.mubr.msk.bf16.mxu0 %vm4646_vm2, %v4644_v1  ;;  %v221_v41 = vld [vmem:[%s4767_s28 + $0x108] sm:$0x3f] }
  0x92   : > { %3941 = vmatprep.mubr.msk.bf16.mxu1 %vm4646_vm2, %v4644_v1  ;;  %v238_v43 = vpack.c.bf16 %v221_v41, %v220_v39 }
  0x98   : > { %4008 = vmatmul.mubr.msk.bf16.gmra.mxu0 %vm295_vm3, %v4949_v46 }
  0x99   : > { %3942 = vmatmul.mubr.msk.bf16.gmra.mxu1 %vm295_vm3, %v229_v47  ;;  %4011 = vmatprep.mubr.msk.bf16.mxu0 %vm4646_vm2, %v4644_v1  ;;  %v5078_v47 = vld [vmem:[%s4767_s28 + $0x102] sm:$0xff] }
  0x9a   : > { %3945 = vmatprep.mubr.msk.bf16.mxu1 %vm4646_vm2, %v4644_v1  ;;  %v798_v54 = vpack.c.bf16 %v3293_v48, %v5078_v47  ;;  %v3375_v48 = vld [vmem:[%s4767_s28 + $0x5b] sm:$0xff] }
  0xa0   : > { %4012 = vmatmul.mubr.msk.bf16.gmra.mxu0 %vm295_vm3, %v4962_v52 }
  0xa1   : > { %3946 = vmatmul.mubr.msk.bf16.gmra.mxu1 %vm295_vm3, %v230_v53  ;;  %4015 = vmatprep.mubr.msk.bf16.mxu0 %vm4646_vm2, %v4644_v1 }
  0xa2   : > { %3949 = vmatprep.mubr.msk.bf16.mxu1 %vm4646_vm2, %v4644_v1 }
  0xa8   : > { %4016 = vmatmul.mubr.msk.bf16.gmra.mxu0 %vm295_vm3, %v4975_v58 }
  0xa9   : > { %3950 = vmatmul.mubr.msk.bf16.gmra.mxu1 %vm295_vm3, %v231_v59  ;;  %4019 = vmatprep.mubr.msk.bf16.mxu0 %vm4646_vm2, %v4644_v1 }
  0xaa   : > { %3953 = vmatprep.mubr.msk.bf16.mxu1 %vm4646_vm2, %v4644_v1 }
  0xb0   : > { %4020 = vmatmul.mubr.msk.bf16.gmra.mxu0 %vm295_vm3, %v4988_v0 }
  0xb1   : > { %3954 = vmatmul.mubr.msk.bf16.gmra.mxu1 %vm295_vm3, %v232_v2  ;;  %4023 = vmatprep.mubr.msk.bf16.mxu0 %vm4646_vm2, %v4644_v1 }
  0xb2   : > { %3957 = vmatprep.mubr.msk.bf16.mxu1 %vm4646_vm2, %v4644_v1 }
  0xb8   : > { %4024 = vmatmul.mubr.msk.bf16.gmra.mxu0 %vm295_vm3, %v5001_v8 }
  0xb9   : > { %3958 = vmatmul.mubr.msk.bf16.gmra.mxu1 %vm295_vm3, %v233_v9  ;;  %4027 = vmatprep.mubr.msk.bf16.mxu0 %vm4646_vm2, %v4644_v1  ;;  %v2103_v9 = vand.u32 %v3510_v3, %v4747_v4 }
  0xba   : > { %3961 = vmatprep.mubr.msk.bf16.mxu1 %vm4646_vm2, %v4644_v1 }
  0xc0   : > { %4028 = vmatmul.mubr.msk.bf16.gmra.mxu0 %vm295_vm3, %v5014_v14 }
  0xc1   : > { %3962 = vmatmul.mubr.msk.bf16.gmra.mxu1 %vm295_vm3, %v234_v15  ;;  %4031 = vmatprep.mubr.msk.bf16.mxu0 %vm4646_vm2, %v4644_v1  ;;  %v3370_v15 = vld [vmem:[%s4767_s28 + $0x33] sm:$0xff] }
  0xc2   : > { %3965 = vmatprep.mubr.msk.bf16.mxu1 %vm4646_vm2, %v4644_v1 }
  0xc8   : > { %4032 = vmatmul.mubr.msk.bf16.gmra.mxu0 %vm295_vm3, %v5027_v20 }
  0xc9   : > { %3966 = vmatmul.mubr.msk.bf16.gmra.mxu1 %vm295_vm3, %v235_v21  ;;  %4035 = vmatprep.mubr.msk.bf16.mxu0 %vm4646_vm2, %v4644_v1  ;;  %v1408_v21 = vpack.c.bf16 %v3371_v16, %v3370_v15 }
  0xca   : > { %3969 = vmatprep.mubr.msk.bf16.mxu1 %vm4646_vm2, %v4644_v1 }
  0xd0   : > { %4036 = vmatmul.mubr.msk.bf16.gmra.mxu0 %vm295_vm3, %v5040_v27 }
  0xd1   : > { %3970 = vmatmul.mubr.msk.bf16.gmra.mxu1 %vm295_vm3, %v236_v29  ;;  %4039 = vmatprep.mubr.msk.bf16.mxu0 %vm4646_vm2, %v4644_v1  ;;  %v3372_v29 = vld [vmem:[%s4767_s28 + $0x43] sm:$0xff] }
  0xd2   : > { %3973 = vmatprep.mubr.msk.bf16.mxu1 %vm4646_vm2, %v4644_v1 }
  0xd8   : > { %4040 = vmatmul.mubr.msk.bf16.gmra.mxu0 %vm295_vm3, %v5053_v35 }
  0xd9   : > { %3974 = vmatmul.mubr.msk.bf16.gmra.mxu1 %vm295_vm3, %v237_v36  ;;  %4043 = vmatprep.mubr.msk.bf16.mxu0 %vm4646_vm2, %v4644_v1  ;;  %v1409_v36 = vpack.c.bf16 %v3373_v30, %v3372_v29 }
  0xda   : > { %3977 = vmatprep.mubr.msk.bf16.mxu1 %vm4646_vm2, %v4644_v1 }
  0xe0   : > { %v5068_v44 = vpop.f32.mrf.mxu0  ;;  %4044 = vmatmul.mubr.msk.bf16.gmra.mxu0 %vm295_vm3, %v5066_v42 }
  0xe1   : > { %v5072_v45 = vpop.f32.mrf.mxu1  ;;  %3978 = vmatmul.mubr.msk.bf16.gmra.mxu1 %vm295_vm3, %v238_v43  ;;  %4047 = vmatprep.mubr.msk.bf16.mxu0 %vm4646_vm2, %v4644_v1  ;;  %v3374_v43 = vld [vmem:[%s4767_s28 + $0x53] sm:$0xff] }
  0xe2   : > { %v3845_v49 = vpop.f32.mrf.mxu0  ;;  %4053 = vmatprep.mubr.msk.bf16.mxu1 %vm4646_vm2, %v4644_v1 }
  0xe3   : > { %v3881_v50 = vpop.f32.mrf.mxu1 }
  0xe4   : > { %v5086_v53 = vpop.f32.mrf.mxu0 }
  0xe5   : > { %v5089_v55 = vpop.f32.mrf.mxu1 }
  0xe6   : > { %v3846_v56 = vpop.f32.mrf.mxu0 }
  0xe7   : > { %v3882_v59 = vpop.f32.mrf.mxu1 }
  0xe8   : > { %v5092_v60 = vpop.f32.mrf.mxu0  ;;  %4048 = vmatmul.mubr.msk.bf16.gmra.mxu0 %vm295_vm3, %v798_v54  ;;  %v1410_v54 = vpack.c.bf16 %v3375_v48, %v3374_v43 }
  0xe9   : > { %v5095_v61 = vpop.f32.mrf.mxu1  ;;  %4054 = vmatmul.mubr.msk.bf16.vlgmr.msra.gmra.mxu1 %vm295_vm3, %v4897_v22  ;;  %4123 = vmatprep.mubr.msk.bf16.mxu0 %vm4646_vm2, %v4644_v1 }
  0xea   : > { %v3849_v2 = vpop.f32.mrf.mxu0  ;;  %4192 = vmatpush3.bf16.msra.mxu1 %v1790_v57  ;;  %4057 = vmatprep.mubr.msk.bf16.mxu1 %vm4646_vm2, %v4644_v1 }
  0xeb   : > { %v3885_v5 = vpop.f32.mrf.mxu1  ;;  %4331 = vmatprep.subr.bf16.mxu1 %v4644_v1  ;;  %v3377_v2 = vld [vmem:[%s4767_s28 + $0x6b] sm:$0xff] }
  0xec   : > { %v5109_v22 = vpop.f32.mrf.mxu0 }
  0xed   : > { %v5111_v7 = vpop.f32.mrf.mxu1 }
  0xee   : > { %v3850_v10 = vpop.f32.mrf.mxu0 }
  0xef   : > { %v3886_v11 = vpop.f32.mrf.mxu1 }
  0xf0   : > { %v5114_v12 = vpop.f32.mrf.mxu0  ;;  %4124 = vmatmul.mubr.msk.bf16.vlgmr.msra.gmra.mxu0 %vm295_vm3, %v1407_v6 }
  0xf1   : > { %v5117_v13 = vpop.f32.mrf.mxu1  ;;  %4058 = vmatmul.mubr.msk.bf16.gmra.mxu1 %vm295_vm3, %v4910_v28  ;;  %4262 = vmatpush3.bf16.msra.mxu0 %v2103_v9  ;;  %v1411_v9 = vpack.c.bf16 %v3377_v2, %v3376_v63  ;;  %v3382_v2 = vld [vmem:[%s4767_s28 + $0x93] sm:$0xff] }
  0xf2   : > { %v3853_v17 = vpop.f32.mrf.mxu0  ;;  %4061 = vmatprep.mubr.msk.bf16.mxu1 %vm4646_vm2, %v4644_v1  ;;  %4127 = vmatprep.mubr.msk.bf16.mxu0 %vm4646_vm2, %v4644_v1 }
  0xf3   : > { %v3889_v18 = vpop.f32.mrf.mxu1  ;;  %4401 = vmatprep.subr.bf16.mxu0 %v4644_v1  ;;  %v3378_v17 = vld [vmem:[%s4767_s28 + $0x73] sm:$0xff] }
  0xf4   : > { %v5128_v19 = vpop.f32.mrf.mxu0  ;;  %v3379_v18 = vld [vmem:[%s4767_s28 + $0x7b] sm:$0xff] }
  0xf5   : > { %v5130_v23 = vpop.f32.mrf.mxu1  ;;  %v1412_v29 = vpack.c.bf16 %v3379_v18, %v3378_v17 }
  0xf6   : > { %v3854_v28 = vpop.f32.mrf.mxu0 }
  0xf7   : > { %v3890_v24 = vpop.f32.mrf.mxu1 }
  0xf8   : > { %v5132_v25 = vpop.f32.mrf.mxu0  ;;  %4128 = vmatmul.mubr.msk.bf16.gmra.mxu0 %vm295_vm3, %v1408_v21 }
  0xf9   : > { %v5135_v26 = vpop.f32.mrf.mxu1  ;;  %4062 = vmatmul.mubr.msk.bf16.gmra.mxu1 %vm295_vm3, %v4923_v34  ;;  %4131 = vmatprep.mubr.msk.bf16.mxu0 %vm4646_vm2, %v4644_v1 }
  0xfa   : > { %v3857_v31 = vpop.f32.mrf.mxu0  ;;  %4065 = vmatprep.mubr.msk.bf16.mxu1 %vm4646_vm2, %v4644_v1 }
  0xfb   : > { %v3893_v32 = vpop.f32.mrf.mxu1 }
  0xfc   : > { %v5145_v33 = vpop.f32.mrf.mxu0 }
  0xfd   : > { %v5147_v37 = vpop.f32.mrf.mxu1 }
  0xfe   : > { %v3858_v38 = vpop.f32.mrf.mxu0 }
  0xff   : > { %v3894_v39 = vpop.f32.mrf.mxu1  ;;  %v3380_v38 = vld [vmem:[%s4767_s28 + $0x83] sm:$0xff] }
 0x100   : > { %v5149_v34 = vpop.f32.mrf.mxu0  ;;  %4132 = vmatmul.mubr.msk.bf16.gmra.mxu0 %vm295_vm3, %v1409_v36  ;;  %v3381_v39 = vld [vmem:[%s4767_s28 + $0x8b] sm:$0xff] }
 0x101   : > { %v5152_v41 = vpop.f32.mrf.mxu1  ;;  %4066 = vmatmul.mubr.msk.bf16.gmra.mxu1 %vm295_vm3, %v4936_v40  ;;  %4135 = vmatprep.mubr.msk.bf16.mxu0 %vm4646_vm2, %v4644_v1 }
 0x102   : > { %v3861_v49 = vpop.f32.mrf.mxu0  ;;  %4069 = vmatprep.mubr.msk.bf16.mxu1 %vm4646_vm2, %v4644_v1 }
 0x103   : > { %v3897_v50 = vpop.f32.mrf.mxu1 }
 0x104   : > { %v5162_v51 = vpop.f32.mrf.mxu0  ;;  %v1413_v50 = vpack.c.bf16 %v3381_v39, %v3380_v38  ;;  %v3385_v38 = vld [vmem:[%s4767_s28 + $0xab] sm:$0xff] }
 0x105   : > { %v5164_v56 = vpop.f32.mrf.mxu1 }
 0x106   : > { %v3862_v57 = vpop.f32.mrf.mxu0 }
 0x107   : > { %v3898_v59 = vpop.f32.mrf.mxu1 }
 0x108   : > { %v5166_v40 = vpop.f32.mrf.mxu0  ;;  %4136 = vmatmul.mubr.msk.bf16.gmra.mxu0 %vm295_vm3, %v1410_v54 }
 0x109   : > { %v5169_v62 = vpop.f32.mrf.mxu1  ;;  %4070 = vmatmul.mubr.msk.bf16.gmra.mxu1 %vm295_vm3, %v4949_v46  ;;  %4139 = vmatprep.mubr.msk.bf16.mxu0 %vm4646_vm2, %v4644_v1 }
 0x10a   : > { %v3865_v3 = vpop.f32.mrf.mxu0  ;;  %4073 = vmatprep.mubr.msk.bf16.mxu1 %vm4646_vm2, %v4644_v1 }
 0x10b   : > { %v3901_v5 = vpop.f32.mrf.mxu1  ;;  %v3383_v3 = vld [vmem:[%s4767_s28 + $0x9b] sm:$0xff] }
 0x10c   : > { %v5179_v6 = vpop.f32.mrf.mxu0  ;;  %v1414_v17 = vpack.c.bf16 %v3383_v3, %v3382_v2 }
 0x10d   : > { %v5181_v10 = vpop.f32.mrf.mxu1 }
 0x10e   : > { %v3866_v11 = vpop.f32.mrf.mxu0 }
 0x10f   : > { %v3902_v15 = vpop.f32.mrf.mxu1 }
 0x110   : > { %v5183_v46 = vpop.f32.mrf.mxu0  ;;  %4140 = vmatmul.mubr.msk.bf16.gmra.mxu0 %vm295_vm3, %v1411_v9 }
 0x111   : > { %v5186_v16 = vpop.f32.mrf.mxu1  ;;  %4074 = vmatmul.mubr.msk.bf16.gmra.mxu1 %vm295_vm3, %v4962_v52  ;;  %4143 = vmatprep.mubr.msk.bf16.mxu0 %vm4646_vm2, %v4644_v1 }
 0x112   : > { %v3869_v21 = vpop.f32.mrf.mxu0  ;;  %4077 = vmatprep.mubr.msk.bf16.mxu1 %vm4646_vm2, %v4644_v1 }
 0x113   : > { %v3905_v28 = vpop.f32.mrf.mxu1 }
 0x114   : > { %v5196_v24 = vpop.f32.mrf.mxu0 }
 0x115   : > { %v5198_v30 = vpop.f32.mrf.mxu1 }
 0x116   : > { %v3870_v31 = vpop.f32.mrf.mxu0 }
 0x117   : > { %v3906_v32 = vpop.f32.mrf.mxu1 }
 0x118   : > { %v5200_v52 = vpop.f32.mrf.mxu0  ;;  %4144 = vmatmul.mubr.msk.bf16.gmra.mxu0 %vm295_vm3, %v1412_v29  ;;  %v3384_v32 = vld [vmem:[%s4767_s28 + $0xa3] sm:$0xff] }
 0x119   : > { %v5203_v36 = vpop.f32.mrf.mxu1  ;;  %4078 = vmatmul.mubr.msk.bf16.gmra.mxu1 %vm295_vm3, %v4975_v58  ;;  %4147 = vmatprep.mubr.msk.bf16.mxu0 %vm4646_vm2, %v4644_v1 }
 0x11a   : > { %v3873_v43 = vpop.f32.mrf.mxu0  ;;  %4081 = vmatprep.mubr.msk.bf16.mxu1 %vm4646_vm2, %v4644_v1 }
 0x11b   : > { %v3909_v48 = vpop.f32.mrf.mxu1 }
 0x11c   : > { %v5213_v49 = vpop.f32.mrf.mxu0 }
 0x11d   : > { %v5215_v54 = vpop.f32.mrf.mxu1 }
 0x11e   : > { %v3874_v57 = vpop.f32.mrf.mxu0 }
 0x11f   : > { %v3910_v59 = vpop.f32.mrf.mxu1 }
 0x120   : > { %v5217_v58 = vpop.f32.mrf.mxu0  ;;  %4148 = vmatmul.mubr.msk.bf16.gmra.mxu0 %vm295_vm3, %v1413_v50  ;;  %v1415_v50 = vpack.c.bf16 %v3385_v38, %v3384_v32 }
 0x121   : > { %v611_v63 = vpop.f32.mrf.mxu1  ;;  %4082 = vmatmul.mubr.msk.bf16.gmra.mxu1 %vm295_vm3, %v4988_v0  ;;  %4151 = vmatprep.mubr.msk.bf16.mxu0 %vm4646_vm2, %v4644_v1 }
 0x122   : > { %v612_v5 = vadd.f32 %v611_v63, %v5068_v44  ;;  %v3877_v9 = vpop.f32.mrf.mxu0  ;;  %4085 = vmatprep.mubr.msk.bf16.mxu1 %vm4646_vm2, %v4644_v1 }
 0x123   : > { %v3915_v11 = vpop.f32.mrf.mxu1  ;;  %v3386_v9 = vld [vmem:[%s4767_s28 + $0xb3] sm:$0xff] }
 0x124   : > { %v5229_v15 = vpop.f32.mrf.mxu0  ;;  %v3387_v11 = vld [vmem:[%s4767_s28 + $0xbb] sm:$0xff] }
 0x125   : > { %v614_v18 = vpop.f32.mrf.mxu1 }
 0x126   : > { %v615_v0 = vadd.f32 %v614_v18, %v5086_v53  ;;  %v3878_v21 = vpop.f32.mrf.mxu0 }
 0x127   : > { %v3916_v28 = vpop.f32.mrf.mxu1  ;;  %v1416_v21 = vpack.c.bf16 %v3387_v11, %v3386_v9 }
 0x128   : > { %v889_v29 = vpop.f32.mrf.mxu0  ;;  %4152 = vmatmul.mubr.msk.bf16.gmra.mxu0 %vm295_vm3, %v1414_v17 }
 0x129   : > { %v619_v31 = vpop.f32.mrf.mxu1  ;;  %v5233_v44 = vadd.f32 %v889_v29, %v612_v5  ;;  %4086 = vmatmul.mubr.msk.bf16.gmra.mxu1 %vm295_vm3, %v5001_v8  ;;  %4155 = vmatprep.mubr.msk.bf16.mxu0 %vm4646_vm2, %v4644_v1 }
 0x12a   : > { %v620_v39 = vadd.f32 %v619_v31, %v5092_v60  ;;  %v3985_v43 = vpop.f32.mrf.mxu0  ;;  %4089 = vmatprep.mubr.msk.bf16.mxu1 %vm4646_vm2, %v4644_v1 }
 0x12b   : > { %v3919_v53 = vpop.f32.mrf.mxu1  ;;  %v3388_v43 = vld [vmem:[%s4767_s28 + $0xc3] sm:$0xff] }
 0x12c   : > { %v892_v48 = vpop.f32.mrf.mxu0  ;;  %v3389_v53 = vld [vmem:[%s4767_s28 + $0xcb] sm:$0xff] }
 0x12d   : > { %v622_v57 = vpop.f32.mrf.mxu1  ;;  %v5244_v59 = vadd.f32 %v892_v48, %v615_v0 }
 0x12e   : > { %v623_v8 = vadd.f32 %v622_v57, %v5109_v22  ;;  %v3986_v63 = vpop.f32.mrf.mxu0 }
 0x12f   : > { %v3920_v2 = vpop.f32.mrf.mxu1 }
 0x130   : > { %v897_v3 = vpop.f32.mrf.mxu0  ;;  %4156 = vmatmul.mubr.msk.bf16.gmra.mxu0 %vm295_vm3, %v1415_v50 }
 0x131   : > { %v627_v60 = vpop.f32.mrf.mxu1  ;;  %v5248_v5 = vadd.f32 %v897_v3, %v620_v39  ;;  %4090 = vmatmul.mubr.msk.bf16.gmra.mxu1 %vm295_vm3, %v5014_v14  ;;  %4159 = vmatprep.mubr.msk.bf16.mxu0 %vm4646_vm2, %v4644_v1 }
 0x132   : > { %v628_v17 = vadd.f32 %v627_v60, %v5114_v12  ;;  %v3989_v18 = vpop.f32.mrf.mxu0  ;;  %4093 = vmatprep.mubr.msk.bf16.mxu1 %vm4646_vm2, %v4644_v1 }
 0x133   : > { %v3923_v22 = vpop.f32.mrf.mxu1  ;;  %v3391_v18 = vld [vmem:[%s4767_s28 + $0xdb] sm:$0xff] }
 0x134   : > { %v900_v0 = vpop.f32.mrf.mxu0 }
 0x135   : > { %v630_v28 = vpop.f32.mrf.mxu1  ;;  %v5259_v29 = vadd.f32 %v900_v0, %v623_v8  ;;  %v1417_v8 = vpack.c.bf16 %v3389_v53, %v3388_v43  ;;  %v3392_v53 = vld [vmem:[%s4767_s28 + $0xe3] sm:$0xff] }
 0x136   : > { %v631_v14 = vadd.f32 %v630_v28, %v5128_v19  ;;  %v3990_v31 = vpop.f32.mrf.mxu0 }
 0x137   : > { %v3924_v32 = vpop.f32.mrf.mxu1 }
 0x138   : > { %v905_v38 = vpop.f32.mrf.mxu0  ;;  %4160 = vmatmul.mubr.msk.bf16.gmra.mxu0 %vm295_vm3, %v1416_v21 }
 0x139   : > { %v635_v12 = vpop.f32.mrf.mxu1  ;;  %v5263_v39 = vadd.f32 %v905_v38, %v628_v17  ;;  %4094 = vmatmul.mubr.msk.bf16.gmra.mxu1 %vm295_vm3, %v5027_v20  ;;  %4163 = vmatprep.mubr.msk.bf16.mxu0 %vm4646_vm2, %v4644_v1  ;;  %v3390_v17 = vld [vmem:[%s4767_s28 + $0xd3] sm:$0xff] }
 0x13a   : > { %v636_v48 = vadd.f32 %v635_v12, %v5132_v25  ;;  %v3993_v50 = vpop.f32.mrf.mxu0  ;;  %4097 = vmatprep.mubr.msk.bf16.mxu1 %vm4646_vm2, %v4644_v1  ;;  %v1418_v28 = vpack.c.bf16 %v3391_v18, %v3390_v17  ;;  %v3394_v17 = vld [vmem:[%s4767_s28 + $0xf3] sm:$0xff]  ;;  %v3395_v18 = vld [vmem:[%s4767_s28 + $0xfb] sm:$0xff] }
 0x13b   : > { %v3927_v19 = vpop.f32.mrf.mxu1 }
 0x13c   : > { %v908_v57 = vpop.f32.mrf.mxu0 }
 0x13d   : > { %v638_v63 = vpop.f32.mrf.mxu1  ;;  %v5274_v2 = vadd.f32 %v908_v57, %v631_v14 }
 0x13e   : > { %v639_v20 = vadd.f32 %v638_v63, %v5145_v33  ;;  %v3994_v3 = vpop.f32.mrf.mxu0 }
 0x13f   : > { %v3928_v60 = vpop.f32.mrf.mxu1 }
 0x140   : > { %v913_v9 = vpop.f32.mrf.mxu0  ;;  %4164 = vmatmul.mubr.msk.bf16.gmra.mxu0 %vm295_vm3, %v1417_v8 }
 0x141   : > { %v643_v25 = vpop.f32.mrf.mxu1  ;;  %v5278_v11 = vadd.f32 %v913_v9, %v636_v48  ;;  %4098 = vmatmul.mubr.msk.bf16.gmra.mxu1 %vm295_vm3, %v5040_v27  ;;  %4167 = vmatprep.mubr.msk.bf16.mxu0 %vm4646_vm2, %v4644_v1  ;;  %v3393_v48 = vld [vmem:[%s4767_s28 + $0xeb] sm:$0xff] }
 0x142   : > { %v644_v22 = vadd.f32 %v643_v25, %v5149_v34  ;;  %v3997_v0 = vpop.f32.mrf.mxu0  ;;  %4101 = vmatprep.mubr.msk.bf16.mxu1 %vm4646_vm2, %v4644_v1  ;;  %v1419_v8 = vpack.c.bf16 %v3393_v48, %v3392_v53  ;;  %v3396_v48 = vld [vmem:[%s4767_s28 + $0x103] sm:$0xff] }
 0x143   : > { %v3931_v33 = vpop.f32.mrf.mxu1 }
 0x144   : > { %v916_v21 = vpop.f32.mrf.mxu0 }
 0x145   : > { %v646_v14 = vpop.f32.mrf.mxu1  ;;  %v5289_v31 = vadd.f32 %v916_v21, %v639_v20 }
 0x146   : > { %v647_v27 = vadd.f32 %v646_v14, %v5162_v51  ;;  %v3998_v32 = vpop.f32.mrf.mxu0 }
 0x147   : > { %v3932_v38 = vpop.f32.mrf.mxu1 }
 0x148   : > { %v921_v12 = vpop.f32.mrf.mxu0  ;;  %4168 = vmatmul.mubr.msk.bf16.gmra.mxu0 %vm295_vm3, %v1418_v28  ;;  %v1420_v28 = vpack.c.bf16 %v3395_v18, %v3394_v17 }
 0x149   : > { %v651_v34 = vpop.f32.mrf.mxu1  ;;  %v5293_v43 = vadd.f32 %v921_v12, %v644_v22  ;;  %4102 = vmatmul.mubr.msk.bf16.gmra.mxu1 %vm295_vm3, %v5053_v35  ;;  %4171 = vmatprep.mubr.msk.bf16.mxu0 %vm4646_vm2, %v4644_v1 }
 0x14a   : > { %v652_v50 = vadd.f32 %v651_v34, %v5166_v40  ;;  %v4001_v19 = vpop.f32.mrf.mxu0  ;;  %4105 = vmatprep.mubr.msk.bf16.mxu1 %vm4646_vm2, %v4644_v1 }
 0x14b   : > { %v3935_v51 = vpop.f32.mrf.mxu1 }
 0x14c   : > { %v924_v57 = vpop.f32.mrf.mxu0  ;;  %v3345_v51 = vld [vmem:[%s4767_s28 + $0x11a] sm:$0xff] }
 0x14d   : > { %v654_v63 = vpop.f32.mrf.mxu1  ;;  %v5304_v20 = vadd.f32 %v924_v57, %v647_v27 }
 0x14e   : > { %v655_v35 = vadd.f32 %v654_v63, %v5179_v6  ;;  %v4002_v3 = vpop.f32.mrf.mxu0  ;;  %v3343_v6 = vld [vmem:[%s4767_s28 + $0x10a] sm:$0xff] }
 0x14f   : > { %v3936_v60 = vpop.f32.mrf.mxu1 }
 0x150   : > { %v929_v9 = vpop.f32.mrf.mxu0  ;;  %4172 = vmatmul.mubr.msk.bf16.gmra.mxu0 %vm295_vm3, %v1419_v8 }
 0x151   : > { %v659_v40 = vpop.f32.mrf.mxu1  ;;  %v5308_v25 = vadd.f32 %v929_v9, %v652_v50  ;;  %4106 = vmatmul.mubr.msk.bf16.gmra.mxu1 %vm295_vm3, %v5066_v42  ;;  %4175 = vmatprep.mubr.msk.bf16.mxu0 %vm4646_vm2, %v4644_v1  ;;  %v1109_v42 = vpack.c.bf16 %v3343_v6, %v5078_v47  ;;  %v3397_v50 = vld [vmem:[%s4767_s28 + $0x10b] sm:$0xff]  ;;  %v3399_v6 = vld [vmem:[%s4767_s28 + $0x11b] sm:$0xff] }
 0x152   : > { %v660_v22 = vadd.f32 %v659_v40, %v5183_v46  ;;  %v4005_v0 = vpop.f32.mrf.mxu0  ;;  %4109 = vmatprep.mubr.msk.bf16.mxu1 %vm4646_vm2, %v4644_v1  ;;  %v1421_v63 = vpack.c.bf16 %v3397_v50, %v3396_v48 }
 0x153   : > { %v3939_v33 = vpop.f32.mrf.mxu1  ;;  %v3398_v0 = vld [vmem:[%s4767_s28 + $0x113] sm:$0xff] }
 0x154   : > { %v932_v21 = vpop.f32.mrf.mxu0 }
 0x155   : > { %v662_v14 = vpop.f32.mrf.mxu1  ;;  %v5320_v27 = vadd.f32 %v932_v21, %v655_v35 }
 0x156   : > { %v663_v32 = vadd.f32 %v662_v14, %v5196_v24  ;;  %v4006_v46 = vpop.f32.mrf.mxu0  ;;  %v3344_v24 = vld [vmem:[%s4767_s28 + $0x112] sm:$0xff] }
 0x157   : > { %v3940_v38 = vpop.f32.mrf.mxu1  ;;  %v1110_v60 = vpack.c.bf16 %v3345_v51, %v3344_v24  ;;  %v3400_v24 = vld [vmem:[%s4767_s28 + $0x123] sm:$0xff]  ;;  %v3401_v51 = vld [vmem:[%s4767_s28 + $0x12b] sm:$0x3f] }
 0x158   : > { %v937_v12 = vpop.f32.mrf.mxu0  ;;  %4176 = vmatmul.mubr.msk.bf16.gmra.mxu0 %vm295_vm3, %v1420_v28  ;;  %v3347_v28 = vld [vmem:[%s4767_s28 + $0x12a] sm:$0x3f] }
 0x159   : > { %v667_v34 = vpop.f32.mrf.mxu1  ;;  %v5325_v53 = vadd.f32 %v937_v12, %v660_v22  ;;  %4110 = vmatmul.mubr.msk.bf16.gmra.mxu1 %vm295_vm3, %v1109_v42  ;;  %4179 = vmatprep.mubr.msk.bf16.mxu0 %vm4646_vm2, %v4644_v1 }
 0x15a   : > { %v668_v47 = vadd.f32 %v667_v34, %v5200_v52  ;;  %v4009_v19 = vpop.f32.mrf.mxu0  ;;  %4113 = vmatprep.mubr.msk.bf16.mxu1 %vm4646_vm2, %v4644_v1 }
 0x15b   : > { %v3943_v57 = vpop.f32.mrf.mxu1 }
 0x15c   : > { %v940_v8 = vpop.f32.mrf.mxu0 }
 0x15d   : > { %v670_v35 = vpop.f32.mrf.mxu1  ;;  %v5337_v3 = vadd.f32 %v940_v8, %v663_v32  ;;  %v1422_v32 = vpack.c.bf16 %v3399_v6, %v3398_v0  ;;  %v3423_v8 = vld [vmem:[%s4767_s28 + $0x2c] sm:$0xff] }
 0x15e   : > { %v671_v9 = vadd.f32 %v670_v35, %v5213_v49  ;;  %v4010_v52 = vpop.f32.mrf.mxu0  ;;  %v3346_v49 = vld [vmem:[%s4767_s28 + $0x122] sm:$0xff]  ;;  %v3564_v35 = vld [vmem:[%s6156_s1 + $0xe] sm:$0x3] }
 0x15f   : > { %v3944_v40 = vpop.f32.mrf.mxu1  ;;  %v1111_v12 = vpack.c.bf16 %v3347_v28, %v3346_v49  ;;  %v2415_v0 = vand.u32 %v3564_v35, %v4747_v4 }
 0x160   : > { %v945_v17 = vpop.f32.mrf.mxu0  ;;  %4180 = vmatmul.mubr.msk.bf16.gmra.mxu0 %vm295_vm3, %v1421_v63 }
 0x161   : > { %v675_v18 = vpop.f32.mrf.mxu1  ;;  %v5341_v22 = vadd.f32 %v945_v17, %v668_v47  ;;  %4114 = vmatmul.mubr.msk.bf16.gmra.mxu1 %vm295_vm3, %v1110_v60  ;;  %4183 = vmatprep.mubr.msk.bf16.mxu0 %vm4646_vm2, %v4644_v1 }
 0x162   : > { %v676_v33 = vadd.f32 %v675_v18, %v5217_v58  ;;  %v4013_v21 = vpop.f32.mrf.mxu0  ;;  %4117 = vmatprep.mubr.msk.bf16.mxu1 %vm4646_vm2, %v4644_v1 }
 0x163   : > { %v3947_v14 = vpop.f32.mrf.mxu1 }
 0x164   : > { %v948_v42 = vpop.f32.mrf.mxu0  ;;  %v3476_v14 = vld [vmem:[%s4767_s28 + $0x44] sm:$0xff] }
 0x165   : > { %v678_v46 = vpop.f32.mrf.mxu1  ;;  %v5353_v38 = vadd.f32 %v948_v42, %v671_v9  ;;  %v1423_v9 = vpack.c.bf16 %v3401_v51, %v3400_v24  ;;  %v3477_v42 = vld [vmem:[%s4767_s28 + $0x4c] sm:$0xff] }
 0x166   : > { %v679_v34 = vadd.f32 %v678_v46, %v5229_v15  ;;  %v4014_v58 = vpop.f32.mrf.mxu0  ;;  %v3422_v15 = vld [vmem:[%s4767_s28 + $0x24] sm:$0xff]  ;;  %v3425_v46 = vld [vmem:[%s4767_s28 + $0x3c] sm:$0xff] }
 0x167   : > { %v3948_v48 = vpop.f32.mrf.mxu1  ;;  %v1719_v17 = vpack.c.bf16 %v3423_v8, %v3422_v15 }
 0x168   : > { %v953_v50 = vpop.f32.mrf.mxu0  ;;  %4184 = vmatmul.mubr.msk.bf16.gmra.mxu0 %vm295_vm3, %v1422_v32 }
 0x169   : > { %v683_v47 = vpop.f32.mrf.mxu1  ;;  %v5357_v19 = vadd.f32 %v953_v50, %v676_v33  ;;  %4118 = vmatmul.mubr.msk.bf16.gmra.mxu1 %vm295_vm3, %v1111_v12  ;;  %4187 = vmatprep.mubr.msk.bf16.mxu0 %vm4646_vm2, %v4644_v1  ;;  %v3618_v12 = vld [vmem:[%s6156_s1 + $0x10] sm:$0x3]  ;;  %v2032_v50 = vpack.c.bf16 %v3477_v42, %v3476_v14 }
 0x16a   : > { %v4017_v57 = vpop.f32.mrf.mxu0  ;;  %4193 = vmatprep.mubr.msk.bf16.mxu1 %vm4646_vm2, %v4644_v1  ;;  %v684_v6 = vadd.f32 %v683_v47, %v5072_v45  ;;  %v3424_v45 = vld [vmem:[%s4767_s28 + $0x34] sm:$0xff] }
 0x16b   : > { %v3951_v63 = vpop.f32.mrf.mxu1  ;;  %v1720_v51 = vpack.c.bf16 %v3425_v46, %v3424_v45  ;;  %v2727_v57 = vand.u32 %v3618_v12, %v4747_v4  ;;  %v3481_v46 = vld [vmem:[%s4767_s28 + $0x6c] sm:$0xff] }
 0x16c   : > { %v956_v60 = vpop.f32.mrf.mxu0 }
 0x16d   : > { %v686_v52 = vpop.f32.mrf.mxu1  ;;  %v5371_v40 = vadd.f32 %v956_v60, %v679_v34 }
 0x16e   : > { %v4018_v18 = vpop.f32.mrf.mxu0  ;;  %v687_v34 = vadd.f32 %v686_v52, %v5089_v55  ;;  %v3479_v52 = vld [vmem:[%s4767_s28 + $0x5c] sm:$0xff] }
 0x16f   : > { %v3952_v33 = vpop.f32.mrf.mxu1 }
 0x170   : > { %v961_v21 = vpop.f32.mrf.mxu0  ;;  %4188 = vmatmul.mubr.msk.bf16.gmra.mxu0 %vm295_vm3, %v1423_v9  ;;  %v3478_v9 = vld [vmem:[%s4767_s28 + $0x54] sm:$0xff] }
 0x171   : > { %v691_v49 = vpop.f32.mrf.mxu1  ;;  %v5376_v28 = vadd.f32 %v961_v21, %v684_v6  ;;  %4194 = vmatmul.mubr.msk.bf16.vlgmr.msra.gmra.mxu1 %vm295_vm3, %v1719_v17  ;;  %4263 = vmatprep.mubr.msk.bf16.mxu0 %vm4646_vm2, %v4644_v1 }
 0x172   : > { %v4021_v32 = vpop.f32.mrf.mxu0  ;;  %4332 = vmatpush3.bf16.msra.mxu1 %v2415_v0  ;;  %4197 = vmatprep.mubr.msk.bf16.mxu1 %vm4646_vm2, %v4644_v1  ;;  %v692_v8 = vadd.f32 %v691_v49, %v5095_v61  ;;  %v2033_v0 = vpack.c.bf16 %v3479_v52, %v3478_v9 }
 0x173   : > { %v3955_v58 = vpop.f32.mrf.mxu1 }
 0x174   : > { %v964_v48 = vpop.f32.mrf.mxu0 }
 0x175   : > { %v694_v47 = vpop.f32.mrf.mxu1  ;;  %v5391_v24 = vadd.f32 %v964_v48, %v687_v34 }
 0x176   : > { %v4022_v15 = vpop.f32.mrf.mxu0  ;;  %v695_v4 = vadd.f32 %v694_v47, %v5111_v7  ;;  %v3480_v7 = vld [vmem:[%s4767_s28 + $0x64] sm:$0xff] }
 0x177   : > { %v3956_v63 = vpop.f32.mrf.mxu1  ;;  %v2034_v48 = vpack.c.bf16 %v3481_v46, %v3480_v7 }
 0x178   : > { %v969_v35 = vpop.f32.mrf.mxu0  ;;  %4264 = vmatmul.mubr.msk.bf16.vlgmr.msra.gmra.mxu0 %vm295_vm3, %v2032_v50 }
 0x179   : > { %v699_v60 = vpop.f32.mrf.mxu1  ;;  %v5396_v55 = vadd.f32 %v969_v35, %v692_v8  ;;  %4198 = vmatmul.mubr.msk.bf16.gmra.mxu1 %vm295_vm3, %v1720_v51  ;;  %4402 = vmatpush3.bf16.msra.mxu0 %v2727_v57 }
 0x17a   : > { %v4025_v17 = vpop.f32.mrf.mxu0  ;;  %4201 = vmatprep.mubr.msk.bf16.mxu1 %vm4646_vm2, %v4644_v1  ;;  %4267 = vmatprep.mubr.msk.bf16.mxu0 %vm4646_vm2, %v4644_v1  ;;  %v700_v49 = vadd.f32 %v699_v60, %v5117_v13  ;;  %v3483_v60 = vld [vmem:[%s4767_s28 + $0x7c] sm:$0xff] }
 0x17b   : > { %v3959_v61 = vpop.f32.mrf.mxu1 }
 0x17c   : > { %v972_v18 = vpop.f32.mrf.mxu0 }
 0x17d   : > { %v702_v6 = vpop.f32.mrf.mxu1  ;;  %v5406_v33 = vadd.f32 %v972_v18, %v695_v4 }
 0x17e   : > { %v4026_v21 = vpop.f32.mrf.mxu0  ;;  %v703_v13 = vadd.f32 %v702_v6, %v5130_v23  ;;  %v3482_v23 = vld [vmem:[%s4767_s28 + $0x74] sm:$0xff] }
 0x17f   : > { %v3960_v14 = vpop.f32.mrf.mxu1  ;;  %v2035_v4 = vpack.c.bf16 %v3483_v60, %v3482_v23 }
 0x180   : > { %v977_v42 = vpop.f32.mrf.mxu0  ;;  %4268 = vmatmul.mubr.msk.bf16.gmra.mxu0 %vm295_vm3, %v2033_v0 }
 0x181   : > { %v707_v32 = vpop.f32.mrf.mxu1  ;;  %v5410_v45 = vadd.f32 %v977_v42, %v700_v49  ;;  %4202 = vmatmul.mubr.msk.bf16.gmra.mxu1 %vm295_vm3, %v2032_v50  ;;  %4271 = vmatprep.mubr.msk.bf16.mxu0 %vm4646_vm2, %v4644_v1 }
 0x182   : > { %v4029_v12 = vpop.f32.mrf.mxu0  ;;  %4205 = vmatprep.mubr.msk.bf16.mxu1 %vm4646_vm2, %v4644_v1  ;;  %v708_v57 = vadd.f32 %v707_v32, %v5135_v26  ;;  %v3485_v32 = vld [vmem:[%s4767_s28 + $0x8c] sm:$0xff] }
 0x183   : > { %v3963_v34 = vpop.f32.mrf.mxu1 }
 0x184   : > { %v980_v58 = vpop.f32.mrf.mxu0 }
 0x185   : > { %v710_v47 = vpop.f32.mrf.mxu1  ;;  %v5420_v51 = vadd.f32 %v980_v58, %v703_v13 }
 0x186   : > { %v4030_v50 = vpop.f32.mrf.mxu0  ;;  %v711_v26 = vadd.f32 %v710_v47, %v5147_v37  ;;  %v3484_v37 = vld [vmem:[%s4767_s28 + $0x84] sm:$0xff] }
 0x187   : > { %v3964_v15 = vpop.f32.mrf.mxu1  ;;  %v2036_v13 = vpack.c.bf16 %v3485_v32, %v3484_v37 }
 0x188   : > { %v985_v8 = vpop.f32.mrf.mxu0  ;;  %4272 = vmatmul.mubr.msk.bf16.gmra.mxu0 %vm295_vm3, %v2034_v48 }
 0x189   : > { %v715_v63 = vpop.f32.mrf.mxu1  ;;  %v5424_v35 = vadd.f32 %v985_v8, %v708_v57  ;;  %4206 = vmatmul.mubr.msk.bf16.gmra.mxu1 %vm295_vm3, %v2033_v0  ;;  %4275 = vmatprep.mubr.msk.bf16.mxu0 %vm4646_vm2, %v4644_v1 }
 0x18a   : > { %v4033_v9 = vpop.f32.mrf.mxu0  ;;  %4209 = vmatprep.mubr.msk.bf16.mxu1 %vm4646_vm2, %v4644_v1  ;;  %v716_v6 = vadd.f32 %v715_v63, %v5152_v41  ;;  %v3487_v63 = vld [vmem:[%s4767_s28 + $0x9c] sm:$0xff] }
 0x18b   : > { %v3967_v52 = vpop.f32.mrf.mxu1 }
 0x18c   : > { %v988_v17 = vpop.f32.mrf.mxu0 }
 0x18d   : > { %v718_v61 = vpop.f32.mrf.mxu1  ;;  %v5434_v18 = vadd.f32 %v988_v17, %v711_v26 }
 0x18e   : > { %v4034_v0 = vpop.f32.mrf.mxu0  ;;  %v719_v41 = vadd.f32 %v718_v61, %v5164_v56  ;;  %v3486_v56 = vld [vmem:[%s4767_s28 + $0x94] sm:$0xff] }
 0x18f   : > { %v3968_v21 = vpop.f32.mrf.mxu1  ;;  %v2037_v26 = vpack.c.bf16 %v3487_v63, %v3486_v56 }
 0x190   : > { %v993_v49 = vpop.f32.mrf.mxu0  ;;  %4276 = vmatmul.mubr.msk.bf16.gmra.mxu0 %vm295_vm3, %v2035_v4 }
 0x191   : > { %v723_v14 = vpop.f32.mrf.mxu1  ;;  %v5438_v42 = vadd.f32 %v993_v49, %v716_v6  ;;  %4210 = vmatmul.mubr.msk.bf16.gmra.mxu1 %vm295_vm3, %v2034_v48  ;;  %4279 = vmatprep.mubr.msk.bf16.mxu0 %vm4646_vm2, %v4644_v1 }
 0x192   : > { %v4037_v7 = vpop.f32.mrf.mxu0  ;;  %4213 = vmatprep.mubr.msk.bf16.mxu1 %vm4646_vm2, %v4644_v1  ;;  %v724_v47 = vadd.f32 %v723_v14, %v5169_v62  ;;  %v3489_v14 = vld [vmem:[%s4767_s28 + $0xac] sm:$0xff] }
 0x193   : > { %v3971_v46 = vpop.f32.mrf.mxu1 }
 0x194   : > { %v996_v12 = vpop.f32.mrf.mxu0 }
 0x195   : > { %v726_v34 = vpop.f32.mrf.mxu1  ;;  %v5448_v58 = vadd.f32 %v996_v12, %v719_v41 }
 0x196   : > { %v4038_v48 = vpop.f32.mrf.mxu0  ;;  %v727_v62 = vadd.f32 %v726_v34, %v5181_v10  ;;  %v3488_v10 = vld [vmem:[%s4767_s28 + $0xa4] sm:$0xff] }
 0x197   : > { %v3972_v50 = vpop.f32.mrf.mxu1  ;;  %v2038_v41 = vpack.c.bf16 %v3489_v14, %v3488_v10 }
 0x198   : > { %v1001_v57 = vpop.f32.mrf.mxu0  ;;  %4280 = vmatmul.mubr.msk.bf16.gmra.mxu0 %vm295_vm3, %v2036_v13 }
 0x199   : > { %v731_v15 = vpop.f32.mrf.mxu1  ;;  %v5452_v8 = vadd.f32 %v1001_v57, %v724_v47  ;;  %4214 = vmatmul.mubr.msk.bf16.gmra.mxu1 %vm295_vm3, %v2035_v4  ;;  %4283 = vmatprep.mubr.msk.bf16.mxu0 %vm4646_vm2, %v4644_v1 }
 0x19a   : > { %v4041_v23 = vpop.f32.mrf.mxu0  ;;  %4217 = vmatprep.mubr.msk.bf16.mxu1 %vm4646_vm2, %v4644_v1  ;;  %v732_v61 = vadd.f32 %v731_v15, %v5186_v16  ;;  %v3491_v15 = vld [vmem:[%s4767_s28 + $0xbc] sm:$0xff] }
 0x19b   : > { %v3975_v60 = vpop.f32.mrf.mxu1 }
 0x19c   : > { %v1004_v9 = vpop.f32.mrf.mxu0 }
 0x19d   : > { %v734_v52 = vpop.f32.mrf.mxu1  ;;  %v5462_v17 = vadd.f32 %v1004_v9, %v727_v62 }
 0x19e   : > { %v4042_v4 = vpop.f32.mrf.mxu0  ;;  %v735_v16 = vadd.f32 %v734_v52, %v5198_v30  ;;  %v3490_v30 = vld [vmem:[%s4767_s28 + $0xb4] sm:$0xff] }
 0x19f   : > { %v3976_v0 = vpop.f32.mrf.mxu1  ;;  %v2039_v60 = vpack.c.bf16 %v3491_v15, %v3490_v30 }
 0x1a0   : > { %v1009_v6 = vpop.f32.mrf.mxu0  ;;  %4284 = vmatmul.mubr.msk.bf16.gmra.mxu0 %vm295_vm3, %v2037_v26 }
 0x1a1   : > { %v739_v21 = vpop.f32.mrf.mxu1  ;;  %v5466_v49 = vadd.f32 %v1009_v6, %v732_v61  ;;  %4218 = vmatmul.mubr.msk.bf16.gmra.mxu1 %vm295_vm3, %v2036_v13  ;;  %4287 = vmatprep.mubr.msk.bf16.mxu0 %vm4646_vm2, %v4644_v1 }
 0x1a2   : > { %v4045_v37 = vpop.f32.mrf.mxu0  ;;  %4221 = vmatprep.mubr.msk.bf16.mxu1 %vm4646_vm2, %v4644_v1  ;;  %v740_v34 = vadd.f32 %v739_v21, %v5203_v36  ;;  %v3493_v21 = vld [vmem:[%s4767_s28 + $0xcc] sm:$0xff] }
 0x1a3   : > { %v3979_v32 = vpop.f32.mrf.mxu1 }
 0x1a4   : > { %v1012_v7 = vpop.f32.mrf.mxu0 }
 0x1a5   : > { %v742_v46 = vpop.f32.mrf.mxu1  ;;  %v5476_v12 = vadd.f32 %v1012_v7, %v735_v16 }
 0x1a6   : > { %v4046_v13 = vpop.f32.mrf.mxu0  ;;  %v743_v36 = vadd.f32 %v742_v46, %v5215_v54  ;;  %v3492_v54 = vld [vmem:[%s4767_s28 + $0xc4] sm:$0xff] }
 0x1a7   : > { %v3980_v48 = vpop.f32.mrf.mxu1  ;;  %v2040_v16 = vpack.c.bf16 %v3493_v21, %v3492_v54 }
 0x1a8   : > { %v1017_v47 = vpop.f32.mrf.mxu0  ;;  %4288 = vmatmul.mubr.msk.bf16.gmra.mxu0 %vm295_vm3, %v2038_v41 }
 0x1a9   : > { %v5480_v50 = vadd.f32 %v1017_v47, %v740_v34  ;;  %v1202_v57 = vpop.f32.mrf.mxu1  ;;  %4222 = vmatmul.mubr.msk.bf16.gmra.mxu1 %vm295_vm3, %v2037_v26  ;;  %4291 = vmatprep.mubr.msk.bf16.mxu0 %vm4646_vm2, %v4644_v1  ;;  %v3494_v47 = vld [vmem:[%s4767_s28 + $0xd4] sm:$0xff] }
 0x1aa   : > { %v1337_v56 = vadd.f32 %v1202_v57, %v5233_v44  ;;  %v4049_v63 = vpop.f32.mrf.mxu0  ;;  %4225 = vmatprep.mubr.msk.bf16.mxu1 %vm4646_vm2, %v4644_v1  ;;  %v3495_v57 = vld [vmem:[%s4767_s28 + $0xdc] sm:$0xff] }
 0x1ab   : > { %v4055_v23 = vpop.f32.mrf.mxu1  ;;  %v2041_v63 = vpack.c.bf16 %v3495_v57, %v3494_v47 }
 0x1ac   : > { %v1020_v62 = vpop.f32.mrf.mxu0 }
 0x1ad   : > { %v5491_v9 = vadd.f32 %v1020_v62, %v743_v36  ;;  %v1205_v26 = vpop.f32.mrf.mxu1 }
 0x1ae   : > { %v1338_v52 = vadd.f32 %v1205_v26, %v5244_v59  ;;  %v4050_v4 = vpop.f32.mrf.mxu0 }
 0x1af   : > { %v4056_v61 = vpop.f32.mrf.mxu1 }
 0x1b0   : > { %v1514_v0 = vpop.f32.mrf.mxu0  ;;  %4292 = vmatmul.mubr.msk.bf16.gmra.mxu0 %vm295_vm3, %v2039_v60  ;;  %v3496_v61 = vld [vmem:[%s4767_s28 + $0xe4] sm:$0xff] }
 0x1b1   : > { %v1210_v44 = vpop.f32.mrf.mxu1  ;;  %v5495_v6 = vadd.f32 %v1514_v0, %v1337_v56  ;;  %4226 = vmatmul.mubr.msk.bf16.gmra.mxu1 %vm295_vm3, %v2038_v41  ;;  %4295 = vmatprep.mubr.msk.bf16.mxu0 %vm4646_vm2, %v4644_v1  ;;  %v3497_v0 = vld [vmem:[%s4767_s28 + $0xec] sm:$0xff] }
 0x1b2   : > { %v1339_v10 = vadd.f32 %v1210_v44, %v5248_v5  ;;  %v4125_v14 = vpop.f32.mrf.mxu0  ;;  %4229 = vmatprep.mubr.msk.bf16.mxu1 %vm4646_vm2, %v4644_v1 }
 0x1b3   : > { %v4059_v59 = vpop.f32.mrf.mxu1 }
 0x1b4   : > { %v1517_v37 = vpop.f32.mrf.mxu0 }
 0x1b5   : > { %v1213_v32 = vpop.f32.mrf.mxu1  ;;  %v5505_v7 = vadd.f32 %v1517_v37, %v1338_v52 }
 0x1b6   : > { %v1340_v41 = vadd.f32 %v1213_v32, %v5259_v29  ;;  %v4126_v46 = vpop.f32.mrf.mxu0 }
 0x1b7   : > { %v4060_v13 = vpop.f32.mrf.mxu1 }
 0x1b8   : > { %v1522_v34 = vpop.f32.mrf.mxu0  ;;  %4296 = vmatmul.mubr.msk.bf16.gmra.mxu0 %vm295_vm3, %v2040_v16  ;;  %v3498_v13 = vld [vmem:[%s4767_s28 + $0xf4] sm:$0xff] }
 0x1b9   : > { %v1218_v5 = vpop.f32.mrf.mxu1  ;;  %v5509_v48 = vadd.f32 %v1522_v34, %v1339_v10  ;;  %4230 = vmatmul.mubr.msk.bf16.gmra.mxu1 %vm295_vm3, %v2039_v60  ;;  %4299 = vmatprep.mubr.msk.bf16.mxu0 %vm4646_vm2, %v4644_v1  ;;  %v2042_v10 = vpack.c.bf16 %v3497_v0, %v3496_v61  ;;  %v3499_v34 = vld [vmem:[%s4767_s28 + $0xfc] sm:$0xff] }
 0x1ba   : > { %v1341_v30 = vadd.f32 %v1218_v5, %v5263_v39  ;;  %v4129_v15 = vpop.f32.mrf.mxu0  ;;  %4233 = vmatprep.mubr.msk.bf16.mxu1 %vm4646_vm2, %v4644_v1 }
 0x1bb   : > { %v4063_v29 = vpop.f32.mrf.mxu1 }
 0x1bc   : > { %v1525_v56 = vpop.f32.mrf.mxu0 }
 0x1bd   : > { %v1221_v36 = vpop.f32.mrf.mxu1  ;;  %v5519_v23 = vadd.f32 %v1525_v56, %v1340_v41 }
 0x1be   : > { %v1342_v62 = vadd.f32 %v1221_v36, %v5274_v2  ;;  %v4130_v60 = vpop.f32.mrf.mxu0 }
 0x1bf   : > { %v4064_v26 = vpop.f32.mrf.mxu1 }
 0x1c0   : > { %v1530_v52 = vpop.f32.mrf.mxu0  ;;  %4300 = vmatmul.mubr.msk.bf16.gmra.mxu0 %vm295_vm3, %v2041_v63  ;;  %v3500_v26 = vld [vmem:[%s4767_s28 + $0x104] sm:$0xff] }
 0x1c1   : > { %v1226_v39 = vpop.f32.mrf.mxu1  ;;  %v5523_v4 = vadd.f32 %v1530_v52, %v1341_v30  ;;  %4234 = vmatmul.mubr.msk.bf16.gmra.mxu1 %vm295_vm3, %v2040_v16  ;;  %4303 = vmatprep.mubr.msk.bf16.mxu0 %vm4646_vm2, %v4644_v1  ;;  %v2043_v30 = vpack.c.bf16 %v3499_v34, %v3498_v13  ;;  %v3501_v52 = vld [vmem:[%s4767_s28 + $0x10c] sm:$0xff] }
 0x1c2   : > { %v1343_v44 = vadd.f32 %v1226_v39, %v5278_v11  ;;  %v4133_v54 = vpop.f32.mrf.mxu0  ;;  %4237 = vmatprep.mubr.msk.bf16.mxu1 %vm4646_vm2, %v4644_v1 }
 0x1c3   : > { %v4067_v2 = vpop.f32.mrf.mxu1 }
 0x1c4   : > { %v1533_v21 = vpop.f32.mrf.mxu0 }
 0x1c5   : > { %v1229_v14 = vpop.f32.mrf.mxu1  ;;  %v5533_v59 = vadd.f32 %v1533_v21, %v1342_v62 }
 0x1c6   : > { %v1344_v37 = vadd.f32 %v1229_v14, %v5289_v31  ;;  %v4134_v16 = vpop.f32.mrf.mxu0 }
 0x1c7   : > { %v4068_v32 = vpop.f32.mrf.mxu1 }
 0x1c8   : > { %v1538_v41 = vpop.f32.mrf.mxu0  ;;  %4304 = vmatmul.mubr.msk.bf16.gmra.mxu0 %vm295_vm3, %v2042_v10  ;;  %v3502_v32 = vld [vmem:[%s4767_s28 + $0x114] sm:$0xff] }
 0x1c9   : > { %v1234_v11 = vpop.f32.mrf.mxu1  ;;  %v5537_v46 = vadd.f32 %v1538_v41, %v1343_v44  ;;  %4238 = vmatmul.mubr.msk.bf16.gmra.mxu1 %vm295_vm3, %v2041_v63  ;;  %4307 = vmatprep.mubr.msk.bf16.mxu0 %vm4646_vm2, %v4644_v1  ;;  %v2044_v44 = vpack.c.bf16 %v3501_v52, %v3500_v26  ;;  %v3503_v41 = vld [vmem:[%s4767_s28 + $0x11c] sm:$0xff] }
 0x1ca   : > { %v1345_v5 = vadd.f32 %v1234_v11, %v5293_v43  ;;  %v4137_v47 = vpop.f32.mrf.mxu0  ;;  %4241 = vmatprep.mubr.msk.bf16.mxu1 %vm4646_vm2, %v4644_v1 }
 0x1cb   : > { %v4071_v31 = vpop.f32.mrf.mxu1 }
 0x1cc   : > { %v1541_v57 = vpop.f32.mrf.mxu0 }
 0x1cd   : > { %v1237_v15 = vpop.f32.mrf.mxu1  ;;  %v5547_v29 = vadd.f32 %v1541_v57, %v1344_v37 }
 0x1ce   : > { %v1346_v56 = vadd.f32 %v1237_v15, %v5304_v20  ;;  %v4138_v63 = vpop.f32.mrf.mxu0 }
 0x1cf   : > { %v4072_v36 = vpop.f32.mrf.mxu1 }
 0x1d0   : > { %v1546_v62 = vpop.f32.mrf.mxu0  ;;  %4308 = vmatmul.mubr.msk.bf16.gmra.mxu0 %vm295_vm3, %v2043_v30  ;;  %v3504_v36 = vld [vmem:[%s4767_s28 + $0x124] sm:$0xff] }
 0x1d1   : > { %v1242_v43 = vpop.f32.mrf.mxu1  ;;  %v5551_v60 = vadd.f32 %v1546_v62, %v1345_v5  ;;  %4242 = vmatmul.mubr.msk.bf16.gmra.mxu1 %vm295_vm3, %v2042_v10  ;;  %4311 = vmatprep.mubr.msk.bf16.mxu0 %vm4646_vm2, %v4644_v1  ;;  %v2045_v5 = vpack.c.bf16 %v3503_v41, %v3502_v32  ;;  %v3505_v62 = vld [vmem:[%s4767_s28 + $0x12c] sm:$0xff] }
 0x1d2   : > { %v1347_v39 = vadd.f32 %v1242_v43, %v5308_v25  ;;  %v4141_v61 = vpop.f32.mrf.mxu0  ;;  %4245 = vmatprep.mubr.msk.bf16.mxu1 %vm4646_vm2, %v4644_v1 }
 0x1d3   : > { %v4075_v20 = vpop.f32.mrf.mxu1 }
 0x1d4   : > { %v1549_v0 = vpop.f32.mrf.mxu0 }
 0x1d5   : > { %v1245_v54 = vpop.f32.mrf.mxu1  ;;  %v5561_v2 = vadd.f32 %v1549_v0, %v1346_v56 }
 0x1d6   : > { %v1348_v21 = vadd.f32 %v1245_v54, %v5320_v27  ;;  %v4142_v10 = vpop.f32.mrf.mxu0 }
 0x1d7   : > { %v4076_v14 = vpop.f32.mrf.mxu1 }
 0x1d8   : > { %v1554_v37 = vpop.f32.mrf.mxu0  ;;  %4312 = vmatmul.mubr.msk.bf16.gmra.mxu0 %vm295_vm3, %v2044_v44  ;;  %v3506_v14 = vld [vmem:[%s4767_s28 + $0x134] sm:$0xff] }
 0x1d9   : > { %v1250_v25 = vpop.f32.mrf.mxu1  ;;  %v5565_v16 = vadd.f32 %v1554_v37, %v1347_v39  ;;  %4246 = vmatmul.mubr.msk.bf16.gmra.mxu1 %vm295_vm3, %v2043_v30  ;;  %4315 = vmatprep.mubr.msk.bf16.mxu0 %vm4646_vm2, %v4644_v1  ;;  %v2046_v39 = vpack.c.bf16 %v3505_v62, %v3504_v36  ;;  %v3507_v37 = vld [vmem:[%s4767_s28 + $0x13c] sm:$0xff]  ;;  %v3509_v62 = vld [vmem:[%s4767_s28 + $0x14c] sm:$0x3f] }
 0x1da   : > { %v1349_v11 = vadd.f32 %v1250_v25, %v5325_v53  ;;  %v4145_v13 = vpop.f32.mrf.mxu0  ;;  %4249 = vmatprep.mubr.msk.bf16.mxu1 %vm4646_vm2, %v4644_v1 }
 0x1db   : > { %v4079_v27 = vpop.f32.mrf.mxu1  ;;  %v2047_v13 = vpack.c.bf16 %v3507_v37, %v3506_v14 }
 0x1dc   : > { %v1557_v34 = vpop.f32.mrf.mxu0 }
 0x1dd   : > { %v1253_v47 = vpop.f32.mrf.mxu1  ;;  %v5575_v31 = vadd.f32 %v1557_v34, %v1348_v21 }
 0x1de   : > { %v1350_v57 = vadd.f32 %v1253_v47, %v5337_v3  ;;  %v4146_v30 = vpop.f32.mrf.mxu0 }
 0x1df   : > { %v4080_v15 = vpop.f32.mrf.mxu1 }
 0x1e0   : > { %v1562_v56 = vpop.f32.mrf.mxu0  ;;  %4316 = vmatmul.mubr.msk.bf16.gmra.mxu0 %vm295_vm3, %v2045_v5 }
 0x1e1   : > { %v1258_v53 = vpop.f32.mrf.mxu1  ;;  %v5579_v63 = vadd.f32 %v1562_v56, %v1349_v11  ;;  %4250 = vmatmul.mubr.msk.bf16.gmra.mxu1 %vm295_vm3, %v2044_v44  ;;  %4319 = vmatprep.mubr.msk.bf16.mxu0 %vm4646_vm2, %v4644_v1 }
 0x1e2   : > { %v1351_v43 = vadd.f32 %v1258_v53, %v5341_v22  ;;  %v4149_v26 = vpop.f32.mrf.mxu0  ;;  %4253 = vmatprep.mubr.msk.bf16.mxu1 %vm4646_vm2, %v4644_v1  ;;  %v3508_v53 = vld [vmem:[%s4767_s28 + $0x144] sm:$0xff] }
 0x1e3   : > { %v4083_v3 = vpop.f32.mrf.mxu1  ;;  %v3531_v26 = vld [vmem:[%s4767_s28 + $0x4d] sm:$0xff] }
 0x1e4   : > { %v1565_v52 = vpop.f32.mrf.mxu0 }
 0x1e5   : > { %v1261_v61 = vpop.f32.mrf.mxu1  ;;  %v5589_v20 = vadd.f32 %v1565_v52, %v1350_v57 }
 0x1e6   : > { %v1352_v0 = vadd.f32 %v1261_v61, %v5353_v38  ;;  %v4150_v44 = vpop.f32.mrf.mxu0  ;;  %v3455_v38 = vld [vmem:[%s4767_s28 + $0x12c] sm:$0x3f] }
 0x1e7   : > { %v4084_v54 = vpop.f32.mrf.mxu1 }
 0x1e8   : > { %v1570_v21 = vpop.f32.mrf.mxu0  ;;  %4320 = vmatmul.mubr.msk.bf16.gmra.mxu0 %vm295_vm3, %v2046_v39  ;;  %v2048_v39 = vpack.c.bf16 %v3509_v62, %v3508_v53 }
 0x1e9   : > { %v1266_v22 = vpop.f32.mrf.mxu1  ;;  %v5593_v10 = vadd.f32 %v1570_v21, %v1351_v43  ;;  %4254 = vmatmul.mubr.msk.bf16.gmra.mxu1 %vm295_vm3, %v2045_v5  ;;  %4323 = vmatprep.mubr.msk.bf16.mxu0 %vm4646_vm2, %v4644_v1  ;;  %v1735_v5 = vpack.c.bf16 %v3455_v38, %v3504_v36 }
 0x1ea   : > { %v1353_v25 = vadd.f32 %v1266_v22, %v5357_v19  ;;  %v4153_v32 = vpop.f32.mrf.mxu0  ;;  %4257 = vmatprep.mubr.msk.bf16.mxu1 %vm4646_vm2, %v4644_v1 }
 0x1eb   : > { %v4087_v41 = vpop.f32.mrf.mxu1  ;;  %v3585_v32 = vld [vmem:[%s4767_s28 + $0x4e] sm:$0xff] }
 0x1ec   : > { %v1573_v11 = vpop.f32.mrf.mxu0 }
 0x1ed   : > { %v1269_v27 = vpop.f32.mrf.mxu1  ;;  %v5604_v34 = vadd.f32 %v1573_v11, %v1352_v0  ;;  %v3533_v11 = vld [vmem:[%s4767_s28 + $0x5d] sm:$0xff] }
 0x1ee   : > { %v1354_v47 = vadd.f32 %v1269_v27, %v5371_v40  ;;  %v4154_v57 = vpop.f32.mrf.mxu0  ;;  %v3530_v40 = vld [vmem:[%s4767_s28 + $0x45] sm:$0xff] }
 0x1ef   : > { %v4088_v19 = vpop.f32.mrf.mxu1  ;;  %v2344_v44 = vpack.c.bf16 %v3531_v26, %v3530_v40  ;;  %v3587_v40 = vld [vmem:[%s4767_s28 + $0x5e] sm:$0xff] }
 0x1f0   : > { %v1578_v30 = vpop.f32.mrf.mxu0  ;;  %4324 = vmatmul.mubr.msk.bf16.gmra.mxu0 %vm295_vm3, %v2047_v13 }
 0x1f1   : > { %v1274_v15 = vpop.f32.mrf.mxu1  ;;  %v5608_v56 = vadd.f32 %v1578_v30, %v1353_v25  ;;  %4258 = vmatmul.mubr.msk.bf16.gmra.mxu1 %vm295_vm3, %v1735_v5  ;;  %4327 = vmatprep.mubr.msk.bf16.mxu0 %vm4646_vm2, %v4644_v1  ;;  %v3584_v25 = vld [vmem:[%s4767_s28 + $0x46] sm:$0xff] }
 0x1f2   : > { %v1355_v36 = vadd.f32 %v1274_v15, %v5376_v28  ;;  %v4157_v43 = vpop.f32.mrf.mxu0  ;;  %4333 = vmatprep.mubr.msk.bf16.mxu1 %vm4646_vm2, %v4644_v1  ;;  %v2656_v5 = vpack.c.bf16 %v3585_v32, %v3584_v25 }
 0x1f3   : > { %v4091_v3 = vpop.f32.mrf.mxu1  ;;  %v3586_v43 = vld [vmem:[%s4767_s28 + $0x56] sm:$0xff] }
 0x1f4   : > { %v1581_v52 = vpop.f32.mrf.mxu0 }
 0x1f5   : > { %v1277_v61 = vpop.f32.mrf.mxu1  ;;  %v5620_v0 = vadd.f32 %v1581_v52, %v1354_v47  ;;  %v3535_v52 = vld [vmem:[%s4767_s28 + $0x6d] sm:$0xff] }
 0x1f6   : > { %v1356_v54 = vadd.f32 %v1277_v61, %v5391_v24  ;;  %v4158_v28 = vpop.f32.mrf.mxu0  ;;  %v3532_v24 = vld [vmem:[%s4767_s28 + $0x55] sm:$0xff] }
 0x1f7   : > { %v4092_v21 = vpop.f32.mrf.mxu1  ;;  %v2345_v19 = vpack.c.bf16 %v3533_v11, %v3532_v24  ;;  %v3589_v24 = vld [vmem:[%s4767_s28 + $0x6e] sm:$0xff] }
 0x1f8   : > { %v1586_v22 = vpop.f32.mrf.mxu0  ;;  %4328 = vmatmul.mubr.msk.bf16.gmra.mxu0 %vm295_vm3, %v2048_v39 }
 0x1f9   : > { %v1282_v14 = vpop.f32.mrf.mxu1  ;;  %v5624_v37 = vadd.f32 %v1586_v22, %v1355_v36  ;;  %4334 = vmatmul.mubr.msk.bf16.vlgmr.msra.gmra.mxu1 %vm295_vm3, %v2344_v44  ;;  %4403 = vmatprep.mubr.msk.bf16.mxu0 %vm4646_vm2, %v4644_v1  ;;  %v2657_v44 = vpack.c.bf16 %v3587_v40, %v3586_v43 }
 0x1fa   : > { %v1357_v38 = vadd.f32 %v1282_v14, %v5396_v55  ;;  %v4161_v41 = vpop.f32.mrf.mxu0  ;;  %4337 = vmatprep.mubr.msk.bf16.mxu1 %vm4646_vm2, %v4644_v1 }
 0x1fb   : > { %v4095_v13 = vpop.f32.mrf.mxu1  ;;  %v3588_v41 = vld [vmem:[%s4767_s28 + $0x66] sm:$0xff] }
 0x1fc   : > { %v1589_v27 = vpop.f32.mrf.mxu0 }
 0x1fd   : > { %v1285_v47 = vpop.f32.mrf.mxu1  ;;  %v5636_v57 = vadd.f32 %v1589_v27, %v1356_v54  ;;  %v3537_v27 = vld [vmem:[%s4767_s28 + $0x7d] sm:$0xff] }
 0x1fe   : > { %v1358_v30 = vadd.f32 %v1285_v47, %v5406_v33  ;;  %v4162_v55 = vpop.f32.mrf.mxu0  ;;  %v3534_v33 = vld [vmem:[%s4767_s28 + $0x65] sm:$0xff] }
 0x1ff   : > { %v4096_v15 = vpop.f32.mrf.mxu1  ;;  %v2346_v21 = vpack.c.bf16 %v3535_v52, %v3534_v33  ;;  %v3591_v33 = vld [vmem:[%s4767_s28 + $0x7e] sm:$0xff] }
 0x200   : > { %v1594_v53 = vpop.f32.mrf.mxu0  ;;  %4404 = vmatmul.mubr.msk.bf16.vlgmr.msra.gmra.mxu0 %vm295_vm3, %v2656_v5 }
 0x201   : > { %v1290_v62 = vpop.f32.mrf.mxu1  ;;  %v5640_v36 = vadd.f32 %v1594_v53, %v1357_v38  ;;  %4338 = vmatmul.mubr.msk.bf16.gmra.mxu1 %vm295_vm3, %v2345_v19  ;;  %4407 = vmatprep.mubr.msk.bf16.mxu0 %vm4646_vm2, %v4644_v1  ;;  %v2658_v19 = vpack.c.bf16 %v3589_v24, %v3588_v41 }
 0x202   : > { %v1359_v26 = vadd.f32 %v1290_v62, %v5410_v45  ;;  %v4165_v3 = vpop.f32.mrf.mxu0  ;;  %4341 = vmatprep.mubr.msk.bf16.mxu1 %vm4646_vm2, %v4644_v1 }
 0x203   : > { %v4099_v39 = vpop.f32.mrf.mxu1  ;;  %v3590_v3 = vld [vmem:[%s4767_s28 + $0x76] sm:$0xff] }
 0x204   : > { %v1597_v61 = vpop.f32.mrf.mxu0 }
 0x205   : > { %v1293_v54 = vpop.f32.mrf.mxu1  ;;  %v5652_v28 = vadd.f32 %v1597_v61, %v1358_v30  ;;  %v3539_v61 = vld [vmem:[%s4767_s28 + $0x8d] sm:$0xff] }
 0x206   : > { %v1360_v22 = vadd.f32 %v1293_v54, %v5420_v51  ;;  %v4166_v45 = vpop.f32.mrf.mxu0  ;;  %v3536_v51 = vld [vmem:[%s4767_s28 + $0x75] sm:$0xff] }
 0x207   : > { %v4100_v14 = vpop.f32.mrf.mxu1  ;;  %v2347_v15 = vpack.c.bf16 %v3537_v27, %v3536_v51  ;;  %v3593_v51 = vld [vmem:[%s4767_s28 + $0x8e] sm:$0xff] }
 0x208   : > { %v1602_v25 = vpop.f32.mrf.mxu0  ;;  %4408 = vmatmul.mubr.msk.bf16.gmra.mxu0 %vm295_vm3, %v2657_v44 }
 0x209   : > { %v1298_v32 = vpop.f32.mrf.mxu1  ;;  %v5656_v38 = vadd.f32 %v1602_v25, %v1359_v26  ;;  %4342 = vmatmul.mubr.msk.bf16.gmra.mxu1 %vm295_vm3, %v2346_v21  ;;  %4411 = vmatprep.mubr.msk.bf16.mxu0 %vm4646_vm2, %v4644_v1  ;;  %v2659_v21 = vpack.c.bf16 %v3591_v33, %v3590_v3 }
 0x20a   : > { %v1361_v11 = vadd.f32 %v1298_v32, %v5424_v35  ;;  %v4169_v13 = vpop.f32.mrf.mxu0  ;;  %4345 = vmatprep.mubr.msk.bf16.mxu1 %vm4646_vm2, %v4644_v1 }
 0x20b   : > { %v4103_v5 = vpop.f32.mrf.mxu1  ;;  %v3592_v13 = vld [vmem:[%s4767_s28 + $0x86] sm:$0xff] }
 0x20c   : > { %v1605_v47 = vpop.f32.mrf.mxu0 }
 0x20d   : > { %v1301_v30 = vpop.f32.mrf.mxu1  ;;  %v5668_v55 = vadd.f32 %v1605_v47, %v1360_v22  ;;  %v3541_v47 = vld [vmem:[%s4767_s28 + $0x9d] sm:$0xff] }
 0x20e   : > { %v1362_v53 = vadd.f32 %v1301_v30, %v5434_v18  ;;  %v4170_v35 = vpop.f32.mrf.mxu0  ;;  %v3538_v18 = vld [vmem:[%s4767_s28 + $0x85] sm:$0xff] }
 0x20f   : > { %v4104_v62 = vpop.f32.mrf.mxu1  ;;  %v2348_v14 = vpack.c.bf16 %v3539_v61, %v3538_v18  ;;  %v3595_v18 = vld [vmem:[%s4767_s28 + $0x9e] sm:$0xff] }
 0x210   : > { %v1610_v43 = vpop.f32.mrf.mxu0  ;;  %4412 = vmatmul.mubr.msk.bf16.gmra.mxu0 %vm295_vm3, %v2658_v19 }
 0x211   : > { %v1306_v40 = vpop.f32.mrf.mxu1  ;;  %v5672_v26 = vadd.f32 %v1610_v43, %v1361_v11  ;;  %4346 = vmatmul.mubr.msk.bf16.gmra.mxu1 %vm295_vm3, %v2347_v15  ;;  %4415 = vmatprep.mubr.msk.bf16.mxu0 %vm4646_vm2, %v4644_v1  ;;  %v2660_v15 = vpack.c.bf16 %v3593_v51, %v3592_v13 }
 0x212   : > { %v1363_v52 = vadd.f32 %v1306_v40, %v5438_v42  ;;  %v4173_v39 = vpop.f32.mrf.mxu0  ;;  %4349 = vmatprep.mubr.msk.bf16.mxu1 %vm4646_vm2, %v4644_v1 }
 0x213   : > { %v4107_v44 = vpop.f32.mrf.mxu1  ;;  %v3594_v39 = vld [vmem:[%s4767_s28 + $0x96] sm:$0xff] }
 0x214   : > { %v1613_v54 = vpop.f32.mrf.mxu0 }
 0x215   : > { %v1309_v22 = vpop.f32.mrf.mxu1  ;;  %v5684_v45 = vadd.f32 %v1613_v54, %v1362_v53  ;;  %v3543_v54 = vld [vmem:[%s4767_s28 + $0xad] sm:$0xff] }
 0x216   : > { %v1364_v25 = vadd.f32 %v1309_v22, %v5448_v58  ;;  %v4174_v42 = vpop.f32.mrf.mxu0  ;;  %v3540_v58 = vld [vmem:[%s4767_s28 + $0x95] sm:$0xff] }
 0x217   : > { %v4108_v32 = vpop.f32.mrf.mxu1  ;;  %v2349_v62 = vpack.c.bf16 %v3541_v47, %v3540_v58  ;;  %v3597_v58 = vld [vmem:[%s4767_s28 + $0xae] sm:$0xff] }
 0x218   : > { %v1618_v41 = vpop.f32.mrf.mxu0  ;;  %4416 = vmatmul.mubr.msk.bf16.gmra.mxu0 %vm295_vm3, %v2659_v21 }
 0x219   : > { %v1314_v24 = vpop.f32.mrf.mxu1  ;;  %v5688_v11 = vadd.f32 %v1618_v41, %v1363_v52  ;;  %4350 = vmatmul.mubr.msk.bf16.gmra.mxu1 %vm295_vm3, %v2348_v14  ;;  %4419 = vmatprep.mubr.msk.bf16.mxu0 %vm4646_vm2, %v4644_v1  ;;  %v2661_v14 = vpack.c.bf16 %v3595_v18, %v3594_v39 }
 0x21a   : > { %v1365_v27 = vadd.f32 %v1314_v24, %v5452_v8  ;;  %v4177_v5 = vpop.f32.mrf.mxu0  ;;  %4353 = vmatprep.mubr.msk.bf16.mxu1 %vm4646_vm2, %v4644_v1 }
 0x21b   : > { %v4111_v19 = vpop.f32.mrf.mxu1  ;;  %v3596_v5 = vld [vmem:[%s4767_s28 + $0xa6] sm:$0xff] }
 0x21c   : > { %v1621_v30 = vpop.f32.mrf.mxu0 }
 0x21d   : > { %v1317_v53 = vpop.f32.mrf.mxu1  ;;  %v5700_v35 = vadd.f32 %v1621_v30, %v1364_v25  ;;  %v3545_v30 = vld [vmem:[%s4767_s28 + $0xbd] sm:$0xff] }
 0x21e   : > { %v1366_v43 = vadd.f32 %v1317_v53, %v5462_v17  ;;  %v4178_v8 = vpop.f32.mrf.mxu0  ;;  %v3542_v17 = vld [vmem:[%s4767_s28 + $0xa5] sm:$0xff] }
 0x21f   : > { %v4112_v40 = vpop.f32.mrf.mxu1  ;;  %v2350_v32 = vpack.c.bf16 %v3543_v54, %v3542_v17  ;;  %v3599_v17 = vld [vmem:[%s4767_s28 + $0xbe] sm:$0xff] }
 0x220   : > { %v1626_v3 = vpop.f32.mrf.mxu0  ;;  %4420 = vmatmul.mubr.msk.bf16.gmra.mxu0 %vm295_vm3, %v2660_v15 }
 0x221   : > { %v1322_v33 = vpop.f32.mrf.mxu1  ;;  %v5704_v52 = vadd.f32 %v1626_v3, %v1365_v27  ;;  %4354 = vmatmul.mubr.msk.bf16.gmra.mxu1 %vm295_vm3, %v2349_v62  ;;  %4423 = vmatprep.mubr.msk.bf16.mxu0 %vm4646_vm2, %v4644_v1  ;;  %v2662_v62 = vpack.c.bf16 %v3597_v58, %v3596_v5 }
 0x222   : > { %v1367_v61 = vadd.f32 %v1322_v33, %v5466_v49  ;;  %v4181_v44 = vpop.f32.mrf.mxu0  ;;  %4357 = vmatprep.mubr.msk.bf16.mxu1 %vm4646_vm2, %v4644_v1 }
 0x223   : > { %v4115_v21 = vpop.f32.mrf.mxu1  ;;  %v3598_v44 = vld [vmem:[%s4767_s28 + $0xb6] sm:$0xff] }
 0x224   : > { %v1629_v22 = vpop.f32.mrf.mxu0 }
 0x225   : > { %v1325_v25 = vpop.f32.mrf.mxu1  ;;  %v5716_v42 = vadd.f32 %v1629_v22, %v1366_v43  ;;  %v3547_v22 = vld [vmem:[%s4767_s28 + $0xcd] sm:$0xff] }
 0x226   : > { %v1368_v41 = vadd.f32 %v1325_v25, %v5476_v12  ;;  %v4182_v49 = vpop.f32.mrf.mxu0  ;;  %v3544_v12 = vld [vmem:[%s4767_s28 + $0xb5] sm:$0xff] }
 0x227   : > { %v4116_v24 = vpop.f32.mrf.mxu1  ;;  %v2351_v40 = vpack.c.bf16 %v3545_v30, %v3544_v12  ;;  %v3601_v12 = vld [vmem:[%s4767_s28 + $0xce] sm:$0xff] }
 0x228   : > { %v1634_v13 = vpop.f32.mrf.mxu0  ;;  %4424 = vmatmul.mubr.msk.bf16.gmra.mxu0 %vm295_vm3, %v2661_v14 }
 0x229   : > { %v1330_v51 = vpop.f32.mrf.mxu1  ;;  %v5720_v27 = vadd.f32 %v1634_v13, %v1367_v61  ;;  %4358 = vmatmul.mubr.msk.bf16.gmra.mxu1 %vm295_vm3, %v2350_v32  ;;  %4427 = vmatprep.mubr.msk.bf16.mxu0 %vm4646_vm2, %v4644_v1  ;;  %v2663_v32 = vpack.c.bf16 %v3599_v17, %v3598_v44 }
 0x22a   : > { %v1369_v47 = vadd.f32 %v1330_v51, %v5480_v50  ;;  %v4185_v19 = vpop.f32.mrf.mxu0  ;;  %4361 = vmatprep.mubr.msk.bf16.mxu1 %vm4646_vm2, %v4644_v1 }
 0x22b   : > { %v4119_v15 = vpop.f32.mrf.mxu1  ;;  %v3600_v19 = vld [vmem:[%s4767_s28 + $0xc6] sm:$0xff] }
 0x22c   : > { %v1637_v53 = vpop.f32.mrf.mxu0 }
 0x22d   : > { %v1333_v43 = vpop.f32.mrf.mxu1  ;;  %v5732_v8 = vadd.f32 %v1637_v53, %v1368_v41  ;;  %v3549_v53 = vld [vmem:[%s4767_s28 + $0xdd] sm:$0xff] }
 0x22e   : > { %v1370_v3 = vadd.f32 %v1333_v43, %v5491_v9  ;;  %v4186_v50 = vpop.f32.mrf.mxu0  ;;  %v3546_v9 = vld [vmem:[%s4767_s28 + $0xc5] sm:$0xff] }
 0x22f   : > { %v4120_v33 = vpop.f32.mrf.mxu1  ;;  %v2352_v24 = vpack.c.bf16 %v3547_v22, %v3546_v9  ;;  %v3603_v9 = vld [vmem:[%s4767_s28 + $0xde] sm:$0xff] }
 0x230   : > { %v1642_v39 = vpop.f32.mrf.mxu0  ;;  %4428 = vmatmul.mubr.msk.bf16.gmra.mxu0 %vm295_vm3, %v2662_v62 }
 0x231   : > { %v5736_v18 = vadd.f32 %v1642_v39, %v1369_v47  ;;  %v1826_v61 = vpop.f32.mrf.mxu1  ;;  %4362 = vmatmul.mubr.msk.bf16.gmra.mxu1 %vm295_vm3, %v2351_v40  ;;  %4431 = vmatprep.mubr.msk.bf16.mxu0 %vm4646_vm2, %v4644_v1  ;;  %v2664_v40 = vpack.c.bf16 %v3601_v12, %v3600_v19 }
 0x232   : > { %v1961_v54 = vadd.f32 %v1826_v61, %v5495_v6  ;;  %v4189_v21 = vpop.f32.mrf.mxu0  ;;  %4365 = vmatprep.mubr.msk.bf16.mxu1 %vm4646_vm2, %v4644_v1 }
 0x233   : > { %v4195_v14 = vpop.f32.mrf.mxu1  ;;  %v3602_v21 = vld [vmem:[%s4767_s28 + $0xd6] sm:$0xff] }
 0x234   : > { %v1645_v25 = vpop.f32.mrf.mxu0 }
 0x235   : > { %v5748_v41 = vadd.f32 %v1645_v25, %v1370_v3  ;;  %v1829_v49 = vpop.f32.mrf.mxu1  ;;  %v3551_v25 = vld [vmem:[%s4767_s28 + $0xed] sm:$0xff] }
 0x236   : > { %v1962_v13 = vadd.f32 %v1829_v49, %v5505_v7  ;;  %v4190_v6 = vpop.f32.mrf.mxu0  ;;  %v3548_v7 = vld [vmem:[%s4767_s28 + $0xd5] sm:$0xff] }
 0x237   : > { %v4196_v51 = vpop.f32.mrf.mxu1  ;;  %v2353_v33 = vpack.c.bf16 %v3549_v53, %v3548_v7  ;;  %v3605_v7 = vld [vmem:[%s4767_s28 + $0xee] sm:$0xff] }
 0x238   : > { %v2139_v5 = vpop.f32.mrf.mxu0  ;;  %4432 = vmatmul.mubr.msk.bf16.gmra.mxu0 %vm295_vm3, %v2663_v32 }
 0x239   : > { %v1834_v58 = vpop.f32.mrf.mxu1  ;;  %v5752_v47 = vadd.f32 %v2139_v5, %v1961_v54  ;;  %4366 = vmatmul.mubr.msk.bf16.gmra.mxu1 %vm295_vm3, %v2352_v24  ;;  %4435 = vmatprep.mubr.msk.bf16.mxu0 %vm4646_vm2, %v4644_v1  ;;  %v2665_v24 = vpack.c.bf16 %v3603_v9, %v3602_v21 }
 0x23a   : > { %v1963_v30 = vadd.f32 %v1834_v58, %v5509_v48  ;;  %v4265_v15 = vpop.f32.mrf.mxu0  ;;  %4369 = vmatprep.mubr.msk.bf16.mxu1 %vm4646_vm2, %v4644_v1 }
 0x23b   : > { %v4199_v62 = vpop.f32.mrf.mxu1  ;;  %v3604_v15 = vld [vmem:[%s4767_s28 + $0xe6] sm:$0xff] }
 0x23c   : > { %v2142_v43 = vpop.f32.mrf.mxu0 }
 0x23d   : > { %v1837_v3 = vpop.f32.mrf.mxu1  ;;  %v5764_v50 = vadd.f32 %v2142_v43, %v1962_v13  ;;  %v3553_v43 = vld [vmem:[%s4767_s28 + $0xfd] sm:$0xff] }
 0x23e   : > { %v1964_v39 = vadd.f32 %v1837_v3, %v5519_v23  ;;  %v4266_v48 = vpop.f32.mrf.mxu0  ;;  %v3550_v23 = vld [vmem:[%s4767_s28 + $0xe5] sm:$0xff] }
 0x23f   : > { %v4200_v61 = vpop.f32.mrf.mxu1  ;;  %v2354_v51 = vpack.c.bf16 %v3551_v25, %v3550_v23  ;;  %v3607_v23 = vld [vmem:[%s4767_s28 + $0xfe] sm:$0xff] }
 0x240   : > { %v2147_v44 = vpop.f32.mrf.mxu0  ;;  %4436 = vmatmul.mubr.msk.bf16.gmra.mxu0 %vm295_vm3, %v2664_v40 }
 0x241   : > { %v1842_v17 = vpop.f32.mrf.mxu1  ;;  %v5768_v54 = vadd.f32 %v2147_v44, %v1963_v30  ;;  %4370 = vmatmul.mubr.msk.bf16.gmra.mxu1 %vm295_vm3, %v2353_v33  ;;  %4439 = vmatprep.mubr.msk.bf16.mxu0 %vm4646_vm2, %v4644_v1  ;;  %v2666_v33 = vpack.c.bf16 %v3605_v7, %v3604_v15 }
 0x242   : > { %v1965_v22 = vadd.f32 %v1842_v17, %v5523_v4  ;;  %v4269_v14 = vpop.f32.mrf.mxu0  ;;  %4373 = vmatprep.mubr.msk.bf16.mxu1 %vm4646_vm2, %v4644_v1 }
 0x243   : > { %v4203_v32 = vpop.f32.mrf.mxu1  ;;  %v3606_v14 = vld [vmem:[%s4767_s28 + $0xf6] sm:$0xff] }
 0x244   : > { %v2150_v49 = vpop.f32.mrf.mxu0 }
 0x245   : > { %v1845_v13 = vpop.f32.mrf.mxu1  ;;  %v5780_v6 = vadd.f32 %v2150_v49, %v1964_v39  ;;  %v3555_v49 = vld [vmem:[%s4767_s28 + $0x10d] sm:$0xff] }
 0x246   : > { %v1966_v5 = vadd.f32 %v1845_v13, %v5533_v59  ;;  %v4270_v4 = vpop.f32.mrf.mxu0  ;;  %v3552_v59 = vld [vmem:[%s4767_s28 + $0xf5] sm:$0xff] }
 0x247   : > { %v4204_v58 = vpop.f32.mrf.mxu1  ;;  %v2355_v61 = vpack.c.bf16 %v3553_v43, %v3552_v59  ;;  %v3609_v59 = vld [vmem:[%s4767_s28 + $0x10e] sm:$0xff] }
 0x248   : > { %v2155_v19 = vpop.f32.mrf.mxu0  ;;  %4440 = vmatmul.mubr.msk.bf16.gmra.mxu0 %vm295_vm3, %v2665_v24 }
 0x249   : > { %v1850_v12 = vpop.f32.mrf.mxu1  ;;  %v5784_v30 = vadd.f32 %v2155_v19, %v1965_v22  ;;  %4374 = vmatmul.mubr.msk.bf16.gmra.mxu1 %vm295_vm3, %v2354_v51  ;;  %4443 = vmatprep.mubr.msk.bf16.mxu0 %vm4646_vm2, %v4644_v1  ;;  %v2667_v51 = vpack.c.bf16 %v3607_v23, %v3606_v14 }
 0x24a   : > { %v1967_v53 = vadd.f32 %v1850_v12, %v5537_v46  ;;  %v4273_v62 = vpop.f32.mrf.mxu0  ;;  %4377 = vmatprep.mubr.msk.bf16.mxu1 %vm4646_vm2, %v4644_v1 }
 0x24b   : > { %v4207_v40 = vpop.f32.mrf.mxu1  ;;  %v3608_v62 = vld [vmem:[%s4767_s28 + $0x106] sm:$0xff] }
 0x24c   : > { %v2158_v3 = vpop.f32.mrf.mxu0 }
 0x24d   : > { %v1853_v39 = vpop.f32.mrf.mxu1  ;;  %v5796_v48 = vadd.f32 %v2158_v3, %v1966_v5  ;;  %v3557_v3 = vld [vmem:[%s4767_s28 + $0x11d] sm:$0xff] }
 0x24e   : > { %v1968_v44 = vadd.f32 %v1853_v39, %v5547_v29  ;;  %v4274_v46 = vpop.f32.mrf.mxu0  ;;  %v3554_v29 = vld [vmem:[%s4767_s28 + $0x105] sm:$0xff] }
 0x24f   : > { %v4208_v17 = vpop.f32.mrf.mxu1  ;;  %v2356_v58 = vpack.c.bf16 %v3555_v49, %v3554_v29  ;;  %v3611_v29 = vld [vmem:[%s4767_s28 + $0x11e] sm:$0xff] }
 0x250   : > { %v2163_v21 = vpop.f32.mrf.mxu0  ;;  %4444 = vmatmul.mubr.msk.bf16.gmra.mxu0 %vm295_vm3, %v2666_v33 }
 0x251   : > { %v1858_v9 = vpop.f32.mrf.mxu1  ;;  %v5800_v22 = vadd.f32 %v2163_v21, %v1967_v53  ;;  %4378 = vmatmul.mubr.msk.bf16.gmra.mxu1 %vm295_vm3, %v2355_v61  ;;  %4447 = vmatprep.mubr.msk.bf16.mxu0 %vm4646_vm2, %v4644_v1  ;;  %v2668_v61 = vpack.c.bf16 %v3609_v59, %v3608_v62 }
 0x252   : > { %v1969_v25 = vadd.f32 %v1858_v9, %v5551_v60  ;;  %v4277_v32 = vpop.f32.mrf.mxu0  ;;  %4381 = vmatprep.mubr.msk.bf16.mxu1 %vm4646_vm2, %v4644_v1 }
 0x253   : > { %v4211_v24 = vpop.f32.mrf.mxu1  ;;  %v3610_v32 = vld [vmem:[%s4767_s28 + $0x116] sm:$0xff] }
 0x254   : > { %v2166_v13 = vpop.f32.mrf.mxu0 }
 0x255   : > { %v1861_v5 = vpop.f32.mrf.mxu1  ;;  %v5812_v4 = vadd.f32 %v2166_v13, %v1968_v44  ;;  %v3559_v13 = vld [vmem:[%s4767_s28 + $0x12d] sm:$0xff] }
 0x256   : > { %v1970_v19 = vadd.f32 %v1861_v5, %v5561_v2  ;;  %v4278_v60 = vpop.f32.mrf.mxu0  ;;  %v3556_v2 = vld [vmem:[%s4767_s28 + $0x115] sm:$0xff] }
 0x257   : > { %v4212_v12 = vpop.f32.mrf.mxu1  ;;  %v2357_v17 = vpack.c.bf16 %v3557_v3, %v3556_v2  ;;  %v3613_v2 = vld [vmem:[%s4767_s28 + $0x12e] sm:$0xff] }
 0x258   : > { %v2171_v15 = vpop.f32.mrf.mxu0  ;;  %4448 = vmatmul.mubr.msk.bf16.gmra.mxu0 %vm295_vm3, %v2667_v51 }
 0x259   : > { %v1866_v7 = vpop.f32.mrf.mxu1  ;;  %v5816_v53 = vadd.f32 %v2171_v15, %v1969_v25  ;;  %4382 = vmatmul.mubr.msk.bf16.gmra.mxu1 %vm295_vm3, %v2356_v58  ;;  %4451 = vmatprep.mubr.msk.bf16.mxu0 %vm4646_vm2, %v4644_v1  ;;  %v2669_v58 = vpack.c.bf16 %v3611_v29, %v3610_v32 }
 0x25a   : > { %v1971_v43 = vadd.f32 %v1866_v7, %v5565_v16  ;;  %v4281_v40 = vpop.f32.mrf.mxu0  ;;  %4385 = vmatprep.mubr.msk.bf16.mxu1 %vm4646_vm2, %v4644_v1 }
 0x25b   : > { %v4215_v33 = vpop.f32.mrf.mxu1  ;;  %v3612_v40 = vld [vmem:[%s4767_s28 + $0x126] sm:$0xff] }
 0x25c   : > { %v2174_v39 = vpop.f32.mrf.mxu0 }
 0x25d   : > { %v1869_v44 = vpop.f32.mrf.mxu1  ;;  %v5828_v46 = vadd.f32 %v2174_v39, %v1970_v19  ;;  %v3561_v39 = vld [vmem:[%s4767_s28 + $0x13d] sm:$0xff] }
 0x25e   : > { %v1972_v21 = vadd.f32 %v1869_v44, %v5575_v31  ;;  %v4282_v16 = vpop.f32.mrf.mxu0  ;;  %v3558_v31 = vld [vmem:[%s4767_s28 + $0x125] sm:$0xff] }
 0x25f   : > { %v4216_v9 = vpop.f32.mrf.mxu1  ;;  %v2358_v12 = vpack.c.bf16 %v3559_v13, %v3558_v31  ;;  %v3615_v31 = vld [vmem:[%s4767_s28 + $0x13e] sm:$0xff] }
 0x260   : > { %v2179_v14 = vpop.f32.mrf.mxu0  ;;  %4452 = vmatmul.mubr.msk.bf16.gmra.mxu0 %vm295_vm3, %v2668_v61 }
 0x261   : > { %v1874_v23 = vpop.f32.mrf.mxu1  ;;  %v5832_v25 = vadd.f32 %v2179_v14, %v1971_v43  ;;  %4386 = vmatmul.mubr.msk.bf16.gmra.mxu1 %vm295_vm3, %v2357_v17  ;;  %4455 = vmatprep.mubr.msk.bf16.mxu0 %vm4646_vm2, %v4644_v1  ;;  %v2670_v17 = vpack.c.bf16 %v3613_v2, %v3612_v40 }
 0x262   : > { %v1973_v49 = vadd.f32 %v1874_v23, %v5579_v63  ;;  %v4285_v24 = vpop.f32.mrf.mxu0  ;;  %4389 = vmatprep.mubr.msk.bf16.mxu1 %vm4646_vm2, %v4644_v1 }
 0x263   : > { %v4219_v51 = vpop.f32.mrf.mxu1  ;;  %v3614_v24 = vld [vmem:[%s4767_s28 + $0x136] sm:$0xff] }
 0x264   : > { %v2182_v5 = vpop.f32.mrf.mxu0 }
 0x265   : > { %v1877_v19 = vpop.f32.mrf.mxu1  ;;  %v5844_v60 = vadd.f32 %v2182_v5, %v1972_v21  ;;  %v3563_v5 = vld [vmem:[%s4767_s28 + $0x14d] sm:$0x3f] }
 0x266   : > { %v1974_v15 = vadd.f32 %v1877_v19, %v5589_v20  ;;  %v4286_v63 = vpop.f32.mrf.mxu0  ;;  %v3560_v20 = vld [vmem:[%s4767_s28 + $0x135] sm:$0xff] }
 0x267   : > { %v4220_v7 = vpop.f32.mrf.mxu1  ;;  %v2359_v9 = vpack.c.bf16 %v3561_v39, %v3560_v20  ;;  %v3617_v20 = vld [vmem:[%s4767_s28 + $0x14e] sm:$0x3f] }
 0x268   : > { %v2187_v62 = vpop.f32.mrf.mxu0  ;;  %4456 = vmatmul.mubr.msk.bf16.gmra.mxu0 %vm295_vm3, %v2669_v58 }
 0x269   : > { %v1882_v59 = vpop.f32.mrf.mxu1  ;;  %v5848_v43 = vadd.f32 %v2187_v62, %v1973_v49  ;;  %4390 = vmatmul.mubr.msk.bf16.gmra.mxu1 %vm295_vm3, %v2358_v12  ;;  %4459 = vmatprep.mubr.msk.bf16.mxu0 %vm4646_vm2, %v4644_v1  ;;  %v2671_v12 = vpack.c.bf16 %v3615_v31, %v3614_v24 }
 0x26a   : > { %v1975_v3 = vadd.f32 %v1882_v59, %v5593_v10  ;;  %v4289_v33 = vpop.f32.mrf.mxu0  ;;  %4393 = vmatprep.mubr.msk.bf16.mxu1 %vm4646_vm2, %v4644_v1 }
 0x26b   : > { %v4223_v61 = vpop.f32.mrf.mxu1  ;;  %v3616_v33 = vld [vmem:[%s4767_s28 + $0x146] sm:$0xff] }
 0x26c   : > { %v2190_v44 = vpop.f32.mrf.mxu0 }
 0x26d   : > { %v1885_v21 = vpop.f32.mrf.mxu1  ;;  %v5860_v16 = vadd.f32 %v2190_v44, %v1974_v15 }
 0x26e   : > { %v1976_v14 = vadd.f32 %v1885_v21, %v5604_v34  ;;  %v4290_v10 = vpop.f32.mrf.mxu0  ;;  %v3562_v34 = vld [vmem:[%s4767_s28 + $0x145] sm:$0xff]  ;;  %s4554_s28 = sshll.u32 %s4647_s24, 4  ;;  %s4555_s28 = int_to_ptr.vmem [resolvable:$false] %s4554_s28 }
 0x26f   : > { %v4224_v23 = vpop.f32.mrf.mxu1  ;;  %v2360_v7 = vpack.c.bf16 %v3563_v5, %v3562_v34  ;;  %s4556_s29 = scalar_lea.vmem %s4555_s28, 8192  ;;  %p4557_p2 = scmp.lt.s32.totalorder %s6098_s9, %s4555_s28 }
 0x270   : > { %v2195_v32 = vpop.f32.mrf.mxu0  ;;  %4460 = vmatmul.mubr.msk.bf16.gmra.mxu0 %vm295_vm3, %v2670_v17  ;;  %v2672_v17 = vpack.c.bf16 %v3617_v20, %v3616_v33  ;;  %p4558_p4 = scmp.lt.s32.totalorder %s4556_s29, %s4550_s21 }
 0x271   : > { %v1890_v29 = vpop.f32.mrf.mxu1  ;;  %v5864_v49 = vadd.f32 %v2195_v32, %v1975_v3  ;;  %4394 = vmatmul.mubr.msk.bf16.gmra.mxu1 %vm295_vm3, %v2359_v9  ;;  %4463 = vmatprep.mubr.msk.bf16.mxu0 %vm4646_vm2, %v4644_v1 }
 0x272   : > { %v1977_v13 = vadd.f32 %v1890_v29, %v5608_v56  ;;  %v4293_v51 = vpop.f32.mrf.mxu0  ;;  %4397 = vmatprep.mubr.msk.bf16.mxu1 %vm4646_vm2, %v4644_v1  ;;  %p4559_p5 = por %p4558_p4, %p4557_p2 }
 0x273   : > { %v4227_v58 = vpop.f32.mrf.mxu1 }
 0x274   : > { %v2198_v19 = vpop.f32.mrf.mxu0  ;;  %p4560_p6 = pnand %p4559_p5, %p4553_p1 }
 0x275   : > { %v1893_v15 = vpop.f32.mrf.mxu1  ;;  %v5876_v63 = vadd.f32 %v2198_v19, %v1976_v14 }
 0x276   : > { %v1978_v62 = vadd.f32 %v1893_v15, %v5620_v0  ;;  %v4294_v59 = vpop.f32.mrf.mxu0 }
 0x277   : > { %v4228_v40 = vpop.f32.mrf.mxu1 }
 0x278   : > { %v2203_v56 = vpop.f32.mrf.mxu0  ;;  %4464 = vmatmul.mubr.msk.bf16.gmra.mxu0 %vm295_vm3, %v2671_v12 }
 0x279   : > { %v1898_v2 = vpop.f32.mrf.mxu1  ;;  %v5880_v3 = vadd.f32 %v2203_v56, %v1977_v13  ;;  %4398 = vmatmul.mubr.msk.bf16.gmra.mxu1 %vm295_vm3, %v2360_v7  ;;  %4467 = vmatprep.mubr.msk.bf16.mxu0 %vm4646_vm2, %v4644_v1 }
 0x27a   : > { %v1979_v39 = vadd.f32 %v1898_v2, %v5624_v37  ;;  %v4297_v61 = vpop.f32.mrf.mxu0 }
 0x27b   : > { %v4231_v44 = vpop.f32.mrf.mxu1 }
 0x27c   : > { %v2206_v0 = vpop.f32.mrf.mxu0 }
 0x27d   : > { %v1901_v21 = vpop.f32.mrf.mxu1  ;;  %v5888_v9 = vadd.f32 %v2206_v0, %v1978_v62 }
 0x27e   : > { %v1980_v14 = vadd.f32 %v1901_v21, %v5636_v57  ;;  %v4298_v10 = vpop.f32.mrf.mxu0 }
 0x27f   : > { %v4232_v23 = vpop.f32.mrf.mxu1 }
 0x280   : > { %v2211_v32 = vpop.f32.mrf.mxu0  ;;  %4468 = vmatmul.mubr.msk.bf16.gmra.mxu0 %vm295_vm3, %v2672_v17 }
 0x281   : > { %v1906_v29 = vpop.f32.mrf.mxu1  ;;  %v5892_v1 = vadd.f32 %v2211_v32, %v1979_v39 }
 0x282   : > { %v1981_v24 = vadd.f32 %v1906_v29, %v5640_v36  ;;  %v4301_v37 = vpop.f32.mrf.mxu0 }
 0x283   : > { %v4235_v31 = vpop.f32.mrf.mxu1 }
 0x284   : > { %v2214_v13 = vpop.f32.mrf.mxu0 }
 0x285   : > { %v1909_v51 = vpop.f32.mrf.mxu1  ;;  %v5895_v34 = vadd.f32 %v2214_v13, %v1980_v14 }
 0x286   : > { %v1982_v5 = vadd.f32 %v1909_v51, %v5652_v28  ;;  %v4302_v58 = vpop.f32.mrf.mxu0 }
 0x287   : > { %v4236_v57 = vpop.f32.mrf.mxu1 }
 0x288   : > { %v2219_v19 = vpop.f32.mrf.mxu0 }
 0x289   : > { %v1914_v12 = vpop.f32.mrf.mxu1  ;;  %v5898_v15 = vadd.f32 %v2219_v19, %v1981_v24 }
 0x28a   : > { %v1983_v7 = vadd.f32 %v1914_v12, %v5656_v38  ;;  %v4305_v62 = vpop.f32.mrf.mxu0 }
 0x28b   : > { %v4239_v59 = vpop.f32.mrf.mxu1 }
 0x28c   : > { %v2222_v40 = vpop.f32.mrf.mxu0 }
 0x28d   : > { %v1917_v36 = vpop.f32.mrf.mxu1  ;;  %v5901_v56 = vadd.f32 %v2222_v40, %v1982_v5 }
 0x28e   : > { %v1984_v2 = vadd.f32 %v1917_v36, %v5668_v55  ;;  %v4306_v33 = vpop.f32.mrf.mxu0 }
 0x28f   : > { %v4240_v20 = vpop.f32.mrf.mxu1 }
 0x290   : > { %v2227_v39 = vpop.f32.mrf.mxu0 }
 0x291   : > { %v1922_v28 = vpop.f32.mrf.mxu1  ;;  %v5904_v61 = vadd.f32 %v2227_v39, %v1983_v7 }
 0x292   : > { %v1985_v44 = vadd.f32 %v1922_v28, %v5672_v26  ;;  %v4309_v0 = vpop.f32.mrf.mxu0 }
 0x293   : > { %v4243_v17 = vpop.f32.mrf.mxu1 }
 0x294   : > { %v2230_v21 = vpop.f32.mrf.mxu0 }
 0x295   : > { %v1925_v38 = vpop.f32.mrf.mxu1  ;;  %v5907_v14 = vadd.f32 %v2230_v21, %v1984_v2 }
 0x296   : > { %v1986_v10 = vadd.f32 %v1925_v38, %v5684_v45  ;;  %v4310_v23 = vpop.f32.mrf.mxu0 }
 0x297   : > { %v4244_v32 = vpop.f32.mrf.mxu1 }
 0x298   : > { %v2235_v29 = vpop.f32.mrf.mxu0 }
 0x299   : > { %v1930_v55 = vpop.f32.mrf.mxu1  ;;  %v5910_v24 = vadd.f32 %v2235_v29, %v1985_v44 }
 0x29a   : > { %v1987_v37 = vadd.f32 %v1930_v55, %v5688_v11  ;;  %v4313_v31 = vpop.f32.mrf.mxu0 }
 0x29b   : > { %v4247_v13 = vpop.f32.mrf.mxu1 }
 0x29c   : > { %v2238_v51 = vpop.f32.mrf.mxu0 }
 0x29d   : > { %v1933_v26 = vpop.f32.mrf.mxu1  ;;  %v5913_v5 = vadd.f32 %v2238_v51, %v1986_v10 }
 0x29e   : > { %v1988_v58 = vadd.f32 %v1933_v26, %v5700_v35  ;;  %v4314_v57 = vpop.f32.mrf.mxu0 }
 0x29f   : > { %v4248_v19 = vpop.f32.mrf.mxu1 }
 0x2a0   : > { %v2243_v12 = vpop.f32.mrf.mxu0 }
 0x2a1   : > { %v1938_v45 = vpop.f32.mrf.mxu1  ;;  %v5916_v7 = vadd.f32 %v2243_v12, %v1987_v37 }
 0x2a2   : > { %v1989_v62 = vadd.f32 %v1938_v45, %v5704_v52  ;;  %v4317_v59 = vpop.f32.mrf.mxu0 }
 0x2a3   : > { %v4251_v40 = vpop.f32.mrf.mxu1 }
 0x2a4   : > { %v2246_v36 = vpop.f32.mrf.mxu0 }
 0x2a5   : > { %v1941_v11 = vpop.f32.mrf.mxu1  ;;  %v5919_v2 = vadd.f32 %v2246_v36, %v1988_v58 }
 0x2a6   : > { %v1990_v33 = vadd.f32 %v1941_v11, %v5716_v42  ;;  %v4318_v20 = vpop.f32.mrf.mxu0 }
 0x2a7   : > { %v4252_v39 = vpop.f32.mrf.mxu1 }
 0x2a8   : > { %v2251_v28 = vpop.f32.mrf.mxu0 }
 0x2a9   : > { %v1946_v35 = vpop.f32.mrf.mxu1  ;;  %v5922_v44 = vadd.f32 %v2251_v28, %v1989_v62 }
 0x2aa   : > { %v1991_v0 = vadd.f32 %v1946_v35, %v5720_v27  ;;  %v4321_v17 = vpop.f32.mrf.mxu0 }
 0x2ab   : > { %v4255_v21 = vpop.f32.mrf.mxu1 }
 0x2ac   : > { %v2254_v38 = vpop.f32.mrf.mxu0 }
 0x2ad   : > { %v1949_v52 = vpop.f32.mrf.mxu1  ;;  %v5925_v10 = vadd.f32 %v2254_v38, %v1990_v33 }
 0x2ae   : > { %v1992_v23 = vadd.f32 %v1949_v52, %v5732_v8  ;;  %v4322_v32 = vpop.f32.mrf.mxu0 }
 0x2af   : > { %v4256_v29 = vpop.f32.mrf.mxu1 }
 0x2b0   : > { %v2259_v55 = vpop.f32.mrf.mxu0 }
 0x2b1   : > { %v1954_v42 = vpop.f32.mrf.mxu1  ;;  %v5928_v37 = vadd.f32 %v2259_v55, %v1991_v0 }
 0x2b2   : > { %v1993_v31 = vadd.f32 %v1954_v42, %v5736_v18  ;;  %v4325_v13 = vpop.f32.mrf.mxu0 }
 0x2b3   : > { %v4259_v51 = vpop.f32.mrf.mxu1 }
 0x2b4   : > { %v2262_v27 = vpop.f32.mrf.mxu0 }
 0x2b5   : > { %v1957_v26 = vpop.f32.mrf.mxu1  ;;  %v5931_v58 = vadd.f32 %v2262_v27, %v1992_v23 }
 0x2b6   : > { %v1994_v57 = vadd.f32 %v1957_v26, %v5748_v41  ;;  %v4326_v19 = vpop.f32.mrf.mxu0  ;;  %v5943_v41 = vld [vmem:[%s6157_s2] ss:$0 sm:$0xff] }
 0x2b7   : > { %v4260_v12 = vpop.f32.mrf.mxu1 }
 0x2b8   : > { %v2267_v8 = vpop.f32.mrf.mxu0 }
 0x2b9   : > { %v5934_v45 = vadd.f32 %v2267_v8, %v1993_v31  ;;  %v2451_v62 = vpop.f32.mrf.mxu1 }
 0x2ba   : > { %v4329_v59 = vpop.f32.mrf.mxu0  ;;  %v2586_v20 = vadd.f32 %v2451_v62, %v5752_v47 }
 0x2bb   : > { %v4335_v40 = vpop.f32.mrf.mxu1 }
 0x2bc   : > { %v2270_v36 = vpop.f32.mrf.mxu0 }
 0x2bd   : > { %v5936_v18 = vadd.f32 %v2270_v36, %v1994_v57  ;;  %v2454_v11 = vpop.f32.mrf.mxu1 }
 0x2be   : > { %v4330_v33 = vpop.f32.mrf.mxu0  ;;  %v2587_v21 = vadd.f32 %v2454_v11, %v5764_v50 }
 0x2bf   : > { %v4336_v39 = vpop.f32.mrf.mxu1 }
 0x2c0   : > { %v2763_v28 = vpop.f32.mrf.mxu0 }
 0x2c1   : > { %v2459_v35 = vpop.f32.mrf.mxu1  ;;  %v2898_v0 = vadd.f32 %v2763_v28, %v2586_v20 }
 0x2c2   : > { %v4405_v17 = vpop.f32.mrf.mxu0  ;;  %v2588_v42 = vadd.f32 %v2459_v35, %v5768_v54 }
 0x2c3   : > { %v2939_v38 = vadd.f32 %v5943_v41, %v2898_v0  ;;  %v4339_v52 = vpop.f32.mrf.mxu1 }
 0x2c4   : > { %v2766_v23 = vpop.f32.mrf.mxu0 }
 0x2c5   : > { %v2973_v47 = vmax.f32 %v2939_v38, 0.0  ;;  %v2462_v32 = vpop.f32.mrf.mxu1  ;;  %v2899_v29 = vadd.f32 %v2766_v23, %v2587_v21 }
 0x2c6   : > { %v4406_v55 = vpop.f32.mrf.mxu0  ;;  %v2589_v19 = vadd.f32 %v2462_v32, %v5780_v6 }
 0x2c7   : > { %3008 = vst.msk [vmem:[%s5950_s5] sm:$0xff] %vm3007_vm4, %v2973_v47  ;;  %v2940_v31 = vadd.f32 %v5943_v41, %v2899_v29  ;;  %v4340_v50 = vpop.f32.mrf.mxu1 }
 0x2c8   : > { %v2771_v13 = vpop.f32.mrf.mxu0 }
 0x2c9   : > { %v2974_v51 = vmax.f32 %v2940_v31, 0.0  ;;  %v2467_v27 = vpop.f32.mrf.mxu1  ;;  %v2900_v26 = vadd.f32 %v2771_v13, %v2588_v42 }
 0x2ca   : > { %v4409_v57 = vpop.f32.mrf.mxu0  ;;  %v2590_v11 = vadd.f32 %v2467_v27, %v5784_v30 }
 0x2cb   : > { %3009 = vst.msk [vmem:[%s5950_s5 + $0x8] sm:$0xff] %vm3007_vm4, %v2974_v51  ;;  %v2941_v54 = vadd.f32 %v5943_v41, %v2900_v26  ;;  %v4343_v12 = vpop.f32.mrf.mxu1 }
 0x2cc   : > { %v2774_v8 = vpop.f32.mrf.mxu0 }
 0x2cd   : > { %v2975_v62 = vmax.f32 %v2941_v54, 0.0  ;;  %v2470_v59 = vpop.f32.mrf.mxu1  ;;  %v2901_v40 = vadd.f32 %v2774_v8, %v2589_v19 }
 0x2ce   : > { %v4410_v36 = vpop.f32.mrf.mxu0  ;;  %v2591_v17 = vadd.f32 %v2470_v59, %v5796_v48 }
 0x2cf   : > { %3010 = vst.msk [vmem:[%s5950_s5 + $0x10] sm:$0xff] %vm3007_vm4, %v2975_v62  ;;  %v2942_v33 = vadd.f32 %v5943_v41, %v2901_v40  ;;  %v4344_v20 = vpop.f32.mrf.mxu1 }
 0x2d0   : > { %v2779_v39 = vpop.f32.mrf.mxu0 }
 0x2d1   : > { %v2976_v6 = vmax.f32 %v2942_v33, 0.0  ;;  %v2475_v28 = vpop.f32.mrf.mxu1  ;;  %v2902_v35 = vadd.f32 %v2779_v39, %v2590_v11 }
 0x2d2   : > { %v4413_v0 = vpop.f32.mrf.mxu0  ;;  %v2592_v29 = vadd.f32 %v2475_v28, %v5800_v22 }
 0x2d3   : > { %3011 = vst.msk [vmem:[%s5950_s5 + $0x18] sm:$0xff] %vm3007_vm4, %v2976_v6  ;;  %v2943_v21 = vadd.f32 %v5943_v41, %v2902_v35  ;;  %v4347_v38 = vpop.f32.mrf.mxu1 }
 0x2d4   : > { %v2782_v30 = vpop.f32.mrf.mxu0 }
 0x2d5   : > { %v2977_v52 = vmax.f32 %v2943_v21, 0.0  ;;  %v2478_v23 = vpop.f32.mrf.mxu1  ;;  %v2903_v47 = vadd.f32 %v2782_v30, %v2591_v17 }
 0x2d6   : > { %v4414_v32 = vpop.f32.mrf.mxu0  ;;  %v2593_v27 = vadd.f32 %v2478_v23, %v5812_v4 }
 0x2d7   : > { %3637 = vst.msk [vmem:[%s5950_s5 + $0x1e] sm:$0xfc] %vm3013_vm5, %v2977_v52  ;;  %v2944_v55 = vadd.f32 %v5943_v41, %v2903_v47  ;;  %v4348_v42 = vpop.f32.mrf.mxu1 }
 0x2d8   : > { %v2787_v48 = vpop.f32.mrf.mxu0 }
 0x2d9   : > { %v2978_v31 = vmax.f32 %v2944_v55, 0.0  ;;  %v2483_v50 = vpop.f32.mrf.mxu1  ;;  %v2904_v13 = vadd.f32 %v2787_v48, %v2592_v29 }
 0x2da   : > { %v4417_v51 = vpop.f32.mrf.mxu0  ;;  %v2594_v62 = vadd.f32 %v2483_v50, %v5816_v53 }
 0x2db   : > { %3638 = vst.msk [vmem:[%s5950_s5 + $0x26] sm:$0xff] %vm3007_vm4, %v2978_v31  ;;  %v2945_v26 = vadd.f32 %v5943_v41, %v2904_v13  ;;  %v4351_v57 = vpop.f32.mrf.mxu1 }
 0x2dc   : > { %v2790_v22 = vpop.f32.mrf.mxu0 }
 0x2dd   : > { %v2979_v19 = vmax.f32 %v2945_v26, 0.0  ;;  %v2486_v54 = vpop.f32.mrf.mxu1  ;;  %v2905_v12 = vadd.f32 %v2790_v22, %v2593_v27 }
 0x2de   : > { %v4418_v8 = vpop.f32.mrf.mxu0  ;;  %v2595_v39 = vadd.f32 %v2486_v54, %v5828_v46 }
 0x2df   : > { %3639 = vst.msk [vmem:[%s5950_s5 + $0x2e] sm:$0xff] %vm3007_vm4, %v2979_v19  ;;  %v2946_v59 = vadd.f32 %v5943_v41, %v2905_v12  ;;  %v4352_v40 = vpop.f32.mrf.mxu1 }
 0x2e0   : > { %v2795_v36 = vpop.f32.mrf.mxu0 }
 0x2e1   : > { %v2980_v4 = vmax.f32 %v2946_v59, 0.0  ;;  %v2491_v11 = vpop.f32.mrf.mxu1  ;;  %v2906_v33 = vadd.f32 %v2795_v36, %v2594_v62 }
 0x2e2   : > { %v4421_v20 = vpop.f32.mrf.mxu0  ;;  %v2596_v38 = vadd.f32 %v2491_v11, %v5832_v25 }
 0x2e3   : > { %3640 = vst.msk [vmem:[%s5950_s5 + $0x36] sm:$0xff] %vm3007_vm4, %v2980_v4  ;;  %v2947_v6 = vadd.f32 %v5943_v41, %v2906_v33  ;;  %v4355_v28 = vpop.f32.mrf.mxu1 }
 0x2e4   : > { %v2798_v53 = vpop.f32.mrf.mxu0 }
 0x2e5   : > { %v2981_v35 = vmax.f32 %v2947_v6, 0.0  ;;  %v2494_v0 = vpop.f32.mrf.mxu1  ;;  %v2907_v17 = vadd.f32 %v2798_v53, %v2595_v39 }
 0x2e6   : > { %v4422_v21 = vpop.f32.mrf.mxu0  ;;  %v2597_v55 = vadd.f32 %v2494_v0, %v5844_v60 }
 0x2e7   : > { %3641 = vst.msk [vmem:[%s5950_s5 + $0x3e] sm:$0x3] %vm3018_vm6, %v2981_v35  ;;  %v2948_v46 = vadd.f32 %v5943_v41, %v2907_v17  ;;  %v4356_v30 = vpop.f32.mrf.mxu1 }
 0x2e8   : > { %3642 = vst.msk [vmem:[%s5950_s5 + $0x3c] sm:$0xf0] %vm3021_vm7, %v2981_v35  ;;  %v2803_v52 = vpop.f32.mrf.mxu0 }
 0x2e9   : > { %v2982_v23 = vmax.f32 %v2948_v46, 0.0  ;;  %v2499_v47 = vpop.f32.mrf.mxu1  ;;  %v2908_v32 = vadd.f32 %v2803_v52, %v2596_v38 }
 0x2ea   : > { %v4425_v29 = vpop.f32.mrf.mxu0  ;;  %v2598_v27 = vadd.f32 %v2499_v47, %v5848_v43 }
 0x2eb   : > { %3643 = vst.msk [vmem:[%s5950_s5 + $0x44] sm:$0xff] %vm3007_vm4, %v2982_v23  ;;  %v2949_v42 = vadd.f32 %v5943_v41, %v2908_v32  ;;  %v4359_v25 = vpop.f32.mrf.mxu1 }
 0x2ec   : > { %v2806_v48 = vpop.f32.mrf.mxu0 }
 0x2ed   : > { %v2983_v31 = vmax.f32 %v2949_v42, 0.0  ;;  %v2502_v50 = vpop.f32.mrf.mxu1  ;;  %v2909_v13 = vadd.f32 %v2806_v48, %v2597_v55 }
 0x2ee   : > { %v4426_v51 = vpop.f32.mrf.mxu0  ;;  %v2599_v8 = vadd.f32 %v2502_v50, %v5860_v16 }
 0x2ef   : > { %3644 = vst.msk [vmem:[%s5950_s5 + $0x4c] sm:$0xff] %vm3007_vm4, %v2983_v31  ;;  %v2950_v26 = vadd.f32 %v5943_v41, %v2909_v13  ;;  %v4360_v57 = vpop.f32.mrf.mxu1 }
 0x2f0   : > { %v2811_v22 = vpop.f32.mrf.mxu0 }
 0x2f1   : > { %v2984_v60 = vmax.f32 %v2950_v26, 0.0  ;;  %v2507_v19 = vpop.f32.mrf.mxu1  ;;  %v2910_v54 = vadd.f32 %v2811_v22, %v2598_v27 }
 0x2f2   : > { %v4429_v12 = vpop.f32.mrf.mxu0  ;;  %v2600_v33 = vadd.f32 %v2507_v19, %v5864_v49 }
 0x2f3   : > { %3645 = vst.msk [vmem:[%s5950_s5 + $0x54] sm:$0xff] %vm3007_vm4, %v2984_v60  ;;  %v2951_v62 = vadd.f32 %v5943_v41, %v2910_v54  ;;  %v4363_v59 = vpop.f32.mrf.mxu1 }
 0x2f4   : > { %v2814_v43 = vpop.f32.mrf.mxu0 }
 0x2f5   : > { %v2985_v40 = vmax.f32 %v2951_v62, 0.0  ;;  %v2510_v36 = vpop.f32.mrf.mxu1  ;;  %v2911_v4 = vadd.f32 %v2814_v43, %v2599_v8 }
 0x2f6   : > { %v4430_v11 = vpop.f32.mrf.mxu0  ;;  %v2601_v0 = vadd.f32 %v2510_v36, %v5876_v63 }
 0x2f7   : > { %3646 = vst.msk [vmem:[%s5950_s5 + $0x5c] sm:$0xf] %vm3026_vm8, %v2985_v40  ;;  %v2952_v16 = vadd.f32 %v5943_v41, %v2911_v4  ;;  %v4364_v20 = vpop.f32.mrf.mxu1 }
 0x2f8   : > { %3647 = vst.msk [vmem:[%s5950_s5 + $0x5a] sm:$0xc0] %vm3029_vm9, %v2985_v40  ;;  %v2819_v39 = vpop.f32.mrf.mxu0 }
 0x2f9   : > { %v2986_v6 = vmax.f32 %v2952_v16, 0.0  ;;  %v2515_v28 = vpop.f32.mrf.mxu1  ;;  %v2912_v53 = vadd.f32 %v2819_v39, %v2600_v33 }
 0x2fa   : > { %v4433_v35 = vpop.f32.mrf.mxu0  ;;  %v2602_v23 = vadd.f32 %v2515_v28, %v5880_v3 }
 0x2fb   : > { %3648 = vst.msk [vmem:[%s5950_s5 + $0x62] sm:$0xff] %vm3007_vm4, %v2986_v6  ;;  %v2953_v17 = vadd.f32 %v5943_v41, %v2912_v53  ;;  %v4367_v49 = vpop.f32.mrf.mxu1 }
 0x2fc   : > { %v2822_v21 = vpop.f32.mrf.mxu0 }
 0x2fd   : > { %v2987_v38 = vmax.f32 %v2953_v17, 0.0  ;;  %v2518_v46 = vpop.f32.mrf.mxu1  ;;  %v2913_v30 = vadd.f32 %v2822_v21, %v2601_v0 }
 0x2fe   : > { %v4434_v52 = vpop.f32.mrf.mxu0  ;;  %v2603_v48 = vadd.f32 %v2518_v46, %v5888_v9 }
 0x2ff   : > { %3649 = vst.msk [vmem:[%s5950_s5 + $0x6a] sm:$0xff] %vm3007_vm4, %v2987_v38  ;;  %v2954_v47 = vadd.f32 %v5943_v41, %v2913_v30  ;;  %v4368_v32 = vpop.f32.mrf.mxu1 }
 0x300   : > { %v2827_v29 = vpop.f32.mrf.mxu0 }
 0x301   : > { %v2988_v63 = vmax.f32 %v2954_v47, 0.0  ;;  %v2523_v55 = vpop.f32.mrf.mxu1  ;;  %v2914_v42 = vadd.f32 %v2827_v29, %v2602_v23 }
 0x302   : > { %v4437_v25 = vpop.f32.mrf.mxu0  ;;  %v2604_v57 = vadd.f32 %v2523_v55, %v5892_v1 }
 0x303   : > { %3650 = vst.msk [vmem:[%s5950_s5 + $0x72] sm:$0xff] %vm3007_vm4, %v2988_v63  ;;  %v2955_v31 = vadd.f32 %v5943_v41, %v2914_v42  ;;  %v4371_v50 = vpop.f32.mrf.mxu1 }
 0x304   : > { %v2830_v3 = vpop.f32.mrf.mxu0 }
 0x305   : > { %v2989_v13 = vmax.f32 %v2955_v31, 0.0  ;;  %v2526_v51 = vpop.f32.mrf.mxu1  ;;  %v2915_v27 = vadd.f32 %v2830_v3, %v2603_v48 }
 0x306   : > { %v4438_v26 = vpop.f32.mrf.mxu0  ;;  %v2605_v62 = vadd.f32 %v2526_v51, %v5895_v34 }
 0x307   : > { %3651 = vst.msk [vmem:[%s5950_s5 + $0x7a] sm:$0x3f] %vm3034_vm10, %v2989_v13  ;;  %v2956_v22 = vadd.f32 %v5943_v41, %v2915_v27  ;;  %v4372_v60 = vpop.f32.mrf.mxu1 }
 0x308   : > { %v2835_v9 = vpop.f32.mrf.mxu0 }
 0x309   : > { %v2990_v19 = vmax.f32 %v2956_v22, 0.0  ;;  %v2531_v54 = vpop.f32.mrf.mxu1  ;;  %v2916_v12 = vadd.f32 %v2835_v9, %v2604_v57 }
 0x30a   : > { %v4441_v8 = vpop.f32.mrf.mxu0  ;;  %v2606_v33 = vadd.f32 %v2531_v54, %v5898_v15 }
 0x30b   : > { %3652 = vst.msk [vmem:[%s5950_s5 + $0x80] sm:$0xff] %vm3007_vm4, %v2990_v19  ;;  %v2957_v59 = vadd.f32 %v5943_v41, %v2916_v12  ;;  %v4375_v43 = vpop.f32.mrf.mxu1 }
 0x30c   : > { %v2838_v1 = vpop.f32.mrf.mxu0 }
 0x30d   : > { %v2991_v40 = vmax.f32 %v2957_v59, 0.0  ;;  %v2534_v36 = vpop.f32.mrf.mxu1  ;;  %v2917_v4 = vadd.f32 %v2838_v1, %v2605_v62 }
 0x30e   : > { %v4442_v11 = vpop.f32.mrf.mxu0  ;;  %v2607_v35 = vadd.f32 %v2534_v36, %v5901_v56 }
 0x30f   : > { %3653 = vst.msk [vmem:[%s5950_s5 + $0x88] sm:$0xff] %vm3007_vm4, %v2991_v40  ;;  %v2958_v16 = vadd.f32 %v5943_v41, %v2917_v4  ;;  %v4376_v20 = vpop.f32.mrf.mxu1 }
 0x310   : > { %v2843_v34 = vpop.f32.mrf.mxu0 }
 0x311   : > { %v2992_v39 = vmax.f32 %v2958_v16, 0.0  ;;  %v2539_v6 = vpop.f32.mrf.mxu1  ;;  %v2918_v28 = vadd.f32 %v2843_v34, %v2606_v33 }
 0x312   : > { %v4445_v53 = vpop.f32.mrf.mxu0  ;;  %v2608_v30 = vadd.f32 %v2539_v6, %v5904_v61 }
 0x313   : > { %3654 = vst.msk [vmem:[%s5950_s5 + $0x90] sm:$0xff] %vm3007_vm4, %v2992_v39  ;;  %v2959_v0 = vadd.f32 %v5943_v41, %v2918_v28  ;;  %v4379_v17 = vpop.f32.mrf.mxu1 }
 0x314   : > { %v2846_v15 = vpop.f32.mrf.mxu0 }
 0x315   : > { %v2993_v49 = vmax.f32 %v2959_v0, 0.0  ;;  %v2542_v21 = vpop.f32.mrf.mxu1  ;;  %v2919_v38 = vadd.f32 %v2846_v15, %v2607_v35 }
 0x316   : > { %v4446_v46 = vpop.f32.mrf.mxu0  ;;  %v2609_v55 = vadd.f32 %v2542_v21, %v5907_v14 }
 0x317   : > { %3655 = vst.msk [vmem:[%s5950_s5 + $0x98] sm:$0xff] %vm3007_vm4, %v2993_v49  ;;  %v2960_v52 = vadd.f32 %v5943_v41, %v2919_v38  ;;  %v4380_v23 = vpop.f32.mrf.mxu1 }
 0x318   : > { %v2851_v56 = vpop.f32.mrf.mxu0 }
 0x319   : > { %v2994_v47 = vmax.f32 %v2960_v52, 0.0  ;;  %v2547_v32 = vpop.f32.mrf.mxu1  ;;  %v2920_v29 = vadd.f32 %v2851_v56, %v2608_v30 }
 0x31a   : > { %v4449_v63 = vpop.f32.mrf.mxu0  ;;  %v2610_v13 = vadd.f32 %v2547_v32, %v5910_v24 }
 0x31b   : > { %3656 = vst.msk [vmem:[%s5950_s5 + $0x9e] sm:$0xfc] %vm3013_vm5, %v2994_v47  ;;  %v2961_v42 = vadd.f32 %v5943_v41, %v2920_v29  ;;  %v4383_v25 = vpop.f32.mrf.mxu1 }
 0x31c   : > { %v2854_v61 = vpop.f32.mrf.mxu0 }
 0x31d   : > { %v2995_v48 = vmax.f32 %v2961_v42, 0.0  ;;  %v2550_v31 = vpop.f32.mrf.mxu1  ;;  %v2921_v50 = vadd.f32 %v2854_v61, %v2609_v55 }
 0x31e   : > { %v4450_v3 = vpop.f32.mrf.mxu0  ;;  %v2611_v9 = vadd.f32 %v2550_v31, %v5913_v5 }
 0x31f   : > { %3657 = vst.msk [vmem:[%s5950_s5 + $0xa6] sm:$0xff] %vm3007_vm4, %v2995_v48  ;;  %v2962_v51 = vadd.f32 %v5943_v41, %v2921_v50  ;;  %v4384_v27 = vpop.f32.mrf.mxu1 }
 0x320   : > { %v2859_v14 = vpop.f32.mrf.mxu0 }
 0x321   : > { %v2996_v26 = vmax.f32 %v2962_v51, 0.0  ;;  %v2555_v57 = vpop.f32.mrf.mxu1  ;;  %v2922_v22 = vadd.f32 %v2859_v14, %v2610_v13 }
 0x322   : > { %v4453_v60 = vpop.f32.mrf.mxu0  ;;  %v2612_v43 = vadd.f32 %v2555_v57, %v5916_v7 }
 0x323   : > { %3658 = vst.msk [vmem:[%s5950_s5 + $0xae] sm:$0xff] %vm3007_vm4, %v2996_v26  ;;  %v2963_v19 = vadd.f32 %v5943_v41, %v2922_v22  ;;  %v4387_v54 = vpop.f32.mrf.mxu1 }
 0x324   : > { %v2862_v24 = vpop.f32.mrf.mxu0 }
 0x325   : > { %v2997_v12 = vmax.f32 %v2963_v19, 0.0  ;;  %v2558_v8 = vpop.f32.mrf.mxu1  ;;  %v2923_v62 = vadd.f32 %v2862_v24, %v2611_v9 }
 0x326   : > { %v4454_v59 = vpop.f32.mrf.mxu0  ;;  %v2613_v16 = vadd.f32 %v2558_v8, %v5919_v2 }
 0x327   : > { %3659 = vst.msk [vmem:[%s5950_s5 + $0xb6] sm:$0xff] %vm3007_vm4, %v2997_v12  ;;  %v2964_v1 = vadd.f32 %v5943_v41, %v2923_v62  ;;  %v4388_v40 = vpop.f32.mrf.mxu1 }
 0x328   : > { %v2867_v5 = vpop.f32.mrf.mxu0 }
 0x329   : > { %v2998_v36 = vmax.f32 %v2964_v1, 0.0  ;;  %v2563_v4 = vpop.f32.mrf.mxu1  ;;  %v2924_v11 = vadd.f32 %v2867_v5, %v2612_v43 }
 0x32a   : > { %v4457_v33 = vpop.f32.mrf.mxu0  ;;  %v2614_v35 = vadd.f32 %v2563_v4, %v5922_v44 }
 0x32b   : > { %3660 = vst.msk [vmem:[%s5950_s5 + $0xbe] sm:$0x3] %vm3018_vm6, %v2998_v36  ;;  %v2965_v20 = vadd.f32 %v5943_v41, %v2924_v11  ;;  %v4391_v7 = vpop.f32.mrf.mxu1 }
 0x32c   : > { %3661 = vst.msk [vmem:[%s5950_s5 + $0xbc] sm:$0xf0] %vm3021_vm7, %v2998_v36  ;;  %v2870_v34 = vpop.f32.mrf.mxu0 }
 0x32d   : > { %v2999_v39 = vmax.f32 %v2965_v20, 0.0  ;;  %v2566_v6 = vpop.f32.mrf.mxu1  ;;  %v2925_v28 = vadd.f32 %v2870_v34, %v2613_v16 }
 0x32e   : > { %v4458_v53 = vpop.f32.mrf.mxu0  ;;  %v2615_v46 = vadd.f32 %v2566_v6, %v5925_v10 }
 0x32f   : > { %3662 = vst.msk [vmem:[%s5950_s5 + $0xc4] sm:$0xff] %vm3007_vm4, %v2999_v39  ;;  %v2966_v0 = vadd.f32 %v5943_v41, %v2925_v28  ;;  %v4392_v2 = vpop.f32.mrf.mxu1 }
 0x330   : > { %v2875_v17 = vpop.f32.mrf.mxu0 }
 0x331   : > { %v3000_v15 = vmax.f32 %v2966_v0, 0.0  ;;  %v2571_v49 = vpop.f32.mrf.mxu1  ;;  %v2926_v21 = vadd.f32 %v2875_v17, %v2614_v35 }
 0x332   : > { %v4461_v38 = vpop.f32.mrf.mxu0  ;;  %v2616_v29 = vadd.f32 %v2571_v49, %v5928_v37 }
 0x333   : > { %3663 = vst.msk [vmem:[%s5950_s5 + $0xcc] sm:$0xff] %vm3007_vm4, %v3000_v15  ;;  %v2967_v30 = vadd.f32 %v5943_v41, %v2926_v21  ;;  %v4395_v52 = vpop.f32.mrf.mxu1 }
 0x334   : > { %v2878_v44 = vpop.f32.mrf.mxu0 }
 0x335   : > { %v3001_v23 = vmax.f32 %v2967_v30, 0.0  ;;  %v2574_v56 = vpop.f32.mrf.mxu1  ;;  %v2927_v47 = vadd.f32 %v2878_v44, %v2615_v46 }
 0x336   : > { %v4462_v32 = vpop.f32.mrf.mxu0  ;;  %v2617_v31 = vadd.f32 %v2574_v56, %v5931_v58 }
 0x337   : > { %3664 = vst.msk [vmem:[%s5950_s5 + $0xd4] sm:$0xff] %vm3007_vm4, %v3001_v23  ;;  %v2968_v63 = vadd.f32 %v5943_v41, %v2927_v47  ;;  %v4396_v55 = vpop.f32.mrf.mxu1 }
 0x338   : > { %v2883_v10 = vpop.f32.mrf.mxu0 }
 0x339   : > { %v3002_v42 = vmax.f32 %v2968_v63, 0.0  ;;  %v2579_v25 = vpop.f32.mrf.mxu1  ;;  %v2928_v61 = vadd.f32 %v2883_v10, %v2616_v29 }
 0x33a   : > { %v4465_v48 = vpop.f32.mrf.mxu0  ;;  %v2618_v26 = vadd.f32 %v2579_v25, %v5934_v45 }
 0x33b   : > { %3665 = vst.msk [vmem:[%s5950_s5 + $0xdc] sm:$0xf] %vm3026_vm8, %v3002_v42  ;;  %v2969_v37 = vadd.f32 %v5943_v41, %v2928_v61  ;;  %v4399_v50 = vpop.f32.mrf.mxu1 }
 0x33c   : > { %3666 = vst.msk [vmem:[%s5950_s5 + $0xda] sm:$0xc0] %vm3029_vm9, %v3002_v42  ;;  %v2886_v3 = vpop.f32.mrf.mxu0 }
 0x33d   : > { %v3003_v13 = vmax.f32 %v2969_v37, 0.0  ;;  %v2582_v51 = vpop.f32.mrf.mxu1  ;;  %v2929_v27 = vadd.f32 %v2886_v3, %v2617_v31 }
 0x33e   : > { %v4466_v14 = vpop.f32.mrf.mxu0  ;;  %v2619_v54 = vadd.f32 %v2582_v51, %v5936_v18 }
 0x33f   : > { %3667 = vst.msk [vmem:[%s5950_s5 + $0xe2] sm:$0xff] %vm3007_vm4, %v3003_v13  ;;  %v2970_v57 = vadd.f32 %v5943_v41, %v2929_v27  ;;  %v4400_v58 = vpop.f32.mrf.mxu1 }
 0x340   : > { %v2891_v22 = vpop.f32.mrf.mxu0 }
 0x341   : > { %v3004_v60 = vmax.f32 %v2970_v57, 0.0  ;;  %v2930_v9 = vadd.f32 %v2891_v22, %v2618_v26 }
 0x342   : > { %v4469_v19 = vpop.f32.mrf.mxu0 }
 0x343   : > { %3668 = vst.msk [vmem:[%s5950_s5 + $0xea] sm:$0xff] %vm3007_vm4, %v3004_v60  ;;  %v2971_v45 = vadd.f32 %v5943_v41, %v2930_v9 }
 0x344   : > { %v2894_v24 = vpop.f32.mrf.mxu0 }
 0x345   : > { %v3005_v12 = vmax.f32 %v2971_v45, 0.0  ;;  %v2931_v8 = vadd.f32 %v2894_v24, %v2619_v54 }
 0x346   : > { %v4470_v62 = vpop.f32.mrf.mxu0 }
 0x347   : > { %3669 = vst.msk [vmem:[%s5950_s5 + $0xf2] sm:$0xff] %vm3007_vm4, %v3005_v12  ;;  %v2972_v59 = vadd.f32 %v5943_v41, %v2931_v8 }
 0x349   : > { %v3006_v18 = vmax.f32 %v2972_v59, 0.0 }
 0x34b   : > { %3670 = vst.msk [vmem:[%s5950_s5 + $0xfa] sm:$0x3f] %vm3034_vm10, %v3006_v18 }
 0x34c   : > { %4563 = shalt.err (!%p4560_p6)
}
 0x34d   : > { %s4564_s27 = scalar_lea.hbm %s6096_s11, 4096  ;;  %s4568_s6 = scalar_lea.hbm %s6158_s3, 32768 }
 0x34e   : > { %p4565_p7 = scmp.ne.s32.totalorder %s6096_s11, %s4564_s27  ;;  %p4569_p11 = scmp.lt.s32.totalorder %s6096_s11, %s6158_s3 }
 0x34f   : > { %p4570_p12 = scmp.lt.s32.totalorder %s4568_s6, %s4564_s27 }
 0x350   : > { %p4566_p9 = pnand %p4565_p7, %p4721_p3 }
 0x351   : > { %p4571_p13 = por %p4570_p12, %p4569_p11 }
 0x352   : > { %p4567_p10 = pneg %p4566_p9 }
 0x354   : > { %p4572_p0 = pnand %p4571_p13, %p4567_p10 }
 0x356   : > { %4575 = shalt.err (!%p4572_p0)
}
 0x357   : > { %s4648_s15 = smov 128   ;;  %s4649_s16 = smov 8  }
 0x358   : > { %4474 = dma.vmem_to_hbm [thread:$0]  (%p4721_p3), %s6098_s9, 4096, %s6096_s11, %s6104_s20, %s4648_s15, %s4648_s15, %s4649_s16  }
 0x359 PF: > { %p4480_p1 = scmp.ge.s32.totalorder %s4642_s19, 2  ;;  %s3091_s10 = sand.u32 1, %s4614_s12  }
 0x35a   : > { %s3092_s21 = scalar_lea.sflag [#allocation3], %s3091_s10 }
 0x35b   : > { %p4477_p2 = pnand %p4480_p1, %p4730_p8 }
 0x35d   : > { %p4478_p4 = pneg %p4477_p2 }
 0x35f   : > { %4609 = dma.done.wait (%p4478_p4), %s3092_s21, 4096  }
 0x360   : > { %4611 = vsyncadd (%p4478_p4), %s3092_s21, 4294963200  ;;  %s16_s19 = sadd.s32 1, %s4642_s19   ;;  %s6161_s12 = smov %s4618_s13 }
 0x361   : > { %p13_p5 = scmp.ge.s32.totalorder %s16_s19, 10   ;;  %s6162_s13 = smov %s4622_s14 }
 0x362   : > { %s6163_s14 = smov %s4739_s30  ;;  %s6164_s15 = smov %s4634_s17 }
 0x363   : > { %s6165_s16 = smov %s4638_s18  ;;  %s6166_s17 = smov %s6169_s22 }
 0x364   : > { %s6167_s18 = smov %s6173_s23  ;;  %15 = sbr.rel (!%p13_p5) target bundleno = 5 (0x5), region = 91 }
 0x369   :  { %3097 = vsyncpa [#allocation3], 1 }
 0x36a   :  { %3099 = vsyncpa [#allocation3 + $0x1], 1 }

</bundles_post_ra>
